<compile_context>
chip_gen: v7x
topology: tpu7x:2x2x1
jax: 0.10.0
libtpu: 0.0.40
codegen_flags: <defaults>
</compile_context>

<pallas_src>
from functools import partial

import jax
import jax.numpy as jnp
from jax.experimental import pallas as pl
from jax.experimental.pallas import tpu as pltpu

LANE = 128      # lane width  (channel padding target)
SUBLANE = 8     # sublane width (W-axis alignment)


def _round_up(x, m):
    return (x + m - 1) // m * m


def _silu(x):
    return x * jax.nn.sigmoid(x)


# ---------------- Fused Pallas kernel (B_blk images per grid step) ----------------

def bottleneck_kernel(x_ref, w1_ref, b1_ref, w2_ref, b2_ref, w3_ref, b3_ref,
                      o_ref, h1p_ref, *, d, pad_left):
    # x_ref / o_ref : (B, H, W, Cin_p)   NHWC block, channels padded to 128
    # w1: (Cin_p, Cmid_p)   w2: (9*Cmid_p, Cmid_p)  im2col-folded HWIO
    # w3: (Cmid_p, Cin_p)   b*: (1, C_p)            (BN scale/shift folded in)
    # h1p_ref: VMEM scratch (B, H+2d, Wbuf, Cmid_p) zero-bordered halo
    B, H, W, Cin = o_ref.shape
    _, Hbuf, Wbuf, Cmid = h1p_ref.shape
    M = B * H * W
    f32 = jnp.float32

    # ---- conv1: 1x1 (+ folded BN) + SiLU -- channels on lane axis -> MXU matmul
    x2d = x_ref[...].reshape(M, Cin)
    h1 = _silu(jnp.dot(x2d, w1_ref[...], preferred_element_type=f32) + b1_ref[...])

    # ---- stage h1 into the halo buffer (stays on-chip) ------------------------
    # Zero ONLY the thin border strips (not the whole buffer).  Done every step
    # (not @pl.when(program_id==0)): with a "parallel" grid axis each TensorCore
    # owns its own scratch, so a step-0 guard would leave one core's border
    # uninitialised.  Cost is ~d rows/cols of zeros per image -> negligible.
    h1p_ref[:, 0:d, :, :] = jnp.zeros((B, d, Wbuf, Cmid), f32)
    h1p_ref[:, d + H:Hbuf, :, :] = jnp.zeros((B, Hbuf - (d + H), Wbuf, Cmid), f32)
    h1p_ref[:, :, pad_left - d:pad_left, :] = jnp.zeros((B, Hbuf, d, Cmid), f32)
    h1p_ref[:, :, pad_left + W:pad_left + W + d, :] = jnp.zeros((B, Hbuf, d, Cmid), f32)
    # Interior write: W offset `pad_left` is a multiple of 8 -> sublane-aligned.
    h1p_ref[:, d:d + H, pad_left:pad_left + W, :] = h1.reshape(B, H, W, Cmid)

    # ---- conv2: 3x3 dilation-d conv as ONE deep MXU matmul (full im2col) ------
    # cols[(b,h,w), (kh*3+kw)*Cmid + c] = h1_padded[b, h+(kh-1)d, w+(kw-1)d, c]
    cols = jnp.concatenate(
        [h1p_ref[:, kh * d:kh * d + H,
                 pad_left + (kw - 1) * d:pad_left + (kw - 1) * d + W, :]
         for kh in range(3) for kw in range(3)],
        axis=-1)                                           # (B, H, W, 9*Cmid)
    h2 = _silu(jnp.dot(cols.reshape(M, 9 * Cmid), w2_ref[...],
                       preferred_element_type=f32) + b2_ref[...])

    # ---- conv3: 1x1 (+ folded BN) + SiLU + residual ---------------------------
    y = _silu(jnp.dot(h2, w3_ref[...], preferred_element_type=f32) + b3_ref[...])
    o_ref[...] = (y + x2d).reshape(B, H, W, Cin).astype(o_ref.dtype)


# ---------------- Parameter setup (deterministic, synthetic, BN folded) --------

def init_params(key, in_channels, mid_channels):
    """Logical (unpadded) folded conv+BN params: w1(Ci,Cm), w2(3,3,Cm,Cm) HWIO,
    w3(Cm,Ci), biases (C,)."""
    ks = jax.random.split(key, 9)
    f32 = jnp.float32

    def bn(k, c):
        k1, k2, k3, k4 = jax.random.split(k, 4)
        gamma = 1.0 + 0.1 * jax.random.normal(k1, (c,), f32)
        beta = 0.1 * jax.random.normal(k2, (c,), f32)
        mean = 0.1 * jax.random.normal(k3, (c,), f32)
        var = jax.random.uniform(k4, (c,), f32, 0.5, 1.5)
        return gamma, beta, mean, var

    def fold(w, conv_b, gamma, beta, mean, var, eps=1e-5):
        # BN(conv(x)) = conv(x)*scale + shift; scale folds into the weight's
        # OUTPUT-channel (last) axis, leaving a single per-channel bias.
        scale = gamma / jnp.sqrt(var + eps)
        return w * scale, (conv_b - mean) * scale + beta

    w1 = 0.1 * jax.random.normal(ks[0], (in_channels, mid_channels), f32)
    b1 = 0.05 * jax.random.normal(ks[1], (mid_channels,), f32)
    w1, b1 = fold(w1, b1, *bn(ks[2], mid_channels))

    w2 = 0.1 * jax.random.normal(ks[3], (3, 3, mid_channels, mid_channels), f32)
    b2 = 0.05 * jax.random.normal(ks[4], (mid_channels,), f32)
    w2, b2 = fold(w2, b2, *bn(ks[5], mid_channels))

    w3 = 0.1 * jax.random.normal(ks[6], (mid_channels, in_channels), f32)
    b3 = 0.05 * jax.random.normal(ks[7], (in_channels,), f32)
    w3, b3 = fold(w3, b3, *bn(ks[8], in_channels))

    return dict(w1=w1, b1=b1, w2=w2, b2=b2, w3=w3, b3=b3)


def _pad_axis(a, axis, new_size):
    if a.shape[axis] == new_size:
        return a
    pad = [(0, 0)] * a.ndim
    pad[axis] = (0, new_size - a.shape[axis])
    return jnp.pad(a, pad)


def prepare_kernel_params(params, cin_p, cmid_p):
    """Zero-pad channels to lane multiples and fold w2 into im2col layout."""
    w1 = _pad_axis(_pad_axis(params["w1"], 0, cin_p), 1, cmid_p)
    w2 = _pad_axis(_pad_axis(params["w2"], 2, cmid_p), 3, cmid_p)
    w2 = w2.reshape(9 * cmid_p, cmid_p)                    # (kh,kw,cin) -> K axis
    w3 = _pad_axis(_pad_axis(params["w3"], 0, cmid_p), 1, cin_p)
    b1 = _pad_axis(params["b1"], 0, cmid_p)[None, :]
    b2 = _pad_axis(params["b2"], 0, cmid_p)[None, :]
    b3 = _pad_axis(params["b3"], 0, cin_p)[None, :]
    return w1, b1, w2, b2, w3, b3


# ---------------- Forward wrapper (NHWC in / NHWC out, no HBM transposes) ------

def bottleneck_forward(x_nhwc, params, dilation=1, images_per_block=None):
    N, H, W, Cin = x_nhwc.shape
    Cmid = params["w1"].shape[1]
    d = int(dilation)

    cin_p = _round_up(Cin, LANE)
    cmid_p = _round_up(Cmid, LANE)
    w1, b1, w2, b2, w3, b3 = prepare_kernel_params(params, cin_p, cmid_p)
    x_p = _pad_axis(x_nhwc, 3, cin_p)          # no-op at production channel counts

    # Images per grid step: big enough to amortise ~0.35us/step overhead, small
    # enough to keep >=2 steps (megacore balance + DMA/compute overlap).
    if images_per_block is None:
        per_img = H * W * cin_p * 4
        b_blk = max(1, min(N, (2 << 20) // max(per_img, 1)))
        while b_blk > 1 and (N // b_blk) < 2:
            b_blk -= 1
        while N % b_blk:
            b_blk -= 1
    else:
        b_blk = int(images_per_block)
        assert N % b_blk == 0
    grid = (N // b_blk,)

    # Halo buffer geometry: interior written at (d, pad_left); pad_left is a
    # multiple of 8 so the per-step store (and centre im2col window) is aligned.
    pad_left = _round_up(d, SUBLANE)
    hbuf = H + 2 * d
    wbuf = _round_up(pad_left + W + d, SUBLANE)

    def const_spec(a):
        # full-array operand, same block every grid step (fetched once)
        return pl.BlockSpec(a.shape, lambda n: (0,) * a.ndim)

    out = pl.pallas_call(
        partial(bottleneck_kernel, d=d, pad_left=pad_left),
        out_shape=jax.ShapeDtypeStruct((N, H, W, cin_p), jnp.float32),
        grid_spec=pltpu.PrefetchScalarGridSpec(
            num_scalar_prefetch=0,
            grid=grid,
            in_specs=[
                pl.BlockSpec((b_blk, H, W, cin_p), lambda n: (n, 0, 0, 0)),
                const_spec(w1), const_spec(b1),
                const_spec(w2), const_spec(b2),
                const_spec(w3), const_spec(b3),
            ],
            out_specs=pl.BlockSpec((b_blk, H, W, cin_p), lambda n: (n, 0, 0, 0)),
            scratch_shapes=[pltpu.VMEM((b_blk, hbuf, wbuf, cmid_p), jnp.float32)],
        ),
        compiler_params=pltpu.CompilerParams(
            dimension_semantics=("parallel",)),            # v7x: batch over 2 TCs
    )(x_p, w1, b1, w2, b2, w3, b3)

    return out[..., :Cin] if cin_p != Cin else out


# ---------------- Pure-JAX reference (for correctness check, NHWC) -------------

def bottleneck_ref(x_nhwc, params, dilation=1):
    d = dilation

    def pw(h, w, b):
        return _silu(jnp.einsum("nhwc,co->nhwo", h, w) + b)

    h = pw(x_nhwc, params["w1"], params["b1"])
    h = jax.lax.conv_general_dilated(
        h, params["w2"], window_strides=(1, 1), padding=[(d, d), (d, d)],
        rhs_dilation=(d, d), dimension_numbers=("NHWC", "HWIO", "NHWC"))
    h = _silu(h + params["b2"])
    h = pw(h, params["w3"], params["b3"]) + x_nhwc
    return h


if __name__ == "__main__":
    # Small shapes consistent with the module (in/mid channels scaled down).
    # Kernel-facing layout is NHWC (channels-last); the PyTorch NCHW input
    # (2, 64, 16, 16) corresponds to (2, 16, 16, 64) here — same conv math.
    N, Cin, Cmid, H, W, dilation = 2, 64, 32, 16, 16, 1

    key = jax.random.PRNGKey(0)
    kx, kp = jax.random.split(key)
    x = jax.random.normal(kx, (N, H, W, Cin), jnp.float32)
    params = init_params(kp, Cin, Cmid)

    fwd = jax.jit(partial(bottleneck_forward, dilation=dilation))
    out = jax.block_until_ready(fwd(x, params))

    ref = bottleneck_ref(x, params, dilation)
    assert out.shape == (N, H, W, Cin)
    assert jnp.allclose(out, ref, atol=1e-3, rtol=1e-3), "mismatch vs reference"

    print("KERNEL_OK")
</pallas_src>

<mosaic_0001>
module attributes {stable_mosaic.version = 11 : i64} {
  func.func @bottleneck_kernel(%arg0: i32, %arg1: memref<1x16x16x128xf32, #tpu.memory_space<vmem>>, %arg2: memref<128x128xf32, #tpu.memory_space<vmem>>, %arg3: memref<1x128xf32, #tpu.memory_space<vmem>>, %arg4: memref<1152x128xf32, #tpu.memory_space<vmem>>, %arg5: memref<1x128xf32, #tpu.memory_space<vmem>>, %arg6: memref<128x128xf32, #tpu.memory_space<vmem>>, %arg7: memref<1x128xf32, #tpu.memory_space<vmem>>, %arg8: memref<1x16x16x128xf32, #tpu.memory_space<vmem>>, %arg9: memref<1x18x32x128xf32, #tpu.memory_space<vmem>>) attributes {dimension_semantics = [#tpu.dimension_semantics<parallel>], iteration_bounds = array<i64: 2>, scalar_prefetch = 0 : i64, scratch_operands = 1 : i64, tpu.core_type = #tpu.core_type<tc>, window_params = [{transform_indices = @transform_0, window_bounds = array<i64: 1, 16, 16, 128>}, {pipeline_mode = #tpu.pipeline_mode<synchronous>, transform_indices = @transform_1, window_bounds = array<i64: 128, 128>}, {pipeline_mode = #tpu.pipeline_mode<synchronous>, transform_indices = @transform_2, window_bounds = array<i64: 1, 128>}, {pipeline_mode = #tpu.pipeline_mode<synchronous>, transform_indices = @transform_3, window_bounds = array<i64: 1152, 128>}, {pipeline_mode = #tpu.pipeline_mode<synchronous>, transform_indices = @transform_4, window_bounds = array<i64: 1, 128>}, {pipeline_mode = #tpu.pipeline_mode<synchronous>, transform_indices = @transform_5, window_bounds = array<i64: 128, 128>}, {pipeline_mode = #tpu.pipeline_mode<synchronous>, transform_indices = @transform_6, window_bounds = array<i64: 1, 128>}, {transform_indices = @transform_7, window_bounds = array<i64: 1, 16, 16, 128>}]} {
    %c0 = arith.constant 0 : index
    %c0_0 = arith.constant 0 : index
    %c0_1 = arith.constant 0 : index
    %c0_2 = arith.constant 0 : index
    %0 = vector.load %arg1[%c0, %c0_0, %c0_1, %c0_2] : memref<1x16x16x128xf32, #tpu.memory_space<vmem>>, vector<1x16x16x128xf32>
    %1 = vector.shape_cast %0 : vector<1x16x16x128xf32> to vector<256x128xf32>
    %c0_3 = arith.constant 0 : index
    %c0_4 = arith.constant 0 : index
    %2 = vector.load %arg2[%c0_3, %c0_4] : memref<128x128xf32, #tpu.memory_space<vmem>>, vector<128x128xf32>
    %cst = arith.constant dense<0.000000e+00> : vector<256x128xf32>
    %3 = tpu.matmul %1, %2, %cst {dimension_numbers = #tpu.dot_dimension_numbers<[1], [0], [0], [1], [0, 0, 1, 1], [], []>} : vector<256x128xf32>, vector<128x128xf32>, vector<256x128xf32> -> vector<256x128xf32>
    %c0_5 = arith.constant 0 : index
    %c0_6 = arith.constant 0 : index
    %4 = vector.load %arg3[%c0_5, %c0_6] : memref<1x128xf32, #tpu.memory_space<vmem>>, vector<1x128xf32>
    %5 = vector.broadcast %4 : vector<1x128xf32> to vector<256x128xf32>
    %6 = arith.addf %3, %5 : vector<256x128xf32>
    %7 = arith.negf %6 : vector<256x128xf32>
    %8 = math.exp %7 : vector<256x128xf32>
    %cst_7 = arith.constant 1.000000e+00 : f32
    %9 = vector.broadcast %cst_7 : f32 to vector<256x128xf32>
    %10 = arith.addf %9, %8 : vector<256x128xf32>
    %11 = arith.divf %9, %10 : vector<256x128xf32>
    %12 = arith.mulf %6, %11 : vector<256x128xf32>
    %cst_8 = arith.constant 0.000000e+00 : f32
    %13 = vector.broadcast %cst_8 : f32 to vector<1x1x32x128xf32>
    %c0_9 = arith.constant 0 : index
    %c0_10 = arith.constant 0 : index
    %c0_11 = arith.constant 0 : index
    %c0_12 = arith.constant 0 : index
    %14 = vector.load %arg9[%c0_9, %c0_10, %c0_11, %c0_12] : memref<1x18x32x128xf32, #tpu.memory_space<vmem>>, vector<1x1x32x128xf32>
    tpu.vector_store %arg9[%c0_9, %c0_10, %c0_11, %c0_12], %13 {strides = array<i32>} : memref<1x18x32x128xf32, #tpu.memory_space<vmem>>, vector<1x1x32x128xf32>,
    %cst_13 = arith.constant 0.000000e+00 : f32
    %15 = vector.broadcast %cst_13 : f32 to vector<1x1x32x128xf32>
    %c0_14 = arith.constant 0 : index
    %c17 = arith.constant 17 : index
    %c0_15 = arith.constant 0 : index
    %c0_16 = arith.constant 0 : index
    %16 = vector.load %arg9[%c0_14, %c17, %c0_15, %c0_16] : memref<1x18x32x128xf32, #tpu.memory_space<vmem>>, vector<1x1x32x128xf32>
    tpu.vector_store %arg9[%c0_14, %c17, %c0_15, %c0_16], %15 {strides = array<i32>} : memref<1x18x32x128xf32, #tpu.memory_space<vmem>>, vector<1x1x32x128xf32>,
    %cst_17 = arith.constant 0.000000e+00 : f32
    %17 = vector.broadcast %cst_17 : f32 to vector<1x18x1x128xf32>
    %c0_18 = arith.constant 0 : index
    %c0_19 = arith.constant 0 : index
    %c7 = arith.constant 7 : index
    %c0_20 = arith.constant 0 : index
    %18 = vector.load %arg9[%c0_18, %c0_19, %c7, %c0_20] : memref<1x18x32x128xf32, #tpu.memory_space<vmem>>, vector<1x18x1x128xf32>
    tpu.vector_store %arg9[%c0_18, %c0_19, %c7, %c0_20], %17 {strides = array<i32>} : memref<1x18x32x128xf32, #tpu.memory_space<vmem>>, vector<1x18x1x128xf32>,
    %cst_21 = arith.constant 0.000000e+00 : f32
    %19 = vector.broadcast %cst_21 : f32 to vector<1x18x1x128xf32>
    %c0_22 = arith.constant 0 : index
    %c0_23 = arith.constant 0 : index
    %c24 = arith.constant 24 : index
    %c0_24 = arith.constant 0 : index
    %20 = vector.load %arg9[%c0_22, %c0_23, %c24, %c0_24] : memref<1x18x32x128xf32, #tpu.memory_space<vmem>>, vector<1x18x1x128xf32>
    tpu.vector_store %arg9[%c0_22, %c0_23, %c24, %c0_24], %19 {strides = array<i32>} : memref<1x18x32x128xf32, #tpu.memory_space<vmem>>, vector<1x18x1x128xf32>,
    %21 = vector.shape_cast %12 : vector<256x128xf32> to vector<1x16x16x128xf32>
    %c0_25 = arith.constant 0 : index
    %c1 = arith.constant 1 : index
    %c8 = arith.constant 8 : index
    %c0_26 = arith.constant 0 : index
    %22 = vector.load %arg9[%c0_25, %c1, %c8, %c0_26] : memref<1x18x32x128xf32, #tpu.memory_space<vmem>>, vector<1x16x16x128xf32>
    tpu.vector_store %arg9[%c0_25, %c1, %c8, %c0_26], %21 {strides = array<i32>} : memref<1x18x32x128xf32, #tpu.memory_space<vmem>>, vector<1x16x16x128xf32>,
    %c0_27 = arith.constant 0 : index
    %c0_28 = arith.constant 0 : index
    %c7_29 = arith.constant 7 : index
    %c0_30 = arith.constant 0 : index
    %23 = vector.load %arg9[%c0_27, %c0_28, %c7_29, %c0_30] : memref<1x18x32x128xf32, #tpu.memory_space<vmem>>, vector<1x16x16x128xf32>
    %c0_31 = arith.constant 0 : index
    %c0_32 = arith.constant 0 : index
    %c8_33 = arith.constant 8 : index
    %c0_34 = arith.constant 0 : index
    %24 = vector.load %arg9[%c0_31, %c0_32, %c8_33, %c0_34] : memref<1x18x32x128xf32, #tpu.memory_space<vmem>>, vector<1x16x16x128xf32>
    %c0_35 = arith.constant 0 : index
    %c0_36 = arith.constant 0 : index
    %c9 = arith.constant 9 : index
    %c0_37 = arith.constant 0 : index
    %25 = vector.load %arg9[%c0_35, %c0_36, %c9, %c0_37] : memref<1x18x32x128xf32, #tpu.memory_space<vmem>>, vector<1x16x16x128xf32>
    %c0_38 = arith.constant 0 : index
    %c1_39 = arith.constant 1 : index
    %c7_40 = arith.constant 7 : index
    %c0_41 = arith.constant 0 : index
    %26 = vector.load %arg9[%c0_38, %c1_39, %c7_40, %c0_41] : memref<1x18x32x128xf32, #tpu.memory_space<vmem>>, vector<1x16x16x128xf32>
    %c0_42 = arith.constant 0 : index
    %c1_43 = arith.constant 1 : index
    %c8_44 = arith.constant 8 : index
    %c0_45 = arith.constant 0 : index
    %27 = vector.load %arg9[%c0_42, %c1_43, %c8_44, %c0_45] : memref<1x18x32x128xf32, #tpu.memory_space<vmem>>, vector<1x16x16x128xf32>
    %c0_46 = arith.constant 0 : index
    %c1_47 = arith.constant 1 : index
    %c9_48 = arith.constant 9 : index
    %c0_49 = arith.constant 0 : index
    %28 = vector.load %arg9[%c0_46, %c1_47, %c9_48, %c0_49] : memref<1x18x32x128xf32, #tpu.memory_space<vmem>>, vector<1x16x16x128xf32>
    %c0_50 = arith.constant 0 : index
    %c2 = arith.constant 2 : index
    %c7_51 = arith.constant 7 : index
    %c0_52 = arith.constant 0 : index
    %29 = vector.load %arg9[%c0_50, %c2, %c7_51, %c0_52] : memref<1x18x32x128xf32, #tpu.memory_space<vmem>>, vector<1x16x16x128xf32>
    %c0_53 = arith.constant 0 : index
    %c2_54 = arith.constant 2 : index
    %c8_55 = arith.constant 8 : index
    %c0_56 = arith.constant 0 : index
    %30 = vector.load %arg9[%c0_53, %c2_54, %c8_55, %c0_56] : memref<1x18x32x128xf32, #tpu.memory_space<vmem>>, vector<1x16x16x128xf32>
    %c0_57 = arith.constant 0 : index
    %c2_58 = arith.constant 2 : index
    %c9_59 = arith.constant 9 : index
    %c0_60 = arith.constant 0 : index
    %31 = vector.load %arg9[%c0_57, %c2_58, %c9_59, %c0_60] : memref<1x18x32x128xf32, #tpu.memory_space<vmem>>, vector<1x16x16x128xf32>
    %32 = tpu.concatenate %23, %24, %25, %26, %27, %28, %29, %30, %31 in 3 : vector<1x16x16x128xf32>, vector<1x16x16x128xf32>, vector<1x16x16x128xf32>, vector<1x16x16x128xf32>, vector<1x16x16x128xf32>, vector<1x16x16x128xf32>, vector<1x16x16x128xf32>, vector<1x16x16x128xf32>, vector<1x16x16x128xf32> -> vector<1x16x16x1152xf32>
    %33 = vector.shape_cast %32 : vector<1x16x16x1152xf32> to vector<256x1152xf32>
    %c0_61 = arith.constant 0 : index
    %c0_62 = arith.constant 0 : index
    %34 = vector.load %arg4[%c0_61, %c0_62] : memref<1152x128xf32, #tpu.memory_space<vmem>>, vector<1152x128xf32>
    %cst_63 = arith.constant dense<0.000000e+00> : vector<256x128xf32>
    %35 = tpu.matmul %33, %34, %cst_63 {dimension_numbers = #tpu.dot_dimension_numbers<[1], [0], [0], [1], [0, 0, 1, 1], [], []>} : vector<256x1152xf32>, vector<1152x128xf32>, vector<256x128xf32> -> vector<256x128xf32>
    %c0_64 = arith.constant 0 : index
    %c0_65 = arith.constant 0 : index
    %36 = vector.load %arg5[%c0_64, %c0_65] : memref<1x128xf32, #tpu.memory_space<vmem>>, vector<1x128xf32>
    %37 = vector.broadcast %36 : vector<1x128xf32> to vector<256x128xf32>
    %38 = arith.addf %35, %37 : vector<256x128xf32>
    %39 = arith.negf %38 : vector<256x128xf32>
    %40 = math.exp %39 : vector<256x128xf32>
    %cst_66 = arith.constant 1.000000e+00 : f32
    %41 = vector.broadcast %cst_66 : f32 to vector<256x128xf32>
    %42 = arith.addf %41, %40 : vector<256x128xf32>
    %43 = arith.divf %41, %42 : vector<256x128xf32>
    %44 = arith.mulf %38, %43 : vector<256x128xf32>
    %c0_67 = arith.constant 0 : index
    %c0_68 = arith.constant 0 : index
    %45 = vector.load %arg6[%c0_67, %c0_68] : memref<128x128xf32, #tpu.memory_space<vmem>>, vector<128x128xf32>
    %cst_69 = arith.constant dense<0.000000e+00> : vector<256x128xf32>
    %46 = tpu.matmul %44, %45, %cst_69 {dimension_numbers = #tpu.dot_dimension_numbers<[1], [0], [0], [1], [0, 0, 1, 1], [], []>} : vector<256x128xf32>, vector<128x128xf32>, vector<256x128xf32> -> vector<256x128xf32>
    %c0_70 = arith.constant 0 : index
    %c0_71 = arith.constant 0 : index
    %47 = vector.load %arg7[%c0_70, %c0_71] : memref<1x128xf32, #tpu.memory_space<vmem>>, vector<1x128xf32>
    %48 = vector.broadcast %47 : vector<1x128xf32> to vector<256x128xf32>
    %49 = arith.addf %46, %48 : vector<256x128xf32>
    %50 = arith.negf %49 : vector<256x128xf32>
    %51 = math.exp %50 : vector<256x128xf32>
    %cst_72 = arith.constant 1.000000e+00 : f32
    %52 = vector.broadcast %cst_72 : f32 to vector<256x128xf32>
    %53 = arith.addf %52, %51 : vector<256x128xf32>
    %54 = arith.divf %52, %53 : vector<256x128xf32>
    %55 = arith.mulf %49, %54 : vector<256x128xf32>
    %56 = arith.addf %55, %1 : vector<256x128xf32>
    %57 = vector.shape_cast %56 : vector<256x128xf32> to vector<1x16x16x128xf32>
    %c0_73 = arith.constant 0 : index
    %c0_74 = arith.constant 0 : index
    %c0_75 = arith.constant 0 : index
    %c0_76 = arith.constant 0 : index
    %58 = vector.load %arg8[%c0_73, %c0_74, %c0_75, %c0_76] : memref<1x16x16x128xf32, #tpu.memory_space<vmem>>, vector<1x16x16x128xf32>
    tpu.vector_store %arg8[%c0_73, %c0_74, %c0_75, %c0_76], %57 {strides = array<i32>} : memref<1x16x16x128xf32, #tpu.memory_space<vmem>>, vector<1x16x16x128xf32>,
    return
  }
  func.func @transform_0(%arg0: i32) -> (i32, i32, i32, i32) {
    %c0_i32 = arith.constant 0 : i32
    %c0_i32_0 = arith.constant 0 : i32
    %c0_i32_1 = arith.constant 0 : i32
    %c0_i32_2 = arith.constant 0 : i32
    return %arg0, %c0_i32, %c0_i32_0, %c0_i32_1 : i32, i32, i32, i32
  }
  func.func @transform_1(%arg0: i32) -> (i32, i32) {
    %c0_i32 = arith.constant 0 : i32
    %c0_i32_0 = arith.constant 0 : i32
    %c0_i32_1 = arith.constant 0 : i32
    return %c0_i32, %c0_i32_0 : i32, i32
  }
  func.func @transform_2(%arg0: i32) -> (i32, i32) {
    %c0_i32 = arith.constant 0 : i32
    %c0_i32_0 = arith.constant 0 : i32
    %c0_i32_1 = arith.constant 0 : i32
    return %c0_i32, %c0_i32_0 : i32, i32
  }
  func.func @transform_3(%arg0: i32) -> (i32, i32) {
    %c0_i32 = arith.constant 0 : i32
    %c0_i32_0 = arith.constant 0 : i32
    %c0_i32_1 = arith.constant 0 : i32
    return %c0_i32, %c0_i32_0 : i32, i32
  }
  func.func @transform_4(%arg0: i32) -> (i32, i32) {
    %c0_i32 = arith.constant 0 : i32
    %c0_i32_0 = arith.constant 0 : i32
    %c0_i32_1 = arith.constant 0 : i32
    return %c0_i32, %c0_i32_0 : i32, i32
  }
  func.func @transform_5(%arg0: i32) -> (i32, i32) {
    %c0_i32 = arith.constant 0 : i32
    %c0_i32_0 = arith.constant 0 : i32
    %c0_i32_1 = arith.constant 0 : i32
    return %c0_i32, %c0_i32_0 : i32, i32
  }
  func.func @transform_6(%arg0: i32) -> (i32, i32) {
    %c0_i32 = arith.constant 0 : i32
    %c0_i32_0 = arith.constant 0 : i32
    %c0_i32_1 = arith.constant 0 : i32
    return %c0_i32, %c0_i32_0 : i32, i32
  }
  func.func @transform_7(%arg0: i32) -> (i32, i32, i32, i32) {
    %c0_i32 = arith.constant 0 : i32
    %c0_i32_0 = arith.constant 0 : i32
    %c0_i32_1 = arith.constant 0 : i32
    %c0_i32_2 = arith.constant 0 : i32
    return %arg0, %c0_i32, %c0_i32_0, %c0_i32_1 : i32, i32, i32, i32
  }
}

</mosaic_0001>

<bundles_post_ra>
// kernel: bottleneck_forward.1
= control target key start
LH: loop header
LB: loop body
LE: loop exit
PB: predicated region body
PF: predicated region fallthrough
CT: control target
= control target key end

     0   :  { %12 = vsyncpa [#allocation4], 0  ;;  %s6829_s0 = inlined_call_operand.vmem [shape: f32[2,16,16,128], index: 0, kind: input, shape index: {}]   ;;  %s6830_s1 = inlined_call_operand.vmem [shape: f32[128,128], index: 1, kind: input, shape index: {}]   ;;  %s6831_s2 = inlined_call_operand.vmem [shape: f32[1,128], index: 2, kind: input, shape index: {}]   ;;  %s6832_s3 = inlined_call_operand.vmem [shape: f32[1152,128], index: 3, kind: input, shape index: {}]   ;;  %s6833_s4 = inlined_call_operand.vmem [shape: f32[1,128], index: 4, kind: input, shape index: {}]   ;;  %s6834_s5 = inlined_call_operand.vmem [shape: f32[128,128], index: 5, kind: input, shape index: {}]   ;;  %s6835_s6 = inlined_call_operand.vmem [shape: f32[1,128], index: 6, kind: input, shape index: {}]   ;;  %s6836_s7 = inlined_call_operand.hbm [shape: f32[2,16,16,128], index: 7, kind: output, shape index: {}]  }
   0x1   :  { %14 = vsyncpa [#allocation4 + $0x1], 0  ;;  %s4838_s24 = smov 0   ;;  %s4840_s25 = smov 0  }
   0x2   :  { %s4842_s26 = smov 0   ;;  %s4844_s27 = smov 0  }
   0x3 LB: > { %s4859_s28 = sadd.s32 4294967295, %s4791_s27   ;;  %s3260_s29 = sadd.s32 4294967294, %s4791_s27   ;;  %s4791_s27 = sphi %s4844_s27, %s6870_s27   ;;  %s4787_s26 = sphi %s4842_s26, %s6869_s26   ;;  %s4783_s25 = sphi %s4840_s25, %s6868_s25   ;;  %s4779_s24 = sphi %s4838_s24, %s6867_s24  }
   0x4   : > { %s4863_s30 = sadd.s32 1, %s4791_s27   ;;  %s179_s8 = sadd.s32 1, %s4787_s26 }
   0x5   : > { %s176_s9 = ssub.s32 %s4791_s27, %s4863_s30  ;;  %p189_p0 = scmp.ne.s32.totalorder %s4787_s26, %s4783_s25 }
   0x6   : > { %p177_p1 = scmp.eq.s32.totalorder %s176_s9, 0  ;;  %p190_p2 = scmp.eq.s32.totalorder %s4859_s28, 1 }
   0x7   : > { %p195_p3 = scmp.ne.s32.totalorder %s4783_s25, %s4779_s24  ;;  %p196_p4 = scmp.eq.s32.totalorder %s3260_s29, 1 }
   0x8   : > { %s4874_s10 = scalar_select %p177_p1, %s4787_s26, %s179_s8  }
   0x9   : > { %p4876_p5 = por %p190_p2, %p189_p0  ;;  %p4880_p6 = por %p196_p4, %p195_p3 }
   0xa   : > { %p3263_p7 = scmp.ge.s32.totalorder %s4791_s27, 1  ;;  %p240_p8 = scmp.lt.s32.totalorder %s4791_s27, 3 }
   0xc   : > { %p241_p9 = pnand %p3263_p7, %p240_p8 }
   0xe   : > { %244 = sbr.rel (%p241_p9) target bundleno = 1169 (0x491), region = 48 }
  0x15   : > { %v309_v0 = vld [vmem:[%s6830_s1] sm:$0xff]  ;;  %v310_v1 = vld [vmem:[%s6830_s1 + $0x8] sm:$0xff]  ;;  %v311_v2 = vld [vmem:[%s6830_s1 + $0x10] sm:$0xff]  ;;  %p272_p10 = scmp.lt.s32.totalorder %s4859_s28, 1  ;;  %v4793_v5 = vmov 0.0|0.0   ;;  %s269_s29 = sand.u32 1, %s4783_s25  }
  0x16   : > { %v3757_v3 = vpack.c.bf16 %v310_v1, %v309_v0  ;;  %v312_v4 = vld [vmem:[%s6830_s1 + $0x18] sm:$0xff]  ;;  %4045 = vmatprep.subr.bf16.mxu1 %v4793_v5  ;;  %v313_v7 = vld [vmem:[%s6830_s1 + $0x20] sm:$0xff]  ;;  %v314_v8 = vld [vmem:[%s6830_s1 + $0x28] sm:$0xff]  ;;  %s3372_s13 = sshll.u32 %s4859_s28, 12  ;;  %s4795_s20 = smov [#allocation3]  }
  0x17   : > { %v3761_v6 = vpack.c.bf16 %v312_v4, %v311_v2  ;;  %s273_s8 = scalar_select %p272_p10, %s4859_s28, 1  ;;  %v3765_v9 = vpack.c.bf16 %v314_v8, %v313_v7  ;;  %v315_v10 = vld [vmem:[%s6830_s1 + $0x30] sm:$0xff]  ;;  %v316_v11 = vld [vmem:[%s6830_s1 + $0x38] sm:$0xff]  ;;  %v317_v14 = vld [vmem:[%s6830_s1 + $0x40] sm:$0xff] }
  0x18   : > { %3758 = vmatprep.subr.bf16.mxu0 %v3757_v3  ;;  %v3769_v13 = vpack.c.bf16 %v316_v11, %v315_v10  ;;  %v318_v15 = vld [vmem:[%s6830_s1 + $0x48] sm:$0xff]  ;;  %v319_v17 = vld [vmem:[%s6830_s1 + $0x50] sm:$0xff]  ;;  %v320_v18 = vld [vmem:[%s6830_s1 + $0x58] sm:$0xff]  ;;  %s6779_s18 = scalar_lea.hbm %s6836_s7, %s3372_s13  ;;  %s6788_s28 = scalar_lea.sflag [#allocation4], %s269_s29 }
  0x19   : > { %3760 = vmatpush3.bf16.msra.mxu0 %v3757_v3  ;;  %s3371_s9 = sshll.u32 %s273_s8, 8  ;;  %v3773_v16 = vpack.c.bf16 %v318_v15, %v317_v14  ;;  %v3777_v19 = vpack.c.bf16 %v320_v18, %v319_v17  ;;  %v321_v20 = vld [vmem:[%s6830_s1 + $0x60] sm:$0xff]  ;;  %v322_v21 = vld [vmem:[%s6830_s1 + $0x68] sm:$0xff]  ;;  %v323_v23 = vld [vmem:[%s6830_s1 + $0x70] sm:$0xff]  ;;  %s3264_s8 = sshll.u32 %s269_s29, 8 }
  0x1a   : > { %3762 = vmatprep.subr.bf16.mxu0 %v3761_v6  ;;  %s4910_s15 = scalar_lea.vmem %s6829_s0, %s3371_s9  ;;  %v3781_v22 = vpack.c.bf16 %v322_v21, %v321_v20  ;;  %v324_v24 = vld [vmem:[%s6830_s1 + $0x78] sm:$0xff]  ;;  %v1148_v26 = vld [vmem:[%s6832_s3] sm:$0xff]  ;;  %v1149_v27 = vld [vmem:[%s6832_s3 + $0x8] sm:$0xff]  ;;  %s6597_s9 = scalar_lea.vmem [#allocation3], %s3264_s8 }
  0x1b   : > { %v277_v12 = vld [vmem:[%s4910_s15] sm:$0xff]  ;;  %v3785_v25 = vpack.c.bf16 %v324_v24, %v323_v23  ;;  %v278_v28 = vld [vmem:[%s4910_s15 + $0x8] sm:$0xff]  ;;  %v3790_v29 = vpack.c.bf16 %v1149_v27, %v1148_v26  ;;  %v279_v30 = vld [vmem:[%s4910_s15 + $0x10] sm:$0xff]  ;;  %s3198_s14 = sshll.u32 %s6597_s9, 4  ;;  %s4733_s21 = sshll.u32 %s4795_s20, 4  ;;  %s6781_s14 = int_to_ptr.vmem [resolvable:$true] %s3198_s14  ;;  %s4734_s21 = int_to_ptr.vmem [resolvable:$false] %s4733_s21 }
  0x1c   : > { %3549 = vmatprep.mubr.f32.mxu0 %v277_v12  ;;  %v1150_v31 = vld [vmem:[%s6832_s3 + $0x10] sm:$0xff]  ;;  %v1151_v32 = vld [vmem:[%s6832_s3 + $0x18] sm:$0xff]  ;;  %v281_v35 = vld [vmem:[%s4910_s15 + $0x20] sm:$0xff]  ;;  %s4729_s19 = scalar_lea.vmem %s6781_s14, 4096  ;;  %s4735_s22 = scalar_lea.vmem %s4734_s21, 8192 }
  0x1d   : > { %3764 = vmatpush3.bf16.msra.mxu0 %v3761_v6  ;;  %v280_v33 = vld [vmem:[%s4910_s15 + $0x18] sm:$0xff]  ;;  %v3793_v34 = vpack.c.bf16 %v1151_v32, %v1150_v31  ;;  %v1152_v36 = vld [vmem:[%s6832_s3 + $0x20] sm:$0xff]  ;;  %v1153_v37 = vld [vmem:[%s6832_s3 + $0x28] sm:$0xff]  ;;  %p4730_p11 = scmp.ne.s32.totalorder %s6781_s14, %s4729_s19  ;;  %p4736_p0 = scmp.lt.s32.totalorder %s6781_s14, %s4734_s21 }
  0x1e   : > { %3766 = vmatprep.subr.bf16.mxu0 %v3765_v9  ;;  %v282_v38 = vld [vmem:[%s4910_s15 + $0x28] sm:$0xff]  ;;  %v3796_v39 = vpack.c.bf16 %v1153_v37, %v1152_v36  ;;  %v283_v40 = vld [vmem:[%s4910_s15 + $0x30] sm:$0xff]  ;;  %v1155_v42 = vld [vmem:[%s6832_s3 + $0x38] sm:$0xff]  ;;  %p4737_p1 = scmp.lt.s32.totalorder %s4735_s22, %s4729_s19 }
  0x1f   : > { %v1154_v41 = vld [vmem:[%s6832_s3 + $0x30] sm:$0xff]  ;;  %v284_v43 = vld [vmem:[%s4910_s15 + $0x38] sm:$0xff]  ;;  %v285_v45 = vld [vmem:[%s4910_s15 + $0x40] sm:$0xff]  ;;  %p4731_p12 = pnand %p4730_p11, %p4876_p5 }
  0x20   : > { %v3799_v44 = vpack.c.bf16 %v1155_v42, %v1154_v41  ;;  %v1156_v46 = vld [vmem:[%s6832_s3 + $0x40] sm:$0xff]  ;;  %v1157_v47 = vld [vmem:[%s6832_s3 + $0x48] sm:$0xff]  ;;  %v287_v50 = vld [vmem:[%s4910_s15 + $0x50] sm:$0xff]  ;;  %p4738_p2 = por %p4737_p1, %p4736_p0 }
  0x21   : > { %3768 = vmatpush3.bf16.msra.mxu0 %v3765_v9  ;;  %v286_v48 = vld [vmem:[%s4910_s15 + $0x48] sm:$0xff]  ;;  %v3802_v49 = vpack.c.bf16 %v1157_v47, %v1156_v46  ;;  %v1158_v51 = vld [vmem:[%s6832_s3 + $0x50] sm:$0xff]  ;;  %v1159_v52 = vld [vmem:[%s6832_s3 + $0x58] sm:$0xff]  ;;  %p4732_p13 = pneg %p4731_p12 }
  0x22   : > { %3770 = vmatprep.subr.bf16.mxu0 %v3769_v13  ;;  %v288_v53 = vld [vmem:[%s4910_s15 + $0x58] sm:$0xff]  ;;  %v3805_v54 = vpack.c.bf16 %v1159_v52, %v1158_v51  ;;  %v289_v55 = vld [vmem:[%s4910_s15 + $0x60] sm:$0xff]  ;;  %v1161_v57 = vld [vmem:[%s6832_s3 + $0x68] sm:$0xff] }
  0x23   : > { %v1160_v56 = vld [vmem:[%s6832_s3 + $0x60] sm:$0xff]  ;;  %v290_v58 = vld [vmem:[%s4910_s15 + $0x68] sm:$0xff]  ;;  %v291_v60 = vld [vmem:[%s4910_s15 + $0x70] sm:$0xff]  ;;  %p4739_p3 = pnand %p4738_p2, %p4732_p13 }
  0x24   : > { %v3808_v59 = vpack.c.bf16 %v1161_v57, %v1160_v56  ;;  %v1162_v61 = vld [vmem:[%s6832_s3 + $0x70] sm:$0xff]  ;;  %v1163_v62 = vld [vmem:[%s6832_s3 + $0x78] sm:$0xff]  ;;  %v293_v1 = vld [vmem:[%s4910_s15 + $0x80] sm:$0xff] }
  0x25   : > { %3772 = vmatpush3.bf16.msra.mxu0 %v3769_v13  ;;  %v292_v63 = vld [vmem:[%s4910_s15 + $0x78] sm:$0xff]  ;;  %v3811_v0 = vpack.c.bf16 %v1163_v62, %v1162_v61  ;;  %v294_v2 = vld [vmem:[%s4910_s15 + $0x88] sm:$0xff]  ;;  %v295_v3 = vld [vmem:[%s4910_s15 + $0x90] sm:$0xff] }
  0x26   : > { %3774 = vmatprep.subr.bf16.mxu0 %v3773_v16  ;;  %v296_v4 = vld [vmem:[%s4910_s15 + $0x98] sm:$0xff]  ;;  %v297_v6 = vld [vmem:[%s4910_s15 + $0xa0] sm:$0xff]  ;;  %v298_v7 = vld [vmem:[%s4910_s15 + $0xa8] sm:$0xff] }
  0x27   : > { %v299_v8 = vld [vmem:[%s4910_s15 + $0xb0] sm:$0xff]  ;;  %v300_v9 = vld [vmem:[%s4910_s15 + $0xb8] sm:$0xff]  ;;  %v301_v10 = vld [vmem:[%s4910_s15 + $0xc0] sm:$0xff] }
  0x28   : > { %v302_v11 = vld [vmem:[%s4910_s15 + $0xc8] sm:$0xff]  ;;  %v303_v12 = vld [vmem:[%s4910_s15 + $0xd0] sm:$0xff]  ;;  %v304_v13 = vld [vmem:[%s4910_s15 + $0xd8] sm:$0xff] }
  0x29   : > { %3776 = vmatpush3.bf16.msra.mxu0 %v3773_v16  ;;  %v305_v14 = vld [vmem:[%s4910_s15 + $0xe0] sm:$0xff]  ;;  %v306_v15 = vld [vmem:[%s4910_s15 + $0xe8] sm:$0xff]  ;;  %v307_v16 = vld [vmem:[%s4910_s15 + $0xf0] sm:$0xff] }
  0x2a   : > { %3778 = vmatprep.subr.bf16.mxu0 %v3777_v19  ;;  %v308_v17 = vld [vmem:[%s4910_s15 + $0xf8] sm:$0xff]  ;;  %v1164_v18 = vld [vmem:[%s6832_s3 + $0x80] sm:$0xff]  ;;  %v1166_v21 = vld [vmem:[%s6832_s3 + $0x90] sm:$0xff] }
  0x2b   : > { %v1180_v24 = vld [vmem:[%s6832_s3 + $0x100] sm:$0xff]  ;;  %v1183_v31 = vld [vmem:[%s6832_s3 + $0x118] sm:$0xff]  ;;  %v1186_v42 = vld [vmem:[%s6832_s3 + $0x130] sm:$0xff] }
  0x2c   : > { %v1168_v27 = vld [vmem:[%s6832_s3 + $0xa0] sm:$0xff]  ;;  %v1171_v37 = vld [vmem:[%s6832_s3 + $0xb8] sm:$0xff]  ;;  %v1177_v52 = vld [vmem:[%s6832_s3 + $0xe8] sm:$0xff] }
  0x2d   : > { %3780 = vmatpush3.bf16.msra.mxu0 %v3777_v19  ;;  %v1165_v19 = vld [vmem:[%s6832_s3 + $0x88] sm:$0xff]  ;;  %v1175_v46 = vld [vmem:[%s6832_s3 + $0xd8] sm:$0xff]  ;;  %v1176_v51 = vld [vmem:[%s6832_s3 + $0xe0] sm:$0xff] }
  0x2e   : > { %3782 = vmatprep.subr.bf16.mxu0 %v3781_v22  ;;  %v3814_v20 = vpack.c.bf16 %v1165_v19, %v1164_v18  ;;  %v1191_v56 = vld [vmem:[%s6832_s3 + $0x158] sm:$0xff]  ;;  %v1192_v61 = vld [vmem:[%s6832_s3 + $0x160] sm:$0xff]  ;;  %v1193_v62 = vld [vmem:[%s6832_s3 + $0x168] sm:$0xff] }
  0x2f   : > { %v1204_v18 = vld [vmem:[%s6832_s3 + $0x1c0] sm:$0xff]  ;;  %v1205_v19 = vld [vmem:[%s6832_s3 + $0x1c8] sm:$0xff] }
  0x31   : > { %3784 = vmatpush3.bf16.msra.mxu0 %v3781_v22  ;;  %v1167_v22 = vld [vmem:[%s6832_s3 + $0x98] sm:$0xff] }
  0x32   : > { %3786 = vmatprep.subr.bf16.mxu0 %v3785_v25  ;;  %v3817_v23 = vpack.c.bf16 %v1167_v22, %v1166_v21  ;;  %v1206_v21 = vld [vmem:[%s6832_s3 + $0x1d0] sm:$0xff]  ;;  %v1207_v22 = vld [vmem:[%s6832_s3 + $0x1d8] sm:$0xff] }
  0x35   : > { %3788 = vmatpush3.bf16.msra.mxu0 %v3785_v25  ;;  %v1181_v25 = vld [vmem:[%s6832_s3 + $0x108] sm:$0xff] }
  0x36   : > { %3789 = vmatprep.subr.bf16.mxu0 %v4793_v5  ;;  %v5050_v26 = vpack.c.bf16 %v1181_v25, %v1180_v24  ;;  %v1208_v24 = vld [vmem:[%s6832_s3 + $0x1e0] sm:$0xff]  ;;  %v1209_v25 = vld [vmem:[%s6832_s3 + $0x1e8] sm:$0xff] }
  0x38   : > { %3550 = vmatmul.mubr.f32.vlgmr.msra.gmra.mrb[0].mxu0 %v278_v28  ;;  %v1169_v28 = vld [vmem:[%s6832_s3 + $0xa8] sm:$0xff]  ;;  %4061 = vmatpush1.bf16.msra.mxu1 %v5050_v26 }
  0x39   : > { %3552 = vmatprep.mubr.f32.mxu0 %v279_v30  ;;  %3791 = vmatpush1.bf16.msra.mxu0 %v3790_v29  ;;  %v3820_v29 = vpack.c.bf16 %v1169_v28, %v1168_v27  ;;  %v1182_v30 = vld [vmem:[%s6832_s3 + $0x110] sm:$0xff]  ;;  %v1211_v28 = vld [vmem:[%s6832_s3 + $0x1f8] sm:$0xff] }
  0x3a   : > { %3792 = vmatprep.subr.bf16.mxu0 %v4793_v5  ;;  %4046 = vmatprep.subr.bf16.mxu1 %v4793_v5  ;;  %v5067_v32 = vpack.c.bf16 %v1183_v31, %v1182_v30  ;;  %v1210_v27 = vld [vmem:[%s6832_s3 + $0x1f0] sm:$0xff]  ;;  %v5283_v30 = vld [vmem:[%s6831_s2] ss:$0 sm:$0xff] }
  0x3c   : > { %3553 = vmatmul.mubr.f32.gmra.mrb[2].mxu0 %v280_v33  ;;  %4062 = vmatpush1.bf16.msra.mxu1 %v5067_v32  ;;  %v1184_v33 = vld [vmem:[%s6832_s3 + $0x120] sm:$0xff] }
  0x3d   : > { %3555 = vmatprep.mubr.f32.mxu0 %v281_v35  ;;  %3794 = vmatpush1.bf16.msra.mxu0 %v3793_v34  ;;  %v1185_v34 = vld [vmem:[%s6832_s3 + $0x128] sm:$0xff]  ;;  %v1170_v35 = vld [vmem:[%s6832_s3 + $0xb0] sm:$0xff] }
  0x3e   : > { %3795 = vmatprep.subr.bf16.mxu0 %v4793_v5  ;;  %4047 = vmatprep.subr.bf16.mxu1 %v4793_v5  ;;  %v5081_v36 = vpack.c.bf16 %v1185_v34, %v1184_v33 }
  0x40   : > { %3556 = vmatmul.mubr.f32.gmra.mrb[4].mxu0 %v282_v38  ;;  %v3823_v38 = vpack.c.bf16 %v1171_v37, %v1170_v35  ;;  %4063 = vmatpush1.bf16.msra.mxu1 %v5081_v36 }
  0x41   : > { %3558 = vmatprep.mubr.f32.mxu0 %v283_v40  ;;  %3797 = vmatpush1.bf16.msra.mxu0 %v3796_v39  ;;  %v1172_v39 = vld [vmem:[%s6832_s3 + $0xc0] sm:$0xff]  ;;  %v1173_v40 = vld [vmem:[%s6832_s3 + $0xc8] sm:$0xff] }
  0x42   : > { %3798 = vmatprep.subr.bf16.mxu0 %v4793_v5  ;;  %4048 = vmatprep.subr.bf16.mxu1 %v4793_v5  ;;  %v3826_v41 = vpack.c.bf16 %v1173_v40, %v1172_v39 }
  0x44   : > { %3559 = vmatmul.mubr.f32.gmra.mrb[6].mxu0 %v284_v43  ;;  %v1187_v43 = vld [vmem:[%s6832_s3 + $0x138] sm:$0xff] }
  0x45   : > { %3561 = vmatprep.mubr.f32.mxu0 %v285_v45  ;;  %3800 = vmatpush1.bf16.msra.mxu0 %v3799_v44  ;;  %v5101_v44 = vpack.c.bf16 %v1187_v43, %v1186_v42  ;;  %v1174_v45 = vld [vmem:[%s6832_s3 + $0xd0] sm:$0xff] }
  0x46   : > { %3801 = vmatprep.subr.bf16.mxu0 %v4793_v5  ;;  %v3829_v47 = vpack.c.bf16 %v1175_v46, %v1174_v45 }
  0x47   : > { %4064 = vmatpush1.bf16.msra.mxu1 %v5101_v44 }
  0x48   : > { %3562 = vmatmul.mubr.f32.gmra.mrb[8].mxu0 %v286_v48  ;;  %4049 = vmatprep.subr.bf16.mxu1 %v4793_v5  ;;  %v1188_v48 = vld [vmem:[%s6832_s3 + $0x140] sm:$0xff] }
  0x49   : > { %3564 = vmatprep.mubr.f32.mxu0 %v287_v50  ;;  %3803 = vmatpush1.bf16.msra.mxu0 %v3802_v49  ;;  %v1189_v49 = vld [vmem:[%s6832_s3 + $0x148] sm:$0xff] }
  0x4a   : > { %3804 = vmatprep.subr.bf16.mxu0 %v4793_v5  ;;  %v5118_v50 = vpack.c.bf16 %v1189_v49, %v1188_v48 }
  0x4c   : > { %3565 = vmatmul.mubr.f32.gmra.mrb[10].mxu0 %v288_v53  ;;  %4065 = vmatpush1.bf16.msra.mxu1 %v5118_v50  ;;  %v3832_v53 = vpack.c.bf16 %v1177_v52, %v1176_v51 }
  0x4d   : > { %3567 = vmatprep.mubr.f32.mxu0 %v289_v55  ;;  %3806 = vmatpush1.bf16.msra.mxu0 %v3805_v54  ;;  %v4794_v54 = vmov 0.0   ;;  %v1190_v55 = vld [vmem:[%s6832_s3 + $0x150] sm:$0xff] }
  0x4e   : > { %3807 = vmatprep.subr.bf16.mxu0 %v4793_v5  ;;  %782 = vst [vmem:[#allocation2 + $0x8] sm:$0xff] %v4794_v54  ;;  %781 = vst [vmem:[#allocation2] sm:$0xff] %v4794_v54  ;;  %4050 = vmatprep.subr.bf16.mxu1 %v4793_v5  ;;  %v3853_v57 = vpack.c.bf16 %v1191_v56, %v1190_v55 }
  0x4f   : > { %783 = vst [vmem:[#allocation2 + $0x10] sm:$0xff] %v4794_v54  ;;  %784 = vst [vmem:[#allocation2 + $0x18] sm:$0xff] %v4794_v54 }
  0x50   : > { %3568 = vmatmul.mubr.f32.gmra.mrb[12].mxu0 %v290_v58  ;;  %786 = vst [vmem:[#allocation2 + $0x220] sm:$0xff] %v4794_v54  ;;  %787 = vst [vmem:[#allocation2 + $0x228] sm:$0xff] %v4794_v54  ;;  %v1178_v58 = vld [vmem:[%s6832_s3 + $0xf0] sm:$0xff]  ;;  %4066 = vmatpush1.bf16.msra.mxu1 %v3853_v57 }
  0x51   : > { %3570 = vmatprep.mubr.f32.mxu0 %v291_v60  ;;  %3809 = vmatpush1.bf16.msra.mxu0 %v3808_v59  ;;  %788 = vst [vmem:[#allocation2 + $0x230] sm:$0xff] %v4794_v54  ;;  %789 = vst [vmem:[#allocation2 + $0x238] sm:$0xff] %v4794_v54  ;;  %v1179_v59 = vld [vmem:[%s6832_s3 + $0xf8] sm:$0xff] }
  0x52   : > { %3810 = vmatprep.subr.bf16.mxu0 %v4793_v5  ;;  %791 = vst [vmem:[#allocation2 + $0x27] sm:$0x1] %v4794_v54  ;;  %792 = vst [vmem:[#allocation2 + $0x47] sm:$0x1] %v4794_v54  ;;  %v3835_v60 = vpack.c.bf16 %v1179_v59, %v1178_v58  ;;  %4051 = vmatprep.subr.bf16.mxu1 %v4793_v5 }
  0x53   : > { %793 = vst [vmem:[#allocation2 + $0x67] sm:$0x1] %v4794_v54  ;;  %794 = vst [vmem:[#allocation2 + $0x87] sm:$0x1] %v4794_v54 }
  0x54   : > { %3571 = vmatmul.mubr.f32.gmra.mrb[14].mxu0 %v292_v63  ;;  %795 = vst [vmem:[#allocation2 + $0xa7] sm:$0x1] %v4794_v54  ;;  %796 = vst [vmem:[#allocation2 + $0xc7] sm:$0x1] %v4794_v54  ;;  %v3856_v63 = vpack.c.bf16 %v1193_v62, %v1192_v61 }
  0x55   : > { %3573 = vmatprep.mubr.f32.mxu0 %v293_v1  ;;  %3812 = vmatpush1.bf16.msra.mxu0 %v3811_v0  ;;  %797 = vst [vmem:[#allocation2 + $0xe7] sm:$0x1] %v4794_v54  ;;  %798 = vst [vmem:[#allocation2 + $0x107] sm:$0x1] %v4794_v54  ;;  %v1194_v1 = vld [vmem:[%s6832_s3 + $0x170] sm:$0xff] }
  0x56   : > { %3813 = vmatprep.subr.bf16.mxu0 %v4793_v5  ;;  %799 = vst [vmem:[#allocation2 + $0x127] sm:$0x1] %v4794_v54  ;;  %800 = vst [vmem:[#allocation2 + $0x147] sm:$0x1] %v4794_v54  ;;  %4067 = vmatpush1.bf16.msra.mxu1 %v3856_v63 }
  0x57   : > { %801 = vst [vmem:[#allocation2 + $0x167] sm:$0x1] %v4794_v54  ;;  %802 = vst [vmem:[#allocation2 + $0x187] sm:$0x1] %v4794_v54  ;;  %4052 = vmatprep.subr.bf16.mxu1 %v4793_v5 }
  0x58   : > { %3574 = vmatmul.mubr.f32.gmra.mrb[16].mxu0 %v294_v2  ;;  %803 = vst [vmem:[#allocation2 + $0x1a7] sm:$0x1] %v4794_v54  ;;  %804 = vst [vmem:[#allocation2 + $0x1c7] sm:$0x1] %v4794_v54  ;;  %v1195_v2 = vld [vmem:[%s6832_s3 + $0x178] sm:$0xff] }
  0x59   : > { %3576 = vmatprep.mubr.f32.mxu0 %v295_v3  ;;  %3815 = vmatpush1.bf16.msra.mxu0 %v3814_v20  ;;  %805 = vst [vmem:[#allocation2 + $0x1e7] sm:$0x1] %v4794_v54  ;;  %806 = vst [vmem:[#allocation2 + $0x207] sm:$0x1] %v4794_v54  ;;  %v3859_v3 = vpack.c.bf16 %v1195_v2, %v1194_v1  ;;  %v3874_v20 = vpack.c.bf16 %v1205_v19, %v1204_v18 }
  0x5a   : > { %3816 = vmatprep.subr.bf16.mxu0 %v4793_v5  ;;  %809 = vst [vmem:[#allocation2 + $0x38] sm:$0x1] %v4794_v54  ;;  %810 = vst [vmem:[#allocation2 + $0x58] sm:$0x1] %v4794_v54 }
  0x5b   : > { %811 = vst [vmem:[#allocation2 + $0x78] sm:$0x1] %v4794_v54  ;;  %812 = vst [vmem:[#allocation2 + $0x98] sm:$0x1] %v4794_v54  ;;  %4068 = vmatpush1.bf16.msra.mxu1 %v3859_v3 }
  0x5c   : > { %3577 = vmatmul.mubr.f32.gmra.mrb[18].mxu0 %v296_v4  ;;  %813 = vst [vmem:[#allocation2 + $0xb8] sm:$0x1] %v4794_v54  ;;  %814 = vst [vmem:[#allocation2 + $0xd8] sm:$0x1] %v4794_v54  ;;  %4053 = vmatprep.subr.bf16.mxu1 %v4793_v5  ;;  %v1196_v4 = vld [vmem:[%s6832_s3 + $0x180] sm:$0xff] }
  0x5d   : > { %3579 = vmatprep.mubr.f32.mxu0 %v297_v6  ;;  %3818 = vmatpush1.bf16.msra.mxu0 %v3817_v23  ;;  %815 = vst [vmem:[#allocation2 + $0xf8] sm:$0x1] %v4794_v54  ;;  %816 = vst [vmem:[#allocation2 + $0x118] sm:$0x1] %v4794_v54  ;;  %v1197_v6 = vld [vmem:[%s6832_s3 + $0x188] sm:$0xff]  ;;  %v3877_v23 = vpack.c.bf16 %v1207_v22, %v1206_v21 }
  0x5e   : > { %3819 = vmatprep.subr.bf16.mxu0 %v4793_v5  ;;  %817 = vst [vmem:[#allocation2 + $0x138] sm:$0x1] %v4794_v54  ;;  %818 = vst [vmem:[#allocation2 + $0x158] sm:$0x1] %v4794_v54 }
  0x5f   : > { %819 = vst [vmem:[#allocation2 + $0x178] sm:$0x1] %v4794_v54  ;;  %820 = vst [vmem:[#allocation2 + $0x198] sm:$0x1] %v4794_v54 }
  0x60   : > { %3580 = vmatmul.mubr.f32.gmra.mrb[20].mxu0 %v298_v7  ;;  %821 = vst [vmem:[#allocation2 + $0x1b8] sm:$0x1] %v4794_v54  ;;  %822 = vst [vmem:[#allocation2 + $0x1d8] sm:$0x1] %v4794_v54  ;;  %v860_v7 = vld [vmem:[#allocation2 + $0xf] sm:$0xff] }
  0x61   : > { %3582 = vmatprep.mubr.f32.mxu0 %v299_v8  ;;  %3821 = vmatpush1.bf16.msra.mxu0 %v3820_v29  ;;  %823 = vst [vmem:[#allocation2 + $0x1f8] sm:$0x1] %v4794_v54  ;;  %824 = vst [vmem:[#allocation2 + $0x218] sm:$0x1] %v4794_v54  ;;  %v3862_v8 = vpack.c.bf16 %v1197_v6, %v1196_v4  ;;  %v3883_v29 = vpack.c.bf16 %v1211_v28, %v1210_v27 }
  0x62   : > { %3822 = vmatprep.subr.bf16.mxu0 %v4793_v5  ;;  %790 = vst [vmem:[#allocation2 + $0x7] sm:$0x1] %v4794_v54  ;;  %807 = vst [vmem:[#allocation2 + $0x227] sm:$0x1] %v4794_v54 }
  0x63   : > { %808 = vst [vmem:[#allocation2 + $0x18] sm:$0x1] %v4794_v54  ;;  %825 = vst [vmem:[#allocation2 + $0x238] sm:$0x1] %v4794_v54  ;;  %4069 = vmatpush1.bf16.msra.mxu1 %v3862_v8 }
  0x64   : > { %3583 = vmatmul.mubr.f32.gmra.mrb[22].mxu0 %v300_v9  ;;  %4054 = vmatprep.subr.bf16.mxu1 %v4793_v5  ;;  %v1198_v9 = vld [vmem:[%s6832_s3 + $0x190] sm:$0xff] }
  0x65   : > { %3585 = vmatprep.mubr.f32.mxu0 %v301_v10  ;;  %3824 = vmatpush1.bf16.msra.mxu0 %v3823_v38  ;;  %v1199_v10 = vld [vmem:[%s6832_s3 + $0x198] sm:$0xff] }
  0x66   : > { %3825 = vmatprep.subr.bf16.mxu0 %v4793_v5 }
  0x68   : > { %3586 = vmatmul.mubr.f32.gmra.mrb[24].mxu0 %v302_v11  ;;  %v3865_v11 = vpack.c.bf16 %v1199_v10, %v1198_v9 }
  0x69   : > { %3588 = vmatprep.mubr.f32.mxu0 %v303_v12  ;;  %3827 = vmatpush1.bf16.msra.mxu0 %v3826_v41  ;;  %v859_v0 = vld [vmem:[#allocation2 + $0x7] sm:$0xff] }
  0x6a   : > { %3828 = vmatprep.subr.bf16.mxu0 %v4793_v5  ;;  %4070 = vmatpush1.bf16.msra.mxu1 %v3865_v11  ;;  %v1200_v12 = vld [vmem:[%s6832_s3 + $0x1a0] sm:$0xff] }
  0x6b   : > { %4055 = vmatprep.subr.bf16.mxu1 %v4793_v5 }
  0x6c   : > { %3589 = vmatmul.mubr.f32.gmra.mrb[26].mxu0 %v304_v13  ;;  %v1201_v13 = vld [vmem:[%s6832_s3 + $0x1a8] sm:$0xff] }
  0x6d   : > { %3591 = vmatprep.mubr.f32.mxu0 %v305_v14  ;;  %3830 = vmatpush1.bf16.msra.mxu0 %v3829_v47  ;;  %v3868_v14 = vpack.c.bf16 %v1201_v13, %v1200_v12 }
  0x6e   : > { %3831 = vmatprep.subr.bf16.mxu0 %v4793_v5 }
  0x6f   : > { %4071 = vmatpush1.bf16.msra.mxu1 %v3868_v14 }
  0x70   : > { %3592 = vmatmul.mubr.f32.gmra.mrb[28].mxu0 %v306_v15  ;;  %4056 = vmatprep.subr.bf16.mxu1 %v4793_v5  ;;  %v1202_v15 = vld [vmem:[%s6832_s3 + $0x1b0] sm:$0xff] }
  0x71   : > { %3594 = vmatprep.mubr.f32.mxu0 %v307_v16  ;;  %3833 = vmatpush1.bf16.msra.mxu0 %v3832_v53  ;;  %v1203_v16 = vld [vmem:[%s6832_s3 + $0x1b8] sm:$0xff] }
  0x72   : > { %3834 = vmatprep.subr.bf16.mxu0 %v4793_v5 }
  0x74   : > { %3595 = vmatmul.mubr.f32.gmra.mrb[30].mxu0 %v308_v17  ;;  %v3871_v17 = vpack.c.bf16 %v1203_v16, %v1202_v15 }
  0x75   : > { %1363 = vmatprep.mubr.f32.mxu0 %v4794_v54  ;;  %3836 = vmatpush1.bf16.msra.mxu0 %v3835_v60 }
  0x76   : > { %3837 = vmatprep.subr.bf16.mxu0 %v4793_v5  ;;  %4072 = vmatpush1.bf16.msra.mxu1 %v3871_v17 }
  0x77   : > { %4057 = vmatprep.subr.bf16.mxu1 %v4793_v5 }
  0x78   : > { %1364 = vmatmul.mubr.f32.vlgmr.msra.gmra.mrb[32].mxu0 %v859_v0 }
  0x79   : > { %1368 = vmatprep.mubr.f32.mxu0 %v4794_v54  ;;  %3839 = vmatpush1.bf16.msra.mxu0 %v5050_v26  ;;  %v3880_v26 = vpack.c.bf16 %v1209_v25, %v1208_v24 }
  0x7a   : > { %3840 = vmatprep.subr.bf16.mxu0 %v4793_v5  ;;  %4073 = vmatpush1.bf16.msra.mxu1 %v3874_v20 }
  0x7b   : > { %4058 = vmatprep.subr.bf16.mxu1 %v4793_v5 }
  0x7c   : > { %1369 = vmatmul.mubr.f32.gmra.mrb[34].mxu0 %v860_v7 }
  0x7d   : > { %3842 = vmatpush1.bf16.msra.mxu0 %v5067_v32 }
  0x7e   : > { %3843 = vmatprep.subr.bf16.mxu0 %v4793_v5  ;;  %4074 = vmatpush1.bf16.msra.mxu1 %v3877_v23 }
  0x7f   : > { %4059 = vmatprep.subr.bf16.mxu1 %v4793_v5 }
  0x81   : > { %3845 = vmatpush1.bf16.msra.mxu0 %v5081_v36 }
  0x82   : > { %3846 = vmatprep.subr.bf16.mxu0 %v4793_v5  ;;  %4075 = vmatpush1.bf16.msra.mxu1 %v3880_v26 }
  0x83   : > { %4060 = vmatprep.subr.bf16.mxu1 %v4793_v5 }
  0x85   : > { %3848 = vmatpush1.bf16.msra.mxu0 %v5101_v44 }
  0x86   : > { %3849 = vmatprep.subr.bf16.mxu0 %v4793_v5  ;;  %4076 = vmatpush1.bf16.msra.mxu1 %v3883_v29 }
  0x87   : > { %3885 = vmatprep.subr.bf16.mxu1 %v4793_v5 }
  0x89   : > { %3851 = vmatpush1.bf16.msra.mxu0 %v5118_v50 }
  0x8a   : > { %3852 = vmatprep.subr.bf16.mxu0 %v4793_v5 }
  0x8d   : > { %3854 = vmatpush1.bf16.msra.mxu0 %v3853_v57 }
  0x8e   : > { %3855 = vmatprep.subr.bf16.mxu0 %v4793_v5 }
  0x91   : > { %3857 = vmatpush1.bf16.msra.mxu0 %v3856_v63 }
  0x92   : > { %3858 = vmatprep.subr.bf16.mxu0 %v4793_v5 }
  0x95   : > { %3860 = vmatpush1.bf16.msra.mxu0 %v3859_v3 }
  0x96   : > { %3861 = vmatprep.subr.bf16.mxu0 %v4793_v5 }
  0x99   : > { %3863 = vmatpush1.bf16.msra.mxu0 %v3862_v8 }
  0x9a   : > { %3864 = vmatprep.subr.bf16.mxu0 %v4793_v5 }
  0x9d   : > { %3866 = vmatpush1.bf16.msra.mxu0 %v3865_v11 }
  0x9e   : > { %3867 = vmatprep.subr.bf16.mxu0 %v4793_v5 }
  0xa1   : > { %3869 = vmatpush1.bf16.msra.mxu0 %v3868_v14 }
  0xa2   : > { %3870 = vmatprep.subr.bf16.mxu0 %v4793_v5 }
  0xa5   : > { %3872 = vmatpush1.bf16.msra.mxu0 %v3871_v17 }
  0xa6   : > { %3873 = vmatprep.subr.bf16.mxu0 %v4793_v5 }
  0xa9   : > { %3875 = vmatpush1.bf16.msra.mxu0 %v3874_v20 }
  0xaa   : > { %3876 = vmatprep.subr.bf16.mxu0 %v4793_v5 }
  0xad   : > { %3878 = vmatpush1.bf16.msra.mxu0 %v3877_v23 }
  0xae   : > { %3879 = vmatprep.subr.bf16.mxu0 %v4793_v5 }
  0xb1   : > { %3881 = vmatpush1.bf16.msra.mxu0 %v3880_v26 }
  0xb2   : > { %3882 = vmatprep.subr.bf16.mxu0 %v4793_v5 }
  0xb5   : > { %3884 = vmatpush1.bf16.msra.mxu0 %v3883_v29 }
 0x10b   : > { %v3551_v31 = vpop.f32.mrb[0].mxu0 }
 0x10c   : > { %v5286_v32 = vadd.f32 %v3551_v31, %v5283_v30  ;;  %v398_v33 = vpop.f32.mrb[1].mxu0 }
 0x10d   : > { %v5289_v34 = vadd.f32 %v5283_v30, %v398_v33 }
 0x10e   : > { %v3269_v35 = vmul.f32 -1.442695, %v5286_v32 }
 0x10f   : > { %v3268_v36 = vmul.f32 -1.442695, %v5289_v34  ;;  %v3554_v37 = vpop.f32.mrb[2].mxu0 }
 0x110   : > { %4312 = vpow2.f32 %v3269_v35  ;;  %v5294_v38 = vadd.f32 %v3554_v37, %v5283_v30  ;;  %v408_v39 = vpop.f32.mrb[3].mxu0 }
 0x111   : > { %4314 = vpow2.f32 %v3268_v36  ;;  %v5297_v40 = vadd.f32 %v5283_v30, %v408_v39 }
 0x112   : > { %v3271_v41 = vmul.f32 -1.442695, %v5294_v38 }
 0x113   : > { %v3270_v42 = vmul.f32 -1.442695, %v5297_v40  ;;  %v3557_v43 = vpop.f32.mrb[4].mxu0 }
 0x114   : > { %4316 = vpow2.f32 %v3271_v41  ;;  %v5302_v44 = vadd.f32 %v3557_v43, %v5283_v30  ;;  %v418_v45 = vpop.f32.mrb[5].mxu0 }
 0x115   : > { %4318 = vpow2.f32 %v3270_v42  ;;  %v5305_v46 = vadd.f32 %v5283_v30, %v418_v45 }
 0x116   : > { %v3273_v47 = vmul.f32 -1.442695, %v5302_v44 }
 0x117   : > { %v3272_v48 = vmul.f32 -1.442695, %v5305_v46  ;;  %v3560_v49 = vpop.f32.mrb[6].mxu0 }
 0x118   : > { %4320 = vpow2.f32 %v3273_v47  ;;  %v5310_v50 = vadd.f32 %v3560_v49, %v5283_v30  ;;  %v428_v51 = vpop.f32.mrb[7].mxu0 }
 0x119   : > { %4322 = vpow2.f32 %v3272_v48  ;;  %v5313_v52 = vadd.f32 %v5283_v30, %v428_v51 }
 0x11a   : > { %v4313_v53 = vpop.eup %4312  ;;  %v3275_v54 = vmul.f32 -1.442695, %v5310_v50 }
 0x11b   : > { %v4315_v55 = vpop.eup %4314  ;;  %v654_v56 = vadd.f32 1.0, %v4313_v53  ;;  %v3274_v57 = vmul.f32 -1.442695, %v5313_v52  ;;  %v3563_v58 = vpop.f32.mrb[8].mxu0 }
 0x11c   : > { %v653_v59 = vadd.f32 1.0, %v4315_v55  ;;  %4324 = vpow2.f32 %v3275_v54  ;;  %v5318_v60 = vadd.f32 %v3563_v58, %v5283_v30  ;;  %v438_v61 = vpop.f32.mrb[9].mxu0 }
 0x11d   : > { %4326 = vrcp.f32 %v654_v56  ;;  %v5321_v62 = vadd.f32 %v5283_v30, %v438_v61 }
 0x11e   : > { %v4317_v63 = vpop.eup %4316  ;;  %4328 = vrcp.f32 %v653_v59  ;;  %v3277_v0 = vmul.f32 -1.442695, %v5318_v60 }
 0x11f   : > { %v4319_v1 = vpop.eup %4318  ;;  %v656_v2 = vadd.f32 1.0, %v4317_v63  ;;  %4330 = vpow2.f32 %v3274_v57  ;;  %v3276_v3 = vmul.f32 -1.442695, %v5321_v62  ;;  %v3566_v4 = vpop.f32.mrb[10].mxu0 }
 0x120   : > { %v655_v6 = vadd.f32 1.0, %v4319_v1  ;;  %4332 = vpow2.f32 %v3277_v0  ;;  %v5326_v7 = vadd.f32 %v3566_v4, %v5283_v30  ;;  %v448_v8 = vpop.f32.mrb[11].mxu0 }
 0x121   : > { %4334 = vrcp.f32 %v656_v2  ;;  %v5329_v9 = vadd.f32 %v5283_v30, %v448_v8 }
 0x122   : > { %v4321_v10 = vpop.eup %4320  ;;  %4336 = vrcp.f32 %v655_v6  ;;  %v3279_v11 = vmul.f32 -1.442695, %v5326_v7 }
 0x123   : > { %v4323_v12 = vpop.eup %4322  ;;  %v658_v13 = vadd.f32 1.0, %v4321_v10  ;;  %4338 = vpow2.f32 %v3276_v3  ;;  %v3278_v14 = vmul.f32 -1.442695, %v5329_v9  ;;  %v3569_v15 = vpop.f32.mrb[12].mxu0 }
 0x124   : > { %v657_v16 = vadd.f32 1.0, %v4323_v12  ;;  %4340 = vpow2.f32 %v3279_v11  ;;  %v5334_v17 = vadd.f32 %v3569_v15, %v5283_v30  ;;  %v458_v18 = vpop.f32.mrb[13].mxu0 }
 0x125   : > { %4342 = vrcp.f32 %v658_v13  ;;  %v5337_v19 = vadd.f32 %v5283_v30, %v458_v18 }
 0x126   : > { %v4325_v20 = vpop.eup %4324  ;;  %4344 = vrcp.f32 %v657_v16  ;;  %v3281_v21 = vmul.f32 -1.442695, %v5334_v17 }
 0x127   : > { %v4327_v22 = vpop.eup %4326  ;;  %v660_v23 = vadd.f32 1.0, %v4325_v20  ;;  %4346 = vpow2.f32 %v3278_v14  ;;  %v3280_v24 = vmul.f32 -1.442695, %v5337_v19  ;;  %v3572_v25 = vpop.f32.mrb[14].mxu0 }
 0x128   : > { %v4329_v26 = vpop.eup %4328  ;;  %v5342_v27 = vmul.f32 %v4327_v22, %v5286_v32  ;;  %4348 = vpow2.f32 %v3281_v21  ;;  %v5345_v28 = vadd.f32 %v3572_v25, %v5283_v30  ;;  %v468_v29 = vpop.f32.mrb[15].mxu0 }
 0x129   : > { %v4331_v31 = vpop.eup %4330  ;;  %v749_v33 = vmul.f32 %v4329_v26, %v5289_v34  ;;  %4350 = vrcp.f32 %v660_v23  ;;  %v5349_v35 = vadd.f32 %v5283_v30, %v468_v29 }
 0x12a   : > { %v4333_v36 = vpop.eup %4332  ;;  %828 = vst [vmem:[#allocation2 + $0x30] sm:$0xff] %v5342_v27  ;;  %v659_v37 = vadd.f32 1.0, %v4331_v31  ;;  %4352 = vpow2.f32 %v3280_v24  ;;  %v3283_v32 = vmul.f32 -1.442695, %v5345_v28 }
 0x12b   : > { %v4335_v39 = vpop.eup %4334  ;;  %827 = vst [vmem:[#allocation2 + $0x28] sm:$0xff] %v749_v33  ;;  %v662_v41 = vadd.f32 1.0, %v4333_v36  ;;  %v3282_v42 = vmul.f32 -1.442695, %v5349_v35  ;;  %v3575_v43 = vpop.f32.mrb[16].mxu0  ;;  %1373 = vmatprep.mubr.f32.mxu0 %v749_v33 }
 0x12c   : > { %v4337_v45 = vpop.eup %4336  ;;  %v5355_v34 = vmul.f32 %v4335_v39, %v5294_v38  ;;  %4354 = vrcp.f32 %v659_v37  ;;  %v5358_v47 = vadd.f32 %v3575_v43, %v5283_v30  ;;  %v478_v48 = vpop.f32.mrb[17].mxu0 }
 0x12d   : > { %v4339_v49 = vpop.eup %4338  ;;  %v751_v51 = vmul.f32 %v4337_v45, %v5297_v40  ;;  %4356 = vrcp.f32 %v662_v41  ;;  %v5362_v53 = vadd.f32 %v5283_v30, %v478_v48 }
 0x12e   : > { %v4341_v54 = vpop.eup %4340  ;;  %830 = vst [vmem:[#allocation2 + $0x50] sm:$0xff] %v5355_v34  ;;  %v661_v55 = vadd.f32 1.0, %v4339_v49  ;;  %4358 = vpow2.f32 %v3283_v32  ;;  %v3285_v38 = vmul.f32 -1.442695, %v5358_v47  ;;  %v1276_v49 = vld [vmem:[%s6832_s3 + $0x400] sm:$0xff] }
 0x12f   : > { %v4343_v56 = vpop.eup %4342  ;;  %829 = vst [vmem:[#allocation2 + $0x48] sm:$0xff] %v751_v51  ;;  %v664_v57 = vadd.f32 1.0, %v4341_v54  ;;  %4360 = vpow2.f32 %v3282_v42  ;;  %v3284_v58 = vmul.f32 -1.442695, %v5362_v53  ;;  %v3578_v59 = vpop.f32.mrb[18].mxu0 }
 0x130   : > { %v4345_v61 = vpop.eup %4344  ;;  %v5368_v40 = vmul.f32 %v4343_v56, %v5302_v44  ;;  %4362 = vrcp.f32 %v661_v55  ;;  %v5371_v63 = vadd.f32 %v3578_v59, %v5283_v30  ;;  %v488_v0 = vpop.f32.mrb[19].mxu0 }
 0x131   : > { %v4347_v1 = vpop.eup %4346  ;;  %v5374_v2 = vmul.f32 %v4345_v61, %v5305_v46  ;;  %4364 = vrcp.f32 %v664_v57  ;;  %v5377_v3 = vadd.f32 %v5283_v30, %v488_v0 }
 0x132   : > { %v4349_v4 = vpop.eup %4348  ;;  %832 = vst [vmem:[#allocation2 + $0x70] sm:$0xff] %v5368_v40  ;;  %v663_v6 = vadd.f32 1.0, %v4347_v1  ;;  %4366 = vpow2.f32 %v3285_v38  ;;  %v3287_v44 = vmul.f32 -1.442695, %v5371_v63  ;;  %v5381_v8 = vld [vmem:[#allocation2 + $0x27] sm:$0xff]  ;;  %v5398_v22 = vld [vmem:[#allocation2 + $0x2f] sm:$0xff] }
 0x133   : > { %v4351_v10 = vpop.eup %4350  ;;  %831 = vst [vmem:[#allocation2 + $0x68] sm:$0xff] %v5374_v2  ;;  %v666_v11 = vadd.f32 1.0, %v4349_v4  ;;  %4368 = vpow2.f32 %v3284_v58  ;;  %v3581_v46 = vpop.f32.mrb[20].mxu0  ;;  %1374 = vmatmul.mubr.f32.gmra.mrb[36].mxu0 %v5381_v8  ;;  %v3286_v14 = vmul.f32 -1.442695, %v5377_v3 }
 0x134   : > { %v4353_v12 = vpop.eup %4352  ;;  %v5386_v13 = vmul.f32 %v4351_v10, %v5310_v50  ;;  %4370 = vrcp.f32 %v663_v6  ;;  %v5390_v15 = vadd.f32 %v3581_v46, %v5283_v30  ;;  %v498_v16 = vpop.f32.mrb[21].mxu0  ;;  %1378 = vmatprep.mubr.f32.mxu0 %v5342_v27 }
 0x135   : > { %4372 = vrcp.f32 %v666_v11  ;;  %v665_v18 = vadd.f32 1.0, %v4353_v12  ;;  %v5394_v20 = vadd.f32 %v5283_v30, %v498_v16 }
 0x136   : > { %v4355_v21 = vpop.eup %4354  ;;  %834 = vst [vmem:[#allocation2 + $0x90] sm:$0xff] %v5386_v13  ;;  %4374 = vpow2.f32 %v3287_v44  ;;  %v3289_v50 = vmul.f32 -1.442695, %v5390_v15  ;;  %v5417_v41 = vld [vmem:[#allocation2 + $0x47] sm:$0xff]  ;;  %v5445_v1 = vld [vmem:[#allocation2 + $0x4f] sm:$0xff] }
 0x137   : > { %v4357_v23 = vpop.eup %4356  ;;  %v5401_v24 = vmul.f32 %v4355_v21, %v5313_v52  ;;  %4376 = vrcp.f32 %v665_v18  ;;  %v3288_v25 = vmul.f32 -1.442695, %v5394_v20  ;;  %v3584_v26 = vpop.f32.mrb[22].mxu0  ;;  %1379 = vmatmul.mubr.f32.gmra.mrb[38].mxu0 %v5398_v22 }
 0x138   : > { %v4359_v27 = vpop.eup %4358  ;;  %v5406_v29 = vmul.f32 %v4357_v23, %v5318_v60  ;;  %4378 = vpow2.f32 %v3286_v14  ;;  %v5409_v31 = vadd.f32 %v3584_v26, %v5283_v30  ;;  %v508_v33 = vpop.f32.mrb[23].mxu0  ;;  %1383 = vmatprep.mubr.f32.mxu0 %v751_v51  ;;  %v1277_v51 = vld [vmem:[%s6832_s3 + $0x408] sm:$0xff] }
 0x139   : > { %v4361_v36 = vpop.eup %4360  ;;  %833 = vst [vmem:[#allocation2 + $0x88] sm:$0xff] %v5401_v24  ;;  %v668_v52 = vadd.f32 1.0, %v4359_v27  ;;  %4380 = vpow2.f32 %v3289_v50  ;;  %v5413_v37 = vadd.f32 %v5283_v30, %v508_v33  ;;  %v5437_v56 = vpack.c.bf16 %v1277_v51, %v1276_v49  ;;  %v1212_v51 = vld [vmem:[%s6832_s3 + $0x200] sm:$0xff] }
 0x13a   : > { %v4363_v32 = vpop.eup %4362  ;;  %836 = vst [vmem:[#allocation2 + $0xb0] sm:$0xff] %v5406_v29  ;;  %v667_v39 = vadd.f32 1.0, %v4361_v36  ;;  %4382 = vpow2.f32 %v3288_v25  ;;  %v3291_v60 = vmul.f32 -1.442695, %v5409_v31  ;;  %v5469_v50 = vld [vmem:[#allocation2 + $0x67] sm:$0xff] }
 0x13b   : > { %v4365_v42 = vpop.eup %4364  ;;  %v5420_v43 = vmul.f32 %v4363_v32, %v5321_v62  ;;  %4384 = vrcp.f32 %v668_v52  ;;  %v3290_v45 = vmul.f32 -1.442695, %v5413_v37  ;;  %v3587_v48 = vpop.f32.mrb[24].mxu0  ;;  %1384 = vmatmul.mubr.f32.gmra.mrb[40].mxu0 %v5417_v41  ;;  %3982 = vmatprep.subr.bf16.mxu0 %v5437_v56 }
 0x13c   : > { %v4367_v54 = vpop.eup %4366  ;;  %v5431_v55 = vmul.f32 %v4365_v42, %v5326_v7  ;;  %4386 = vrcp.f32 %v667_v39  ;;  %v5434_v62 = vadd.f32 %v3587_v48, %v5283_v30  ;;  %v518_v38 = vpop.f32.mrb[25].mxu0  ;;  %1388 = vmatprep.mubr.f32.mxu0 %v5355_v34  ;;  %v5485_v48 = vld [vmem:[#allocation2 + $0x6f] sm:$0xff] }
 0x13d   : > { %v4369_v57 = vpop.eup %4368  ;;  %835 = vst [vmem:[#allocation2 + $0xa8] sm:$0xff] %v5420_v43  ;;  %v670_v58 = vadd.f32 1.0, %v4367_v54  ;;  %4388 = vpow2.f32 %v3291_v60  ;;  %v5441_v59 = vadd.f32 %v5283_v30, %v518_v38 }
 0x13e   : > { %v4371_v61 = vpop.eup %4370  ;;  %838 = vst [vmem:[#allocation2 + $0xd0] sm:$0xff] %v5431_v55  ;;  %v669_v7 = vadd.f32 1.0, %v4369_v57  ;;  %4390 = vpow2.f32 %v3290_v45  ;;  %v3293_v0 = vmul.f32 -1.442695, %v5434_v62 }
 0x13f   : > { %v4373_v34 = vpop.eup %4372  ;;  %v5449_v4 = vmul.f32 %v4371_v61, %v5329_v9  ;;  %4392 = vrcp.f32 %v670_v58  ;;  %v3292_v6 = vmul.f32 -1.442695, %v5441_v59  ;;  %v3590_v44 = vpop.f32.mrb[26].mxu0  ;;  %1389 = vmatmul.mubr.f32.gmra.mrb[42].mxu0 %v5445_v1 }
 0x140   : > { %v4375_v10 = vpop.eup %4374  ;;  %v5454_v11 = vmul.f32 %v4373_v34, %v5334_v17  ;;  %4394 = vrcp.f32 %v669_v7  ;;  %v5457_v46 = vadd.f32 %v3590_v44, %v5283_v30  ;;  %v528_v12 = vpop.f32.mrb[27].mxu0  ;;  %1393 = vmatprep.mubr.f32.mxu0 %v5374_v2 }
 0x141   : > { %v4377_v14 = vpop.eup %4376  ;;  %837 = vst [vmem:[#allocation2 + $0xc8] sm:$0xff] %v5449_v4  ;;  %v672_v9 = vadd.f32 1.0, %v4375_v10  ;;  %4396 = vpow2.f32 %v3293_v0  ;;  %v5462_v16 = vadd.f32 %v5283_v30, %v528_v12  ;;  %v5510_v10 = vld [vmem:[#allocation2 + $0x87] sm:$0xff] }
 0x142   : > { %v4379_v18 = vpop.eup %4378  ;;  %840 = vst [vmem:[#allocation2 + $0xf0] sm:$0xff] %v5454_v11  ;;  %v5466_v17 = vmul.f32 %v4377_v14, %v5337_v19  ;;  %4398 = vpow2.f32 %v3292_v6  ;;  %v3295_v21 = vmul.f32 -1.442695, %v5457_v46 }
 0x143   : > { %v4381_v2 = vpop.eup %4380  ;;  %4400 = vrcp.f32 %v672_v9  ;;  %v671_v23 = vadd.f32 1.0, %v4379_v18  ;;  %1394 = vmatmul.mubr.f32.gmra.mrb[44].mxu0 %v5469_v50  ;;  %v3593_v25 = vpop.f32.mrb[28].mxu0  ;;  %v3294_v33 = vmul.f32 -1.442695, %v5462_v16 }
 0x144   : > { %v4383_v26 = vpop.eup %4382  ;;  %839 = vst [vmem:[#allocation2 + $0xe8] sm:$0xff] %v5466_v17  ;;  %v674_v27 = vadd.f32 1.0, %v4381_v2  ;;  %4402 = vpow2.f32 %v3295_v21  ;;  %1398 = vmatprep.mubr.f32.mxu0 %v5368_v40  ;;  %v5476_v19 = vadd.f32 %v3593_v25, %v5283_v30  ;;  %v538_v36 = vpop.f32.mrb[29].mxu0 }
 0x145   : > { %v4385_v52 = vpop.eup %4384  ;;  %4404 = vrcp.f32 %v671_v23  ;;  %v673_v32 = vadd.f32 1.0, %v4383_v26  ;;  %v5479_v39 = vadd.f32 %v5283_v30, %v538_v36 }
 0x146   : > { %v4387_v60 = vpop.eup %4386  ;;  %v5482_v42 = vmul.f32 %v4385_v52, %v5345_v28  ;;  %4406 = vrcp.f32 %v674_v27  ;;  %v3297_v45 = vmul.f32 -1.442695, %v5476_v19  ;;  %v1213_v28 = vld [vmem:[%s6832_s3 + $0x208] sm:$0xff] }
 0x147   : > { %v4389_v40 = vpop.eup %4388  ;;  %v5488_v49 = vmul.f32 %v4387_v60, %v5349_v35  ;;  %4408 = vrcp.f32 %v673_v32  ;;  %1399 = vmatmul.mubr.f32.gmra.mrb[46].mxu0 %v5485_v48  ;;  %v3596_v54 = vpop.f32.mrb[30].mxu0  ;;  %v3296_v35 = vmul.f32 -1.442695, %v5479_v39 }
 0x148   : > { %v4391_v38 = vpop.eup %4390  ;;  %842 = vst [vmem:[#allocation2 + $0x110] sm:$0xff] %v5482_v42  ;;  %v676_v57 = vadd.f32 1.0, %v4389_v40  ;;  %4410 = vpow2.f32 %v3294_v33  ;;  %1403 = vmatprep.mubr.f32.mxu0 %v5401_v24  ;;  %v5501_v58 = vadd.f32 %v3596_v54, %v5283_v30  ;;  %v548_v61 = vpop.f32.mrb[31].mxu0  ;;  %v3886_v24 = vpack.c.bf16 %v1213_v28, %v1212_v51  ;;  %v5553_v28 = vld [vmem:[#allocation2 + $0xd1] sm:$0xff] }
 0x149   : > { %v4393_v7 = vpop.eup %4392  ;;  %841 = vst [vmem:[#allocation2 + $0x108] sm:$0xff] %v5488_v49  ;;  %v675_v0 = vadd.f32 1.0, %v4391_v38  ;;  %4412 = vpow2.f32 %v3297_v45  ;;  %v5505_v34 = vadd.f32 %v5283_v30, %v548_v61  ;;  %v1214_v30 = vld [vmem:[%s6832_s3 + $0x210] sm:$0xff]  ;;  %v1216_v45 = vld [vmem:[%s6832_s3 + $0x220] sm:$0xff] }
 0x14a   : > { %v4395_v6 = vpop.eup %4394  ;;  %v5508_v44 = vmul.f32 %v4393_v7, %v5358_v47  ;;  %4414 = vrcp.f32 %v676_v57  ;;  %v3299_v12 = vmul.f32 -1.442695, %v5501_v58  ;;  %v1215_v47 = vld [vmem:[%s6832_s3 + $0x218] sm:$0xff]  ;;  %v5567_v61 = vld [vmem:[#allocation2 + $0xa7] sm:$0xff] }
 0x14b   : > { %v4397_v14 = vpop.eup %4396  ;;  %v5514_v9 = vmul.f32 %v4395_v6, %v5362_v53  ;;  %4416 = vrcp.f32 %v675_v0  ;;  %v5516_v18 = vld [vmem:[#allocation2 + $0xe7] sm:$0xff]  ;;  %1404 = vmatmul.mubr.f32.gmra.mrb[48].mxu0 %v5510_v10  ;;  %v3298_v23 = vmul.f32 -1.442695, %v5505_v34  ;;  %v5533_v27 = vld [vmem:[#allocation2 + $0xef] sm:$0xff]  ;;  %v3889_v52 = vpack.c.bf16 %v1215_v47, %v1214_v30 }
 0x14c   : > { %v4399_v21 = vpop.eup %4398  ;;  %844 = vst [vmem:[#allocation2 + $0x130] sm:$0xff] %v5508_v44  ;;  %v678_v2 = vadd.f32 1.0, %v4397_v14  ;;  %4418 = vpow2.f32 %v3296_v35  ;;  %1648 = vmatprep.mubr.f32.mxu1 %v5516_v18  ;;  %v5527_v53 = vld [vmem:[#allocation2 + $0xc9] sm:$0xff]  ;;  %1408 = vmatprep.mubr.f32.mxu0 %v5386_v13 }
 0x14d   : > { %v4401_v25 = vpop.eup %4400  ;;  %843 = vst [vmem:[#allocation2 + $0x128] sm:$0xff] %v5514_v9  ;;  %v677_v26 = vadd.f32 1.0, %v4399_v21  ;;  %1649 = vmatmul.mubr.f32.vlgmr.msra.gmra.mrb[0].mxu1 %v5527_v53  ;;  %4420 = vpow2.f32 %v3299_v12  ;;  %v5539_v13 = vld [vmem:[#allocation2 + $0x8f] sm:$0xff] }
 0x14e   : > { %v4403_v33 = vpop.eup %4402  ;;  %v5536_v36 = vmul.f32 %v4401_v25, %v5371_v63  ;;  %4422 = vrcp.f32 %v678_v2  ;;  %3887 = vmatpush1.bf16.msra.mxu1 %v3886_v24  ;;  %1653 = vmatprep.mubr.f32.mxu1 %v5533_v27  ;;  %v1217_v63 = vld [vmem:[%s6832_s3 + $0x228] sm:$0xff]  ;;  %v1218_v0 = vld [vmem:[%s6832_s3 + $0x230] sm:$0xff] }
 0x14f   : > { %v4405_v32 = vpop.eup %4404  ;;  %4424 = vrcp.f32 %v677_v26  ;;  %v680_v60 = vadd.f32 1.0, %v4403_v33  ;;  %1409 = vmatmul.mubr.f32.gmra.mrb[50].mxu0 %v5539_v13  ;;  %3888 = vmatprep.subr.bf16.mxu1 %v4793_v5  ;;  %v5579_v12 = vld [vmem:[#allocation2 + $0xe9] sm:$0xff] }
 0x150   : > { %v4407_v40 = vpop.eup %4406  ;;  %846 = vst [vmem:[#allocation2 + $0x150] sm:$0xff] %v5536_v36  ;;  %v5551_v51 = vmul.f32 %v4405_v32, %v5377_v3  ;;  %4426 = vpow2.f32 %v3298_v23  ;;  %1413 = vmatprep.mubr.f32.mxu0 %v5420_v43  ;;  %v5560_v57 = vld [vmem:[#allocation2 + $0x107] sm:$0xff]  ;;  %v3892_v43 = vpack.c.bf16 %v1217_v63, %v1216_v45  ;;  %v5586_v47 = vld [vmem:[#allocation2 + $0x10f] sm:$0xff] }
 0x151   : > { %v4409_v54 = vpop.eup %4408  ;;  %v5557_v38 = vmul.f32 %v4407_v40, %v5390_v15  ;;  %4428 = vrcp.f32 %v680_v60  ;;  %1654 = vmatmul.mubr.f32.gmra.mrb[2].mxu1 %v5553_v28  ;;  %v5592_v23 = vld [vmem:[#allocation2 + $0xaf] sm:$0xff] }
 0x152   : > { %v4411_v35 = vpop.eup %4410  ;;  %845 = vst [vmem:[#allocation2 + $0x148] sm:$0xff] %v5551_v51  ;;  %v5564_v3 = vmul.f32 %v4409_v54, %v5394_v20  ;;  %1658 = vmatprep.mubr.f32.mxu1 %v5560_v57  ;;  %3890 = vmatpush1.bf16.msra.mxu1 %v3889_v52  ;;  %v1219_v20 = vld [vmem:[%s6832_s3 + $0x238] sm:$0xff]  ;;  %v1221_v26 = vld [vmem:[%s6832_s3 + $0x248] sm:$0xff] }
 0x153   : > { %v4413_v7 = vpop.eup %4412  ;;  %848 = vst [vmem:[#allocation2 + $0x170] sm:$0xff] %v5557_v38  ;;  %v679_v15 = vadd.f32 1.0, %v4411_v35  ;;  %1414 = vmatmul.mubr.f32.gmra.mrb[52].mxu0 %v5567_v61  ;;  %3891 = vmatprep.subr.bf16.mxu1 %v4793_v5  ;;  %v5604_v32 = vld [vmem:[#allocation2 + $0xf1] sm:$0xff]  ;;  %v5617_v35 = vld [vmem:[#allocation2 + $0xc7] sm:$0xff] }
 0x154   : > { %v4415_v6 = vpop.eup %4414  ;;  %847 = vst [vmem:[#allocation2 + $0x168] sm:$0xff] %v5564_v3  ;;  %v682_v24 = vadd.f32 1.0, %v4413_v7  ;;  %1418 = vmatprep.mubr.f32.mxu0 %v5406_v29  ;;  %v3895_v29 = vpack.c.bf16 %v1219_v20, %v1218_v0  ;;  %v5611_v63 = vld [vmem:[#allocation2 + $0x127] sm:$0xff]  ;;  %v1223_v7 = vld [vmem:[%s6832_s3 + $0x258] sm:$0xff]  ;;  %v5636_v20 = vld [vmem:[#allocation2 + $0x12f] sm:$0xff] }
 0x155   : > { %v4417_v14 = vpop.eup %4416  ;;  %v5583_v30 = vmul.f32 %v4415_v6, %v5409_v31  ;;  %4430 = vrcp.f32 %v679_v15  ;;  %1659 = vmatmul.mubr.f32.gmra.mrb[4].mxu1 %v5579_v12  ;;  %v5632_v0 = vld [vmem:[#allocation2 + $0x109] sm:$0xff] }
 0x156   : > { %v4419_v21 = vpop.eup %4418  ;;  %v5589_v2 = vmul.f32 %v4417_v14, %v5413_v37  ;;  %4432 = vrcp.f32 %v682_v24  ;;  %1663 = vmatprep.mubr.f32.mxu1 %v5586_v47  ;;  %3893 = vmatpush1.bf16.msra.mxu1 %v3892_v43  ;;  %v1220_v37 = vld [vmem:[%s6832_s3 + $0x240] sm:$0xff]  ;;  %v5640_v6 = vld [vmem:[#allocation2 + $0xcf] sm:$0xff] }
 0x157   : > { %v4421_v25 = vpop.eup %4420  ;;  %850 = vst [vmem:[#allocation2 + $0x190] sm:$0xff] %v5583_v30  ;;  %v681_v31 = vadd.f32 1.0, %v4419_v21  ;;  %1419 = vmatmul.mubr.f32.gmra.mrb[54].mxu0 %v5592_v23  ;;  %3894 = vmatprep.subr.bf16.mxu1 %v4793_v5 }
 0x158   : > { %v4423_v33 = vpop.eup %4422  ;;  %849 = vst [vmem:[#allocation2 + $0x188] sm:$0xff] %v5589_v2  ;;  %v684_v52 = vadd.f32 1.0, %v4421_v25  ;;  %1423 = vmatprep.mubr.f32.mxu0 %v5449_v4  ;;  %v3898_v4 = vpack.c.bf16 %v1221_v26, %v1220_v37  ;;  %v5653_v25 = vld [vmem:[#allocation2 + $0x111] sm:$0xff] }
 0x159   : > { %v4425_v60 = vpop.eup %4424  ;;  %v5608_v45 = vmul.f32 %v4423_v33, %v5434_v62  ;;  %4434 = vrcp.f32 %v681_v31  ;;  %1664 = vmatmul.mubr.f32.gmra.mrb[6].mxu1 %v5604_v32  ;;  %v5660_v37 = vld [vmem:[#allocation2 + $0x147] sm:$0xff] }
 0x15a   : > { %v4427_v40 = vpop.eup %4426  ;;  %v5614_v54 = vmul.f32 %v4425_v60, %v5441_v59  ;;  %4436 = vrcp.f32 %v684_v52  ;;  %1668 = vmatprep.mubr.f32.mxu1 %v5611_v63  ;;  %3896 = vmatpush1.bf16.msra.mxu1 %v3895_v29  ;;  %v1222_v59 = vld [vmem:[%s6832_s3 + $0x250] sm:$0xff] }
 0x15b   : > { %v4429_v43 = vpop.eup %4428  ;;  %852 = vst [vmem:[#allocation2 + $0x1b0] sm:$0xff] %v5608_v45  ;;  %v683_v62 = vadd.f32 1.0, %v4427_v40  ;;  %1424 = vmatmul.mubr.f32.gmra.mrb[56].mxu0 %v5617_v35  ;;  %3897 = vmatprep.subr.bf16.mxu1 %v4793_v5  ;;  %v3901_v24 = vpack.c.bf16 %v1223_v7, %v1222_v59  ;;  %v5676_v60 = vld [vmem:[#allocation2 + $0x129] sm:$0xff] }
 0x15c   : > { %851 = vst [vmem:[#allocation2 + $0x1a8] sm:$0xff] %v5614_v54  ;;  %v5630_v15 = vmul.f32 %v4429_v43, %v5457_v46  ;;  %1428 = vmatprep.mubr.f32.mxu0 %v5431_v55  ;;  %v1224_v55 = vld [vmem:[%s6832_s3 + $0x260] sm:$0xff]  ;;  %v1225_v46 = vld [vmem:[%s6832_s3 + $0x268] sm:$0xff] }
 0x15d   : > { %4438 = vrcp.f32 %v683_v62  ;;  %1669 = vmatmul.mubr.f32.gmra.mrb[8].mxu1 %v5632_v0  ;;  %v3904_v26 = vpack.c.bf16 %v1225_v46, %v1224_v55  ;;  %v5681_v40 = vld [vmem:[#allocation2 + $0x14f] sm:$0xff]  ;;  %v5698_v59 = vld [vmem:[#allocation2 + $0x167] sm:$0xff] }
 0x15e   : > { %854 = vst [vmem:[#allocation2 + $0x1d0] sm:$0xff] %v5630_v15  ;;  %1673 = vmatprep.mubr.f32.mxu1 %v5636_v20  ;;  %3899 = vmatpush1.bf16.msra.mxu1 %v3898_v4  ;;  %v5694_v62 = vld [vmem:[#allocation2 + $0x131] sm:$0xff]  ;;  %v5709_v7 = vld [vmem:[#allocation2 + $0x149] sm:$0xff] }
 0x15f   : > { %v4431_v14 = vpop.eup %4430  ;;  %1429 = vmatmul.mubr.f32.gmra.mrb[58].mxu0 %v5640_v6  ;;  %3900 = vmatprep.subr.bf16.mxu1 %v4793_v5  ;;  %v5724_v55 = vld [vmem:[#allocation2 + $0x151] sm:$0xff]  ;;  %v5728_v46 = vld [vmem:[#allocation2 + $0x187] sm:$0xff] }
 0x160   : > { %v4433_v21 = vpop.eup %4432  ;;  %v5651_v29 = vmul.f32 %v4431_v14, %v5462_v16  ;;  %1433 = vmatprep.mubr.f32.mxu0 %v5466_v17  ;;  %v1226_v16 = vld [vmem:[%s6832_s3 + $0x270] sm:$0xff]  ;;  %v1227_v17 = vld [vmem:[%s6832_s3 + $0x278] sm:$0xff]  ;;  %v1232_v14 = vld [vmem:[%s6832_s3 + $0x2a0] sm:$0xff] }
 0x161   : > { %v5657_v31 = vmul.f32 %v4433_v21, %v5476_v19  ;;  %1674 = vmatmul.mubr.f32.gmra.mrb[10].mxu1 %v5653_v25  ;;  %v3907_v4 = vpack.c.bf16 %v1227_v17, %v1226_v16  ;;  %v1234_v21 = vld [vmem:[%s6832_s3 + $0x2b0] sm:$0xff]  ;;  %v1236_v16 = vld [vmem:[%s6832_s3 + $0x2c0] sm:$0xff]  ;;  %v1237_v17 = vld [vmem:[%s6832_s3 + $0x2c8] sm:$0xff] }
 0x162   : > { %853 = vst [vmem:[#allocation2 + $0x1c8] sm:$0xff] %v5651_v29  ;;  %1678 = vmatprep.mubr.f32.mxu1 %v5660_v37  ;;  %3902 = vmatpush1.bf16.msra.mxu1 %v3901_v24  ;;  %v5713_v24 = vld [vmem:[#allocation2 + $0x16f] sm:$0xff] }
 0x163   : > { %v4435_v33 = vpop.eup %4434  ;;  %856 = vst [vmem:[#allocation2 + $0x1f0] sm:$0xff] %v5657_v31  ;;  %1434 = vmatmul.mubr.f32.gmra.mrb[60].mxu0 %v5516_v18  ;;  %3903 = vmatprep.subr.bf16.mxu1 %v4793_v5 }
 0x164   : > { %v4437_v19 = vpop.eup %4436  ;;  %v5674_v52 = vmul.f32 %v4435_v33, %v5479_v39  ;;  %1438 = vmatprep.mubr.f32.mxu0 %v5454_v11  ;;  %v1228_v11 = vld [vmem:[%s6832_s3 + $0x280] sm:$0xff]  ;;  %v1229_v39 = vld [vmem:[%s6832_s3 + $0x288] sm:$0xff] }
 0x165   : > { %v780_v18 = vmul.f32 %v4437_v19, %v5501_v58  ;;  %1679 = vmatmul.mubr.f32.gmra.mrb[12].mxu1 %v5676_v60  ;;  %v978_v33 = vld [vmem:[#allocation2 + $0x18f] sm:$0xff] }
 0x166   : > { %855 = vst [vmem:[#allocation2 + $0x1e8] sm:$0xff] %v5674_v52  ;;  %1683 = vmatprep.mubr.f32.mxu1 %v5681_v40  ;;  %3905 = vmatpush1.bf16.msra.mxu1 %v3904_v26  ;;  %v5739_v26 = vld [vmem:[#allocation2 + $0x169] sm:$0xff]  ;;  %v5751_v19 = vld [vmem:[#allocation2 + $0x171] sm:$0xff] }
 0x167   : > { %v4439_v43 = vpop.eup %4438  ;;  %858 = vst [vmem:[#allocation2 + $0x210] sm:$0xff] %v780_v18  ;;  %1439 = vmatmul.mubr.f32.gmra.mrb[62].mxu0 %v5533_v27  ;;  %3906 = vmatprep.subr.bf16.mxu1 %v4793_v5  ;;  %v3910_v27 = vpack.c.bf16 %v1229_v39, %v1228_v11  ;;  %v1238_v18 = vld [vmem:[%s6832_s3 + $0x2d0] sm:$0xff]  ;;  %v1240_v11 = vld [vmem:[%s6832_s3 + $0x2e0] sm:$0xff]  ;;  %v1241_v39 = vld [vmem:[%s6832_s3 + $0x2e8] sm:$0xff] }
 0x168   : > { %v779_v58 = vmul.f32 %v4439_v43, %v5505_v34  ;;  %1443 = vmatprep.mubr.f32.mxu0 %v5488_v49  ;;  %v1230_v34 = vld [vmem:[%s6832_s3 + $0x290] sm:$0xff]  ;;  %v1231_v49 = vld [vmem:[%s6832_s3 + $0x298] sm:$0xff] }
 0x169   : > { %1684 = vmatmul.mubr.f32.gmra.mrb[14].mxu1 %v5694_v62  ;;  %v5763_v43 = vld [vmem:[#allocation2 + $0x189] sm:$0xff] }
 0x16a   : > { %857 = vst [vmem:[#allocation2 + $0x208] sm:$0xff] %v779_v58  ;;  %1688 = vmatprep.mubr.f32.mxu1 %v5698_v59  ;;  %3908 = vmatpush1.bf16.msra.mxu1 %v3907_v4  ;;  %v1239_v4 = vld [vmem:[%s6832_s3 + $0x2d8] sm:$0xff] }
 0x16b   : > { %1444 = vmatmul.mubr.f32.gmra.mrb[64].mxu0 %v5560_v57  ;;  %3909 = vmatprep.subr.bf16.mxu1 %v4793_v5  ;;  %v3913_v57 = vpack.c.bf16 %v1231_v49, %v1230_v34  ;;  %v5775_v58 = vld [vmem:[#allocation2 + $0x191] sm:$0xff]  ;;  %v5787_v49 = vld [vmem:[#allocation2 + $0x1a9] sm:$0xff] }
 0x16c   : > { %1448 = vmatprep.mubr.f32.mxu0 %v5482_v42  ;;  %v1233_v42 = vld [vmem:[%s6832_s3 + $0x2a8] sm:$0xff]  ;;  %v1243_v34 = vld [vmem:[%s6832_s3 + $0x2f8] sm:$0xff] }
 0x16d   : > { %1689 = vmatmul.mubr.f32.gmra.mrb[16].mxu1 %v5709_v7 }
 0x16e   : > { %1693 = vmatprep.mubr.f32.mxu1 %v5713_v24  ;;  %3911 = vmatpush1.bf16.msra.mxu1 %v3910_v27  ;;  %v1242_v27 = vld [vmem:[%s6832_s3 + $0x2f0] sm:$0xff] }
 0x16f   : > { %1449 = vmatmul.mubr.f32.gmra.mrb[66].mxu0 %v5586_v47  ;;  %3912 = vmatprep.subr.bf16.mxu1 %v4793_v5  ;;  %v3916_v47 = vpack.c.bf16 %v1233_v42, %v1232_v14  ;;  %v983_v14 = vld [vmem:[#allocation2 + $0x1e7] sm:$0xff]  ;;  %v5803_v42 = vld [vmem:[#allocation2 + $0x1d1] sm:$0xff] }
 0x170   : > { %1453 = vmatprep.mubr.f32.mxu0 %v5514_v9  ;;  %v1235_v9 = vld [vmem:[%s6832_s3 + $0x2b8] sm:$0xff] }
 0x171   : > { %1694 = vmatmul.mubr.f32.gmra.mrb[18].mxu1 %v5724_v55 }
 0x172   : > { %1698 = vmatprep.mubr.f32.mxu1 %v5728_v46  ;;  %3914 = vmatpush1.bf16.msra.mxu1 %v3913_v57  ;;  %v5793_v57 = vld [vmem:[#allocation2 + $0x1b1] sm:$0xff] }
 0x173   : > { %1454 = vmatmul.mubr.f32.gmra.mrb[68].mxu0 %v5611_v63  ;;  %3915 = vmatprep.subr.bf16.mxu1 %v4793_v5  ;;  %v3919_v63 = vpack.c.bf16 %v1235_v9, %v1234_v21  ;;  %v5817_v21 = vld [vmem:[#allocation2 + $0x1f1] sm:$0xff] }
 0x174   : > { %1458 = vmatprep.mubr.f32.mxu0 %v5508_v44  ;;  %v979_v44 = vld [vmem:[#allocation2 + $0x1a7] sm:$0xff] }
 0x175   : > { %1699 = vmatmul.mubr.f32.gmra.mrb[20].mxu1 %v5739_v26 }
 0x176   : > { %1703 = vmatprep.mubr.f32.mxu1 %v978_v33  ;;  %3917 = vmatpush1.bf16.msra.mxu1 %v3916_v47  ;;  %v1244_v47 = vld [vmem:[%s6832_s3 + $0x300] sm:$0xff] }
 0x177   : > { %1459 = vmatmul.mubr.f32.gmra.mrb[70].mxu0 %v5636_v20  ;;  %3918 = vmatprep.subr.bf16.mxu1 %v4793_v5  ;;  %v3922_v20 = vpack.c.bf16 %v1237_v17, %v1236_v16  ;;  %v987_v16 = vld [vmem:[#allocation2 + $0x28] sm:$0xff] }
 0x178   : > { %1463 = vmatprep.mubr.f32.mxu0 %v5551_v51  ;;  %v980_v51 = vld [vmem:[#allocation2 + $0x1af] sm:$0xff] }
 0x179   : > { %1704 = vmatmul.mubr.f32.gmra.mrb[22].mxu1 %v5751_v19 }
 0x17a   : > { %1708 = vmatprep.mubr.f32.mxu1 %v979_v44  ;;  %3920 = vmatpush1.bf16.msra.mxu1 %v3919_v63  ;;  %v1247_v63 = vld [vmem:[%s6832_s3 + $0x318] sm:$0xff] }
 0x17b   : > { %1464 = vmatmul.mubr.f32.gmra.mrb[72].mxu0 %v5660_v37  ;;  %3921 = vmatprep.subr.bf16.mxu1 %v4793_v5  ;;  %v3925_v37 = vpack.c.bf16 %v1239_v4, %v1238_v18  ;;  %v988_v18 = vld [vmem:[#allocation2 + $0x30] sm:$0xff] }
 0x17c   : > { %1468 = vmatprep.mubr.f32.mxu0 %v5536_v36  ;;  %v981_v36 = vld [vmem:[#allocation2 + $0x1c7] sm:$0xff] }
 0x17d   : > { %1709 = vmatmul.mubr.f32.gmra.mrb[24].mxu1 %v5763_v43 }
 0x17e   : > { %1713 = vmatprep.mubr.f32.mxu1 %v980_v51  ;;  %3923 = vmatpush1.bf16.msra.mxu1 %v3922_v20  ;;  %v1249_v20 = vld [vmem:[%s6832_s3 + $0x328] sm:$0xff] }
 0x17f   : > { %1469 = vmatmul.mubr.f32.gmra.mrb[74].mxu0 %v5681_v40  ;;  %3924 = vmatprep.subr.bf16.mxu1 %v4793_v5  ;;  %v3928_v40 = vpack.c.bf16 %v1241_v39, %v1240_v11  ;;  %v5852_v11 = vld [vmem:[#allocation2 + $0x48] sm:$0xff] }
 0x180   : > { %1473 = vmatprep.mubr.f32.mxu0 %v5564_v3  ;;  %v982_v3 = vld [vmem:[#allocation2 + $0x1cf] sm:$0xff] }
 0x181   : > { %1714 = vmatmul.mubr.f32.gmra.mrb[26].mxu1 %v5775_v58 }
 0x182   : > { %1718 = vmatprep.mubr.f32.mxu1 %v981_v36  ;;  %3926 = vmatpush1.bf16.msra.mxu1 %v3925_v37  ;;  %v1251_v37 = vld [vmem:[%s6832_s3 + $0x338] sm:$0xff] }
 0x183   : > { %1474 = vmatmul.mubr.f32.gmra.mrb[76].mxu0 %v5698_v59  ;;  %3927 = vmatprep.subr.bf16.mxu1 %v4793_v5  ;;  %v3931_v59 = vpack.c.bf16 %v1243_v34, %v1242_v27  ;;  %v1253_v27 = vld [vmem:[%s6832_s3 + $0x348] sm:$0xff]  ;;  %v5872_v34 = vld [vmem:[#allocation2 + $0x50] sm:$0xff] }
 0x184   : > { %1478 = vmatprep.mubr.f32.mxu0 %v5557_v38  ;;  %v5799_v38 = vld [vmem:[#allocation2 + $0x1c9] sm:$0xff] }
 0x185   : > { %1719 = vmatmul.mubr.f32.gmra.mrb[28].mxu1 %v5787_v49 }
 0x186   : > { %1723 = vmatprep.mubr.f32.mxu1 %v982_v3  ;;  %3929 = vmatpush1.bf16.msra.mxu1 %v3928_v40  ;;  %v1279_v40 = vld [vmem:[%s6832_s3 + $0x418] sm:$0xff] }
 0x187   : > { %1479 = vmatmul.mubr.f32.gmra.mrb[78].mxu0 %v5713_v24  ;;  %3930 = vmatprep.subr.bf16.mxu1 %v4793_v5  ;;  %v984_v24 = vld [vmem:[#allocation2 + $0x1ef] sm:$0xff] }
 0x188   : > { %1483 = vmatprep.mubr.f32.mxu0 %v5589_v2  ;;  %v985_v2 = vld [vmem:[#allocation2 + $0x207] sm:$0xff] }
 0x189   : > { %1724 = vmatmul.mubr.f32.gmra.mrb[30].mxu1 %v5793_v57 }
 0x18a   : > { %1728 = vmatprep.mubr.f32.mxu1 %v983_v14  ;;  %3932 = vmatpush1.bf16.msra.mxu1 %v3931_v59  ;;  %v5876_v59 = vld [vmem:[#allocation2 + $0x69] sm:$0xff] }
 0x18b   : > { %1484 = vmatmul.mubr.f32.gmra.mrb[80].mxu0 %v5728_v46  ;;  %3933 = vmatprep.subr.bf16.mxu1 %v4793_v5  ;;  %v5807_v46 = vld [vmem:[#allocation2 + $0x1e9] sm:$0xff] }
 0x18c   : > { %1488 = vmatprep.mubr.f32.mxu0 %v5583_v30  ;;  %v986_v30 = vld [vmem:[#allocation2 + $0x20f] sm:$0xff] }
 0x18d   : > { %1729 = vmatmul.mubr.f32.gmra.mrb[32].mxu1 %v5799_v38 }
 0x18e   : > { %1733 = vmatprep.mubr.f32.mxu1 %v984_v24 }
 0x18f   : > { %1489 = vmatmul.mubr.f32.gmra.mrb[82].mxu0 %v978_v33  ;;  %v1246_v33 = vld [vmem:[%s6832_s3 + $0x310] sm:$0xff] }
 0x190   : > { %1493 = vmatprep.mubr.f32.mxu0 %v5614_v54  ;;  %v1245_v54 = vld [vmem:[%s6832_s3 + $0x308] sm:$0xff]  ;;  %v3937_v17 = vpack.c.bf16 %v1247_v63, %v1246_v33  ;;  %v5897_v33 = vld [vmem:[#allocation2 + $0x71] sm:$0xff] }
 0x191   : > { %1734 = vmatmul.mubr.f32.gmra.mrb[34].mxu1 %v5803_v42  ;;  %v3934_v9 = vpack.c.bf16 %v1245_v54, %v1244_v47  ;;  %v1255_v47 = vld [vmem:[%s6832_s3 + $0x358] sm:$0xff]  ;;  %v5892_v54 = vld [vmem:[#allocation2 + $0x68] sm:$0xff] }
 0x192   : > { %1738 = vmatprep.mubr.f32.mxu1 %v985_v2  ;;  %v1280_v2 = vld [vmem:[%s6832_s3 + $0x420] sm:$0xff] }
 0x193   : > { %1494 = vmatmul.mubr.f32.gmra.mrb[84].mxu0 %v979_v44  ;;  %v1248_v44 = vld [vmem:[%s6832_s3 + $0x320] sm:$0xff] }
 0x194   : > { %1498 = vmatprep.mubr.f32.mxu0 %v5608_v45  ;;  %v5821_v45 = vld [vmem:[#allocation2 + $0x29] sm:$0xff]  ;;  %v3940_v4 = vpack.c.bf16 %v1249_v20, %v1248_v44 }
 0x195   : > { %1739 = vmatmul.mubr.f32.gmra.mrb[36].mxu1 %v5807_v46  ;;  %v1257_v44 = vld [vmem:[%s6832_s3 + $0x368] sm:$0xff]  ;;  %v5913_v20 = vld [vmem:[#allocation2 + $0x70] sm:$0xff] }
 0x196   : > { %1743 = vmatprep.mubr.f32.mxu1 %v986_v30  ;;  %v1281_v30 = vld [vmem:[%s6832_s3 + $0x428] sm:$0xff] }
 0x197   : > { %1499 = vmatmul.mubr.f32.gmra.mrb[86].mxu0 %v980_v51  ;;  %v1250_v51 = vld [vmem:[%s6832_s3 + $0x330] sm:$0xff]  ;;  %v3989_v63 = vpack.c.bf16 %v1281_v30, %v1280_v2 }
 0x198   : > { %1503 = vmatprep.mubr.f32.mxu0 %v5651_v29  ;;  %v5831_v29 = vld [vmem:[#allocation2 + $0x31] sm:$0xff]  ;;  %v3943_v39 = vpack.c.bf16 %v1251_v37, %v1250_v51  ;;  %v1284_v37 = vld [vmem:[%s6832_s3 + $0x440] sm:$0xff]  ;;  %v5959_v30 = vld [vmem:[#allocation2 + $0xa9] sm:$0xff] }
 0x199   : > { %1744 = vmatmul.mubr.f32.gmra.mrb[38].mxu1 %v5817_v21  ;;  %v5955_v2 = vld [vmem:[#allocation2 + $0x90] sm:$0xff] }
 0x19a   : > { %1813 = vmatprep.mubr.f32.mxu1 %v5821_v45 }
 0x19b   : > { %1504 = vmatmul.mubr.f32.gmra.mrb[88].mxu0 %v981_v36  ;;  %v1278_v36 = vld [vmem:[%s6832_s3 + $0x410] sm:$0xff] }
 0x19c   : > { %1508 = vmatprep.mubr.f32.mxu0 %v5630_v15  ;;  %v5842_v15 = vld [vmem:[#allocation2 + $0x49] sm:$0xff] }
 0x19d   : > { %1814 = vmatmul.mubr.f32.vlgmr.msra.gmra.mrb[40].mxu1 %v987_v16 }
 0x19e   : > { %3935 = vmatpush1.bf16.msra.mxu1 %v3934_v9  ;;  %1818 = vmatprep.mubr.f32.mxu1 %v5831_v29  ;;  %v924_v9 = vld [vmem:[#allocation2 + $0x11] sm:$0xff] }
 0x19f   : > { %1509 = vmatmul.mubr.f32.gmra.mrb[90].mxu0 %v982_v3  ;;  %3936 = vmatprep.subr.bf16.mxu1 %v4793_v5  ;;  %v923_v3 = vld [vmem:[#allocation2 + $0x9] sm:$0xff] }
 0x1a0   : > { %1513 = vmatprep.mubr.f32.mxu0 %v5674_v52  ;;  %v5856_v52 = vld [vmem:[#allocation2 + $0x51] sm:$0xff] }
 0x1a1   : > { %1819 = vmatmul.mubr.f32.gmra.mrb[42].mxu1 %v988_v18  ;;  %v5917_v18 = vld [vmem:[#allocation2 + $0x89] sm:$0xff] }
 0x1a2   : > { %1823 = vmatprep.mubr.f32.mxu1 %v5842_v15  ;;  %3938 = vmatpush1.bf16.msra.mxu1 %v3937_v17  ;;  %v1282_v17 = vld [vmem:[%s6832_s3 + $0x430] sm:$0xff] }
 0x1a3   : > { %1514 = vmatmul.mubr.f32.gmra.mrb[92].mxu0 %v983_v14  ;;  %3939 = vmatprep.subr.bf16.mxu1 %v4793_v5  ;;  %v3985_v14 = vpack.c.bf16 %v1279_v40, %v1278_v36  ;;  %v1259_v36 = vld [vmem:[%s6832_s3 + $0x378] sm:$0xff]  ;;  %v5934_v40 = vld [vmem:[#allocation2 + $0x88] sm:$0xff] }
 0x1a4   : > { %1518 = vmatprep.mubr.f32.mxu0 %v5657_v31  ;;  %v1252_v31 = vld [vmem:[%s6832_s3 + $0x340] sm:$0xff] }
 0x1a5   : > { %1824 = vmatmul.mubr.f32.gmra.mrb[44].mxu1 %v5852_v11 }
 0x1a6   : > { %1828 = vmatprep.mubr.f32.mxu1 %v5856_v52  ;;  %3941 = vmatpush1.bf16.msra.mxu1 %v3940_v4 }
 0x1a7   : > { %1519 = vmatmul.mubr.f32.gmra.mrb[94].mxu0 %v984_v24  ;;  %3942 = vmatprep.subr.bf16.mxu1 %v4793_v5  ;;  %v3946_v24 = vpack.c.bf16 %v1253_v27, %v1252_v31  ;;  %v5938_v31 = vld [vmem:[#allocation2 + $0x91] sm:$0xff] }
 0x1a8   : > { %1588 = vmatprep.mubr.f32.mxu0 %v5381_v8  ;;  %v1254_v8 = vld [vmem:[%s6832_s3 + $0x350] sm:$0xff] }
 0x1a9   : > { %1829 = vmatmul.mubr.f32.gmra.mrb[46].mxu1 %v5872_v34  ;;  %v3949_v16 = vpack.c.bf16 %v1255_v47, %v1254_v8  ;;  %v1286_v27 = vld [vmem:[%s6832_s3 + $0x450] sm:$0xff]  ;;  %v1288_v8 = vld [vmem:[%s6832_s3 + $0x460] sm:$0xff]  ;;  %v1289_v47 = vld [vmem:[%s6832_s3 + $0x468] sm:$0xff] }
 0x1aa   : > { %1833 = vmatprep.mubr.f32.mxu1 %v5876_v59  ;;  %3944 = vmatpush1.bf16.msra.mxu1 %v3943_v39  ;;  %v1285_v39 = vld [vmem:[%s6832_s3 + $0x448] sm:$0xff] }
 0x1ab   : > { %1589 = vmatmul.mubr.f32.vlgmr.msra.gmra.mrb[32].mxu0 %v923_v3  ;;  %3945 = vmatprep.subr.bf16.mxu1 %v4793_v5  ;;  %v1287_v3 = vld [vmem:[%s6832_s3 + $0x458] sm:$0xff] }
 0x1ac   : > { %1593 = vmatprep.mubr.f32.mxu0 %v5398_v22  ;;  %3984 = vmatpush3.bf16.msra.mxu0 %v5437_v56  ;;  %v1283_v22 = vld [vmem:[%s6832_s3 + $0x438] sm:$0xff]  ;;  %v1256_v56 = vld [vmem:[%s6832_s3 + $0x360] sm:$0xff] }
 0x1ad   : > { %1834 = vmatmul.mubr.f32.gmra.mrb[48].mxu1 %v5892_v54  ;;  %3986 = vmatprep.subr.bf16.mxu0 %v3985_v14  ;;  %v3993_v4 = vpack.c.bf16 %v1283_v22, %v1282_v17  ;;  %v3952_v51 = vpack.c.bf16 %v1257_v44, %v1256_v56  ;;  %v5980_v17 = vld [vmem:[#allocation2 + $0xb1] sm:$0xff]  ;;  %v4005_v22 = vpack.c.bf16 %v1289_v47, %v1288_v8  ;;  %v1273_v8 = vld [vmem:[%s6832_s3 + $0x3e8] sm:$0xff] }
 0x1ae   : > { %1838 = vmatprep.mubr.f32.mxu1 %v5897_v33  ;;  %3947 = vmatpush1.bf16.msra.mxu1 %v3946_v24  ;;  %v1261_v24 = vld [vmem:[%s6832_s3 + $0x388] sm:$0xff]  ;;  %v1290_v56 = vld [vmem:[%s6832_s3 + $0x470] sm:$0xff]  ;;  %v1291_v44 = vld [vmem:[%s6832_s3 + $0x478] sm:$0xff] }
 0x1af   : > { %1594 = vmatmul.mubr.f32.gmra.mrb[34].mxu0 %v924_v9  ;;  %3948 = vmatprep.subr.bf16.mxu1 %v4793_v5  ;;  %v6049_v47 = vld [vmem:[#allocation2 + $0xf0] sm:$0xff] }
 0x1b0   : > { %1598 = vmatprep.mubr.f32.mxu0 %v5417_v41  ;;  %3988 = vmatpush3.bf16.msra.mxu0 %v3985_v14  ;;  %v1258_v41 = vld [vmem:[%s6832_s3 + $0x370] sm:$0xff] }
 0x1b1   : > { %1839 = vmatmul.mubr.f32.gmra.mrb[50].mxu1 %v5913_v20  ;;  %3990 = vmatprep.subr.bf16.mxu0 %v3989_v63  ;;  %v3955_v14 = vpack.c.bf16 %v1259_v36, %v1258_v41  ;;  %v1266_v36 = vld [vmem:[%s6832_s3 + $0x3b0] sm:$0xff] }
 0x1b2   : > { %1843 = vmatprep.mubr.f32.mxu1 %v5917_v18  ;;  %3950 = vmatpush1.bf16.msra.mxu1 %v3949_v16  ;;  %v5976_v16 = vld [vmem:[#allocation2 + $0xa8] sm:$0xff] }
 0x1b3   : > { %1599 = vmatmul.mubr.f32.gmra.mrb[36].mxu0 %v5821_v45  ;;  %3951 = vmatprep.subr.bf16.mxu1 %v4793_v5  ;;  %v3997_v45 = vpack.c.bf16 %v1285_v39, %v1284_v37  ;;  %v5997_v37 = vld [vmem:[#allocation2 + $0xb0] sm:$0xff]  ;;  %v4009_v39 = vpack.c.bf16 %v1291_v44, %v1290_v56  ;;  %v1058_v44 = vld [vmem:[#allocation2 + $0xa7] sm:$0xff] }
 0x1b4   : > { %1603 = vmatprep.mubr.f32.mxu0 %v5445_v1  ;;  %3992 = vmatpush3.bf16.msra.mxu0 %v3989_v63  ;;  %v1260_v1 = vld [vmem:[%s6832_s3 + $0x380] sm:$0xff]  ;;  %v1263_v63 = vld [vmem:[%s6832_s3 + $0x398] sm:$0xff] }
 0x1b5   : > { %1844 = vmatmul.mubr.f32.gmra.mrb[52].mxu1 %v5934_v40  ;;  %3994 = vmatprep.subr.bf16.mxu0 %v3993_v4  ;;  %v3958_v9 = vpack.c.bf16 %v1261_v24, %v1260_v1  ;;  %v1271_v1 = vld [vmem:[%s6832_s3 + $0x3d8] sm:$0xff] }
 0x1b6   : > { %1848 = vmatprep.mubr.f32.mxu1 %v5938_v31  ;;  %3953 = vmatpush1.bf16.msra.mxu1 %v3952_v51  ;;  %v1265_v51 = vld [vmem:[%s6832_s3 + $0x3a8] sm:$0xff] }
 0x1b7   : > { %1604 = vmatmul.mubr.f32.gmra.mrb[38].mxu0 %v5831_v29  ;;  %3954 = vmatprep.subr.bf16.mxu1 %v4793_v5  ;;  %v4001_v29 = vpack.c.bf16 %v1287_v3, %v1286_v27  ;;  %v1268_v27 = vld [vmem:[%s6832_s3 + $0x3c0] sm:$0xff]  ;;  %v6023_v3 = vld [vmem:[#allocation2 + $0xd0] sm:$0xff] }
 0x1b8   : > { %1608 = vmatprep.mubr.f32.mxu0 %v5469_v50  ;;  %3996 = vmatpush3.bf16.msra.mxu0 %v3993_v4  ;;  %v1262_v50 = vld [vmem:[%s6832_s3 + $0x390] sm:$0xff] }
 0x1b9   : > { %1849 = vmatmul.mubr.f32.gmra.mrb[54].mxu1 %v5955_v2  ;;  %3998 = vmatprep.subr.bf16.mxu0 %v3997_v45  ;;  %v3961_v4 = vpack.c.bf16 %v1263_v63, %v1262_v50  ;;  %v1275_v50 = vld [vmem:[%s6832_s3 + $0x3f8] sm:$0xff]  ;;  %v6062_v63 = vld [vmem:[#allocation2 + $0x108] sm:$0xff] }
 0x1ba   : > { %1853 = vmatprep.mubr.f32.mxu1 %v5959_v30  ;;  %3956 = vmatpush1.bf16.msra.mxu1 %v3955_v14  ;;  %v1270_v14 = vld [vmem:[%s6832_s3 + $0x3d0] sm:$0xff] }
 0x1bb   : > { %1609 = vmatmul.mubr.f32.gmra.mrb[40].mxu0 %v5842_v15  ;;  %3957 = vmatprep.subr.bf16.mxu1 %v4793_v5  ;;  %v3973_v24 = vpack.c.bf16 %v1271_v1, %v1270_v14 }
 0x1bc   : > { %1613 = vmatprep.mubr.f32.mxu0 %v5485_v48  ;;  %4000 = vmatpush3.bf16.msra.mxu0 %v3997_v45  ;;  %v1264_v48 = vld [vmem:[%s6832_s3 + $0x3a0] sm:$0xff]  ;;  %v6010_v45 = vld [vmem:[#allocation2 + $0xc8] sm:$0xff] }
 0x1bd   : > { %1854 = vmatmul.mubr.f32.gmra.mrb[56].mxu1 %v5976_v16  ;;  %4002 = vmatprep.subr.bf16.mxu0 %v4001_v29  ;;  %v3964_v41 = vpack.c.bf16 %v1265_v51, %v1264_v48  ;;  %v1060_v51 = vld [vmem:[#allocation2 + $0xc7] sm:$0xff] }
 0x1be   : > { %1858 = vmatprep.mubr.f32.mxu1 %v5980_v17  ;;  %3959 = vmatpush1.bf16.msra.mxu1 %v3958_v9  ;;  %v1274_v9 = vld [vmem:[%s6832_s3 + $0x3f0] sm:$0xff] }
 0x1bf   : > { %1614 = vmatmul.mubr.f32.gmra.mrb[42].mxu0 %v5856_v52  ;;  %3960 = vmatprep.subr.bf16.mxu1 %v4793_v5 }
 0x1c0   : > { %1618 = vmatprep.mubr.f32.mxu0 %v5510_v10  ;;  %4004 = vmatpush3.bf16.msra.mxu0 %v4001_v29  ;;  %v1267_v10 = vld [vmem:[%s6832_s3 + $0x3b8] sm:$0xff]  ;;  %v1272_v29 = vld [vmem:[%s6832_s3 + $0x3e0] sm:$0xff] }
 0x1c1   : > { %1859 = vmatmul.mubr.f32.gmra.mrb[58].mxu1 %v5997_v37  ;;  %4006 = vmatprep.subr.bf16.mxu0 %v4005_v22 }
 0x1c2   : > { %1863 = vmatprep.mubr.f32.mxu1 %v5527_v53  ;;  %3962 = vmatpush1.bf16.msra.mxu1 %v3961_v4  ;;  %v3967_v53 = vpack.c.bf16 %v1267_v10, %v1266_v36  ;;  %v1059_v4 = vld [vmem:[#allocation2 + $0xaf] sm:$0xff]  ;;  %v1062_v10 = vld [vmem:[#allocation2 + $0xe7] sm:$0xff] }
 0x1c3   : > { %1619 = vmatmul.mubr.f32.gmra.mrb[44].mxu0 %v5876_v59  ;;  %3963 = vmatprep.subr.bf16.mxu1 %v4793_v5 }
 0x1c4   : > { %1623 = vmatprep.mubr.f32.mxu0 %v5539_v13  ;;  %4008 = vmatpush3.bf16.msra.mxu0 %v4005_v22  ;;  %v1269_v13 = vld [vmem:[%s6832_s3 + $0x3c8] sm:$0xff]  ;;  %v6069_v22 = vld [vmem:[#allocation2 + $0x110] sm:$0xff] }
 0x1c5   : > { %1864 = vmatmul.mubr.f32.gmra.mrb[60].mxu1 %v6010_v45  ;;  %4010 = vmatprep.subr.bf16.mxu0 %v4009_v39 }
 0x1c6   : > { %1868 = vmatprep.mubr.f32.mxu1 %v5553_v28  ;;  %3965 = vmatpush1.bf16.msra.mxu1 %v3964_v41  ;;  %v3970_v28 = vpack.c.bf16 %v1269_v13, %v1268_v27  ;;  %v1061_v41 = vld [vmem:[#allocation2 + $0xcf] sm:$0xff] }
 0x1c7   : > { %1624 = vmatmul.mubr.f32.gmra.mrb[46].mxu0 %v5897_v33  ;;  %3966 = vmatprep.subr.bf16.mxu1 %v4793_v5  ;;  %v1063_v27 = vld [vmem:[#allocation2 + $0xef] sm:$0xff] }
 0x1c8   : > { %1628 = vmatprep.mubr.f32.mxu0 %v5567_v61  ;;  %4012 = vmatpush3.bf16.msra.mxu0 %v4009_v39  ;;  %v6036_v61 = vld [vmem:[#allocation2 + $0xe8] sm:$0xff] }
 0x1c9   : > { %1869 = vmatmul.mubr.f32.gmra.mrb[62].mxu1 %v6023_v3 }
 0x1ca   : > { %1873 = vmatprep.mubr.f32.mxu1 %v5579_v12  ;;  %3968 = vmatpush1.bf16.msra.mxu1 %v3967_v53 }
 0x1cb   : > { %1629 = vmatmul.mubr.f32.gmra.mrb[48].mxu0 %v5917_v18  ;;  %3969 = vmatprep.subr.bf16.mxu1 %v4793_v5 }
 0x1cc   : > { %1633 = vmatprep.mubr.f32.mxu0 %v5592_v23  ;;  %v3976_v23 = vpack.c.bf16 %v1273_v8, %v1272_v29  ;;  %v1066_v8 = vld [vmem:[#allocation2 + $0x127] sm:$0xff] }
 0x1cd   : > { %1874 = vmatmul.mubr.f32.gmra.mrb[0].mxu1 %v6036_v61 }
 0x1ce   : > { %1878 = vmatprep.mubr.f32.mxu1 %v5604_v32  ;;  %3971 = vmatpush1.bf16.msra.mxu1 %v3970_v28  ;;  %v1064_v28 = vld [vmem:[#allocation2 + $0x107] sm:$0xff] }
 0x1cf   : > { %1634 = vmatmul.mubr.f32.gmra.mrb[50].mxu0 %v5938_v31  ;;  %3972 = vmatprep.subr.bf16.mxu1 %v4793_v5 }
 0x1d0   : > { %1638 = vmatprep.mubr.f32.mxu0 %v5617_v35  ;;  %v3979_v35 = vpack.c.bf16 %v1275_v50, %v1274_v9  ;;  %v1067_v9 = vld [vmem:[#allocation2 + $0x12f] sm:$0xff] }
 0x1d1   : > { %1879 = vmatmul.mubr.f32.gmra.mrb[2].mxu1 %v6049_v47 }
 0x1d2   : > { %1883 = vmatprep.mubr.f32.mxu1 %v5632_v0  ;;  %3974 = vmatpush1.bf16.msra.mxu1 %v3973_v24 }
 0x1d3   : > { %1639 = vmatmul.mubr.f32.gmra.mrb[52].mxu0 %v5959_v30  ;;  %3975 = vmatprep.subr.bf16.mxu1 %v4793_v5 }
 0x1d4   : > { %1643 = vmatprep.mubr.f32.mxu0 %v5640_v6  ;;  %v6075_v6 = vld [vmem:[#allocation2 + $0x128] sm:$0xff] }
 0x1d5   : > { %1884 = vmatmul.mubr.f32.gmra.mrb[4].mxu1 %v6062_v63 }
 0x1d6   : > { %1888 = vmatprep.mubr.f32.mxu1 %v5653_v25  ;;  %3977 = vmatpush1.bf16.msra.mxu1 %v3976_v23 }
 0x1d7   : > { %1644 = vmatmul.mubr.f32.gmra.mrb[54].mxu0 %v5980_v17  ;;  %3978 = vmatprep.subr.bf16.mxu1 %v4793_v5  ;;  %v6081_v5 = vld [vmem:[#allocation2 + $0x130] sm:$0xff] }
 0x1d8   : > { %3629 = vmatprep.mubr.f32.mxu0 %v5842_v15  ;;  %v6087_v15 = vld [vmem:[#allocation2 + $0x148] sm:$0xff] }
 0x1d9   : > { %1889 = vmatmul.mubr.f32.gmra.mrb[6].mxu1 %v6069_v22 }
 0x1da   : > { %1893 = vmatprep.mubr.f32.mxu1 %v5676_v60  ;;  %3980 = vmatpush1.bf16.msra.mxu1 %v3979_v35  ;;  %v1068_v35 = vld [vmem:[#allocation2 + $0x147] sm:$0xff] }
 0x1db   : > { %3630 = vmatmul.mubr.f32.vlgmr.msra.gmra.mrb[96].mxu0 %v5856_v52  ;;  %v1124_v52 = vld [vmem:[#allocation2 + $0xc9] sm:$0xff] }
 0x1dc   : > { %3632 = vmatprep.mubr.f32.mxu0 %v5876_v59  ;;  %v6093_v59 = vld [vmem:[#allocation2 + $0x150] sm:$0xff] }
 0x1dd   : > { %1894 = vmatmul.mubr.f32.gmra.mrb[8].mxu1 %v6075_v6 }
 0x1de   : > { %1898 = vmatprep.mubr.f32.mxu1 %v5694_v62 }
 0x1df   : > { %3633 = vmatmul.mubr.f32.gmra.mrb[98].mxu0 %v5897_v33  ;;  %v1125_v33 = vld [vmem:[#allocation2 + $0xd1] sm:$0xff] }
 0x1e0   : > { %3635 = vmatprep.mubr.f32.mxu0 %v5917_v18  ;;  %v6097_v18 = vld [vmem:[#allocation2 + $0x168] sm:$0xff] }
 0x1e1   : > { %1899 = vmatmul.mubr.f32.gmra.mrb[10].mxu1 %v6081_v5 }
 0x1e2   : > { %1903 = vmatprep.mubr.f32.mxu1 %v5709_v7 }
 0x1e3   : > { %3636 = vmatmul.mubr.f32.gmra.mrb[100].mxu0 %v5938_v31  ;;  %v6103_v31 = vld [vmem:[#allocation2 + $0x170] sm:$0xff] }
 0x1e4   : > { %3638 = vmatprep.mubr.f32.mxu0 %v5959_v30  ;;  %v6109_v30 = vld [vmem:[#allocation2 + $0x188] sm:$0xff] }
 0x1e5   : > { %1904 = vmatmul.mubr.f32.gmra.mrb[12].mxu1 %v6087_v15 }
 0x1e6   : > { %1908 = vmatprep.mubr.f32.mxu1 %v5724_v55 }
 0x1e7   : > { %3639 = vmatmul.mubr.f32.gmra.mrb[102].mxu0 %v5980_v17 }
 0x1e8   : > { %3641 = vmatprep.mubr.f32.mxu0 %v1124_v52  ;;  %v1069_v52 = vld [vmem:[#allocation2 + $0x14f] sm:$0xff] }
 0x1e9   : > { %1909 = vmatmul.mubr.f32.gmra.mrb[14].mxu1 %v6093_v59 }
 0x1ea   : > { %1913 = vmatprep.mubr.f32.mxu1 %v5739_v26 }
 0x1eb   : > { %3642 = vmatmul.mubr.f32.gmra.mrb[104].mxu0 %v1125_v33 }
 0x1ec   : > { %3644 = vmatprep.mubr.f32.mxu0 %v5579_v12  ;;  %v6115_v12 = vld [vmem:[#allocation2 + $0x190] sm:$0xff] }
 0x1ed   : > { %1914 = vmatmul.mubr.f32.gmra.mrb[16].mxu1 %v6097_v18 }
 0x1ee   : > { %1918 = vmatprep.mubr.f32.mxu1 %v5751_v19 }
 0x1ef   : > { %3645 = vmatmul.mubr.f32.gmra.mrb[106].mxu0 %v5604_v32  ;;  %v6121_v32 = vld [vmem:[#allocation2 + $0x1a8] sm:$0xff] }
 0x1f0   : > { %3647 = vmatprep.mubr.f32.mxu0 %v5632_v0  ;;  %v6127_v0 = vld [vmem:[#allocation2 + $0x1b0] sm:$0xff] }
 0x1f1   : > { %1919 = vmatmul.mubr.f32.gmra.mrb[18].mxu1 %v6103_v31 }
 0x1f2   : > { %1923 = vmatprep.mubr.f32.mxu1 %v5763_v43 }
 0x1f3   : > { %3648 = vmatmul.mubr.f32.gmra.mrb[108].mxu0 %v5653_v25  ;;  %v6133_v25 = vld [vmem:[#allocation2 + $0x1c8] sm:$0xff] }
 0x1f4   : > { %3650 = vmatprep.mubr.f32.mxu0 %v5676_v60  ;;  %v6139_v60 = vld [vmem:[#allocation2 + $0x1d0] sm:$0xff] }
 0x1f5   : > { %1924 = vmatmul.mubr.f32.gmra.mrb[20].mxu1 %v6109_v30 }
 0x1f6   : > { %1928 = vmatprep.mubr.f32.mxu1 %v5775_v58 }
 0x1f7   : > { %3651 = vmatmul.mubr.f32.gmra.mrb[110].mxu0 %v5694_v62  ;;  %v6145_v62 = vld [vmem:[#allocation2 + $0x1e8] sm:$0xff] }
 0x1f8   : > { %3653 = vmatprep.mubr.f32.mxu0 %v5709_v7  ;;  %v1049_v7 = vld [vmem:[#allocation2 + $0x209] sm:$0xff] }
 0x1f9   : > { %1929 = vmatmul.mubr.f32.gmra.mrb[22].mxu1 %v6115_v12 }
 0x1fa   : > { %1933 = vmatprep.mubr.f32.mxu1 %v5787_v49 }
 0x1fb   : > { %3654 = vmatmul.mubr.f32.gmra.mrb[112].mxu0 %v5724_v55  ;;  %v6151_v55 = vld [vmem:[#allocation2 + $0x1f0] sm:$0xff] }
 0x1fc   : > { %3656 = vmatprep.mubr.f32.mxu0 %v5739_v26  ;;  %v1145_v26 = vld [vmem:[#allocation2 + $0x211] sm:$0xff] }
 0x1fd   : > { %1934 = vmatmul.mubr.f32.gmra.mrb[24].mxu1 %v6121_v32 }
 0x1fe   : > { %1938 = vmatprep.mubr.f32.mxu1 %v5793_v57 }
 0x1ff   : > { %3657 = vmatmul.mubr.f32.gmra.mrb[114].mxu0 %v5751_v19  ;;  %v6154_v19 = vld [vmem:[#allocation2 + $0x208] sm:$0xff] }
 0x200   : > { %3659 = vmatprep.mubr.f32.mxu0 %v5763_v43  ;;  %v1146_v43 = vld [vmem:[#allocation2 + $0x229] sm:$0xff] }
 0x201   : > { %1939 = vmatmul.mubr.f32.gmra.mrb[26].mxu1 %v6127_v0 }
 0x202   : > { %1943 = vmatprep.mubr.f32.mxu1 %v5799_v38 }
 0x203   : > { %3660 = vmatmul.mubr.f32.gmra.mrb[116].mxu0 %v5775_v58  ;;  %v1147_v58 = vld [vmem:[#allocation2 + $0x231] sm:$0xff] }
 0x204   : > { %3662 = vmatprep.mubr.f32.mxu0 %v5787_v49  ;;  %v6157_v49 = vld [vmem:[#allocation2 + $0x210] sm:$0xff] }
 0x205   : > { %1944 = vmatmul.mubr.f32.gmra.mrb[28].mxu1 %v6133_v25 }
 0x206   : > { %1948 = vmatprep.mubr.f32.mxu1 %v5803_v42 }
 0x207   : > { %3663 = vmatmul.mubr.f32.gmra.mrb[118].mxu0 %v5793_v57  ;;  %v1052_v57 = vld [vmem:[#allocation2 + $0x47] sm:$0xff] }
 0x208   : > { %3665 = vmatprep.mubr.f32.mxu0 %v5799_v38  ;;  %v1053_v38 = vld [vmem:[#allocation2 + $0x4f] sm:$0xff] }
 0x209   : > { %1949 = vmatmul.mubr.f32.gmra.mrb[30].mxu1 %v6139_v60 }
 0x20a   : > { %1953 = vmatprep.mubr.f32.mxu1 %v5807_v46 }
 0x20b   : > { %3666 = vmatmul.mubr.f32.gmra.mrb[120].mxu0 %v5803_v42  ;;  %v1054_v42 = vld [vmem:[#allocation2 + $0x67] sm:$0xff] }
 0x20c   : > { %3668 = vmatprep.mubr.f32.mxu0 %v5807_v46  ;;  %v1055_v46 = vld [vmem:[#allocation2 + $0x6f] sm:$0xff] }
 0x20d   : > { %1954 = vmatmul.mubr.f32.gmra.mrb[32].mxu1 %v6145_v62 }
 0x20e   : > { %1958 = vmatprep.mubr.f32.mxu1 %v5817_v21 }
 0x20f   : > { %3669 = vmatmul.mubr.f32.gmra.mrb[122].mxu0 %v5817_v21  ;;  %v1056_v21 = vld [vmem:[#allocation2 + $0x87] sm:$0xff] }
 0x210   : > { %3671 = vmatprep.mubr.f32.mxu0 %v1049_v7 }
 0x211   : > { %1959 = vmatmul.mubr.f32.gmra.mrb[34].mxu1 %v6151_v55 }
 0x212   : > { %1963 = vmatprep.mubr.f32.mxu1 %v1049_v7  ;;  %v1070_v7 = vld [vmem:[#allocation2 + $0x167] sm:$0xff] }
 0x213   : > { %3672 = vmatmul.mubr.f32.gmra.mrb[124].mxu0 %v1145_v26 }
 0x214   : > { %3674 = vmatprep.mubr.f32.mxu0 %v1146_v43  ;;  %v1071_v43 = vld [vmem:[#allocation2 + $0x16f] sm:$0xff] }
 0x215   : > { %1964 = vmatmul.mubr.f32.gmra.mrb[36].mxu1 %v6154_v19 }
 0x216   : > { %1968 = vmatprep.mubr.f32.mxu1 %v1145_v26 }
 0x217   : > { %3675 = vmatmul.mubr.f32.gmra.mrb[126].mxu0 %v1147_v58 }
 0x219   : > { %1969 = vmatmul.mubr.f32.gmra.mrb[38].mxu1 %v6157_v49 }
 0x21a   : > { %2038 = vmatprep.mubr.f32.mxu1 %v5852_v11 }
 0x21d   : > { %2039 = vmatmul.mubr.f32.vlgmr.msra.gmra.mrb[40].mxu1 %v1052_v57  ;;  %v1072_v57 = vld [vmem:[#allocation2 + $0x187] sm:$0xff] }
 0x21e   : > { %2043 = vmatprep.mubr.f32.mxu1 %v5872_v34  ;;  %v1057_v34 = vld [vmem:[#allocation2 + $0x8f] sm:$0xff] }
 0x221   : > { %2044 = vmatmul.mubr.f32.gmra.mrb[42].mxu1 %v1053_v38 }
 0x222   : > { %2048 = vmatprep.mubr.f32.mxu1 %v5892_v54 }
 0x225   : > { %2049 = vmatmul.mubr.f32.gmra.mrb[44].mxu1 %v1054_v42  ;;  %v1073_v42 = vld [vmem:[#allocation2 + $0x18f] sm:$0xff] }
 0x226   : > { %2053 = vmatprep.mubr.f32.mxu1 %v5913_v20 }
 0x229   : > { %2054 = vmatmul.mubr.f32.gmra.mrb[46].mxu1 %v1055_v46 }
 0x22a   : > { %2058 = vmatprep.mubr.f32.mxu1 %v5934_v40 }
 0x22d   : > { %2059 = vmatmul.mubr.f32.gmra.mrb[48].mxu1 %v1056_v21  ;;  %v1074_v21 = vld [vmem:[#allocation2 + $0x1a7] sm:$0xff] }
 0x22e   : > { %2063 = vmatprep.mubr.f32.mxu1 %v5955_v2  ;;  %v6166_v11 = vpop.f32.mrb[56].mxu0 }
 0x22f   : > { %v1427_v17 = vpop.f32.mrb[57].mxu0 }
 0x231   : > { %2064 = vmatmul.mubr.f32.gmra.mrb[50].mxu1 %v1057_v34  ;;  %v1075_v34 = vld [vmem:[#allocation2 + $0x1af] sm:$0xff] }
 0x232   : > { %2068 = vmatprep.mubr.f32.mxu1 %v5976_v16  ;;  %v6169_v54 = vpop.f32.mrb[58].mxu0 }
 0x233   : > { %v1432_v56 = vpop.f32.mrb[59].mxu0 }
 0x235   : > { %2069 = vmatmul.mubr.f32.gmra.mrb[52].mxu1 %v1058_v44 }
 0x236   : > { %2073 = vmatprep.mubr.f32.mxu1 %v5997_v37  ;;  %v6172_v20 = vpop.f32.mrb[60].mxu0 }
 0x237   : > { %v1437_v40 = vpop.f32.mrb[61].mxu0 }
 0x239   : > { %2074 = vmatmul.mubr.f32.gmra.mrb[54].mxu1 %v1059_v4  ;;  %v2650_v4 = vld [vmem:[%s6834_s5 + $0x10] sm:$0xff] }
 0x23a   : > { %2078 = vmatprep.mubr.f32.mxu1 %v6010_v45  ;;  %v6175_v2 = vpop.f32.mrb[62].mxu0 }
 0x23b   : > { %v1442_v48 = vpop.f32.mrb[63].mxu0 }
 0x23c   : > { %v2651_v48 = vld [vmem:[%s6834_s5 + $0x18] sm:$0xff] }
 0x23d   : > { %2079 = vmatmul.mubr.f32.gmra.mrb[56].mxu1 %v1060_v51 }
 0x23e   : > { %2083 = vmatprep.mubr.f32.mxu1 %v6023_v3  ;;  %v6178_v16 = vpop.f32.mrb[64].mxu0 }
 0x23f   : > { %v1447_v39 = vpop.f32.mrb[65].mxu0 }
 0x241   : > { %2084 = vmatmul.mubr.f32.gmra.mrb[58].mxu1 %v1061_v41  ;;  %v1077_v41 = vld [vmem:[#allocation2 + $0x1cf] sm:$0xff] }
 0x242   : > { %2088 = vmatprep.mubr.f32.mxu1 %v6036_v61  ;;  %v6181_v37 = vpop.f32.mrb[66].mxu0  ;;  %v1065_v61 = vld [vmem:[#allocation2 + $0x10f] sm:$0xff] }
 0x243   : > { %v1452_v36 = vpop.f32.mrb[67].mxu0 }
 0x244   : > { %v2652_v36 = vld [vmem:[%s6834_s5 + $0x20] sm:$0xff] }
 0x245   : > { %2089 = vmatmul.mubr.f32.gmra.mrb[60].mxu1 %v1062_v10  ;;  %v2653_v10 = vld [vmem:[%s6834_s5 + $0x28] sm:$0xff] }
 0x246   : > { %2093 = vmatprep.mubr.f32.mxu1 %v6049_v47  ;;  %v6184_v45 = vpop.f32.mrb[68].mxu0 }
 0x247   : > { %v1457_v53 = vpop.f32.mrb[69].mxu0 }
 0x249   : > { %2094 = vmatmul.mubr.f32.gmra.mrb[62].mxu1 %v1063_v27 }
 0x24a   : > { %2098 = vmatprep.mubr.f32.mxu1 %v6062_v63  ;;  %v6187_v13 = vpop.f32.mrb[70].mxu0 }
 0x24b   : > { %v1462_v3 = vpop.f32.mrb[71].mxu0 }
 0x24c   : > { %v1078_v3 = vld [vmem:[#allocation2 + $0x1e7] sm:$0xff] }
 0x24d   : > { %2099 = vmatmul.mubr.f32.gmra.mrb[0].mxu1 %v1064_v28  ;;  %v2654_v28 = vld [vmem:[%s6834_s5 + $0x30] sm:$0xff] }
 0x24e   : > { %2103 = vmatprep.mubr.f32.mxu1 %v6069_v22  ;;  %v6190_v14 = vpop.f32.mrb[72].mxu0 }
 0x24f   : > { %v1467_v1 = vpop.f32.mrb[73].mxu0 }
 0x250   : > { %v2655_v1 = vld [vmem:[%s6834_s5 + $0x38] sm:$0xff] }
 0x251   : > { %2104 = vmatmul.mubr.f32.gmra.mrb[2].mxu1 %v1065_v61 }
 0x252   : > { %2108 = vmatprep.mubr.f32.mxu1 %v6075_v6  ;;  %v6193_v24 = vpop.f32.mrb[74].mxu0 }
 0x253   : > { %v1472_v29 = vpop.f32.mrb[75].mxu0 }
 0x255   : > { %2109 = vmatmul.mubr.f32.gmra.mrb[4].mxu1 %v1066_v8  ;;  %v1079_v8 = vld [vmem:[#allocation2 + $0x1ef] sm:$0xff] }
 0x256   : > { %2113 = vmatprep.mubr.f32.mxu1 %v6081_v5  ;;  %v6196_v47 = vpop.f32.mrb[76].mxu0 }
 0x257   : > { %v1477_v23 = vpop.f32.mrb[77].mxu0 }
 0x258   : > { %v2656_v23 = vld [vmem:[%s6834_s5 + $0x40] sm:$0xff] }
 0x259   : > { %2114 = vmatmul.mubr.f32.gmra.mrb[6].mxu1 %v1067_v9  ;;  %v2657_v9 = vld [vmem:[%s6834_s5 + $0x48] sm:$0xff] }
 0x25a   : > { %2118 = vmatprep.mubr.f32.mxu1 %v6087_v15  ;;  %v6199_v50 = vpop.f32.mrb[78].mxu0 }
 0x25b   : > { %v1482_v63 = vpop.f32.mrb[79].mxu0 }
 0x25d   : > { %2119 = vmatmul.mubr.f32.gmra.mrb[8].mxu1 %v1068_v35 }
 0x25e   : > { %2123 = vmatprep.mubr.f32.mxu1 %v6093_v59  ;;  %v6202_v22 = vpop.f32.mrb[80].mxu0 }
 0x25f   : > { %v1487_v6 = vpop.f32.mrb[81].mxu0 }
 0x260   : > { %v1080_v6 = vld [vmem:[#allocation2 + $0x207] sm:$0xff] }
 0x261   : > { %2124 = vmatmul.mubr.f32.gmra.mrb[10].mxu1 %v1069_v52  ;;  %v2658_v52 = vld [vmem:[%s6834_s5 + $0x50] sm:$0xff] }
 0x262   : > { %2128 = vmatprep.mubr.f32.mxu1 %v6097_v18  ;;  %v6205_v5 = vpop.f32.mrb[82].mxu0 }
 0x263   : > { %6839 = vst [vmem:[#allocation6_spill] sm:$0xff] %v6205_v5  ;;  %v1492_v33 = vpop.f32.mrb[83].mxu0 }
 0x264   : > { %v2659_v33 = vld [vmem:[%s6834_s5 + $0x58] sm:$0xff] }
 0x265   : > { %2129 = vmatmul.mubr.f32.gmra.mrb[12].mxu1 %v1070_v7 }
 0x266   : > { %2133 = vmatprep.mubr.f32.mxu1 %v6103_v31  ;;  %v6208_v15 = vpop.f32.mrb[84].mxu0 }
 0x267   : > { %6840 = vst [vmem:[#allocation7_spill] sm:$0xff] %v6208_v15  ;;  %v1497_v26 = vpop.f32.mrb[85].mxu0 }
 0x269   : > { %2134 = vmatmul.mubr.f32.gmra.mrb[14].mxu1 %v1071_v43  ;;  %v1081_v43 = vld [vmem:[#allocation2 + $0x20f] sm:$0xff] }
 0x26a   : > { %2138 = vmatprep.mubr.f32.mxu1 %v6109_v30  ;;  %v6211_v59 = vpop.f32.mrb[86].mxu0 }
 0x26b   : > { %6841 = vst [vmem:[#allocation8_spill] sm:$0xff] %v6211_v59  ;;  %v1502_v58 = vpop.f32.mrb[87].mxu0 }
 0x26c   : > { %v2660_v58 = vld [vmem:[%s6834_s5 + $0x60] sm:$0xff] }
 0x26d   : > { %2139 = vmatmul.mubr.f32.gmra.mrb[16].mxu1 %v1072_v57  ;;  %v2661_v57 = vld [vmem:[%s6834_s5 + $0x68] sm:$0xff] }
 0x26e   : > { %2143 = vmatprep.mubr.f32.mxu1 %v6115_v12  ;;  %v6214_v18 = vpop.f32.mrb[88].mxu0  ;;  %v2648_v12 = vld [vmem:[%s6834_s5] sm:$0xff] }
 0x26f   : > { %6842 = vst [vmem:[#allocation9_spill] sm:$0xff] %v6214_v18  ;;  %v1507_v38 = vpop.f32.mrb[89].mxu0 }
 0x271   : > { %2144 = vmatmul.mubr.f32.gmra.mrb[18].mxu1 %v1073_v42  ;;  %v4696_v42 = vld [vmem:[#allocation2 + $0x8] sm:$0xff] }
 0x272   : > { %2148 = vmatprep.mubr.f32.mxu1 %v6121_v32  ;;  %v6217_v31 = vpop.f32.mrb[90].mxu0  ;;  %v2649_v32 = vld [vmem:[%s6834_s5 + $0x8] sm:$0xff] }
 0x273   : > { %6843 = vst [vmem:[#allocation10_spill] sm:$0xff] %v6217_v31  ;;  %v1512_v46 = vpop.f32.mrb[91].mxu0  ;;  %v4013_v44 = vpack.c.bf16 %v2649_v32, %v2648_v12  ;;  %v1083_v32 = vld [vmem:[#allocation2 + $0x22f] sm:$0xff] }
 0x274   : > { %v4037_v46 = vpack.c.bf16 %v2661_v57, %v2660_v58 }
 0x275   : > { %2149 = vmatmul.mubr.f32.gmra.mrb[20].mxu1 %v1074_v21  ;;  %4014 = vmatprep.subr.bf16.mxu0 %v4013_v44 }
 0x276   : > { %2153 = vmatprep.mubr.f32.mxu1 %v6127_v0  ;;  %v6220_v30 = vpop.f32.mrb[92].mxu0  ;;  %v1076_v0 = vld [vmem:[#allocation2 + $0x1c7] sm:$0xff]  ;;  %4016 = vmatpush3.bf16.msra.mxu0 %v4013_v44 }
 0x277   : > { %6844 = vst [vmem:[#allocation11_spill] sm:$0xff] %v6220_v30  ;;  %v1517_v17 = vpop.f32.mrb[93].mxu0 }
 0x278   : > { %v2662_v17 = vld [vmem:[%s6834_s5 + $0x70] sm:$0xff] }
 0x279   : > { %2154 = vmatmul.mubr.f32.gmra.mrb[22].mxu1 %v1075_v34  ;;  %v2663_v34 = vld [vmem:[%s6834_s5 + $0x78] sm:$0xff] }
 0x27a   : > { %2158 = vmatprep.mubr.f32.mxu1 %v6133_v25  ;;  %v6229_v56 = vpop.f32.mrb[94].mxu0  ;;  %v4017_v25 = vpack.c.bf16 %v2651_v48, %v2650_v4  ;;  %v4041_v44 = vpack.c.bf16 %v2663_v34, %v2662_v17 }
 0x27b   : > { %6845 = vst [vmem:[#allocation12_spill] sm:$0xff] %v6229_v56  ;;  %v1522_v40 = vpop.f32.mrb[95].mxu0 }
 0x27c   : > { %4018 = vmatprep.subr.bf16.mxu0 %v4017_v25 }
 0x27d   : > { %2159 = vmatmul.mubr.f32.gmra.mrb[24].mxu1 %v1076_v0  ;;  %4020 = vmatpush3.bf16.msra.mxu0 %v4017_v25 }
 0x27e   : > { %2163 = vmatprep.mubr.f32.mxu1 %v6139_v60  ;;  %v6238_v51 = vpop.f32.mrb[32].mxu0  ;;  %v4021_v60 = vpack.c.bf16 %v2653_v10, %v2652_v36 }
 0x27f   : > { %v1592_v39 = vpop.f32.mrb[33].mxu0 }
 0x280   : > { %4022 = vmatprep.subr.bf16.mxu0 %v4021_v60 }
 0x281   : > { %2164 = vmatmul.mubr.f32.gmra.mrb[26].mxu1 %v1077_v41  ;;  %4024 = vmatpush3.bf16.msra.mxu0 %v4021_v60 }
 0x282   : > { %2168 = vmatprep.mubr.f32.mxu1 %v6145_v62  ;;  %v6247_v53 = vpop.f32.mrb[34].mxu0  ;;  %v4025_v62 = vpack.c.bf16 %v2655_v1, %v2654_v28 }
 0x283   : > { %v1597_v27 = vpop.f32.mrb[35].mxu0 }
 0x284   : > { %4026 = vmatprep.subr.bf16.mxu0 %v4025_v62 }
 0x285   : > { %2169 = vmatmul.mubr.f32.gmra.mrb[28].mxu1 %v1078_v3  ;;  %4028 = vmatpush3.bf16.msra.mxu0 %v4025_v62 }
 0x286   : > { %2173 = vmatprep.mubr.f32.mxu1 %v6151_v55  ;;  %v6256_v61 = vpop.f32.mrb[36].mxu0  ;;  %v4029_v55 = vpack.c.bf16 %v2657_v9, %v2656_v23 }
 0x287   : > { %v1602_v29 = vpop.f32.mrb[37].mxu0 }
 0x288   : > { %4030 = vmatprep.subr.bf16.mxu0 %v4029_v55 }
 0x289   : > { %2174 = vmatmul.mubr.f32.gmra.mrb[30].mxu1 %v1079_v8  ;;  %4032 = vmatpush3.bf16.msra.mxu0 %v4029_v55 }
 0x28a   : > { %2178 = vmatprep.mubr.f32.mxu1 %v6154_v19  ;;  %v6265_v63 = vpop.f32.mrb[38].mxu0  ;;  %v4033_v19 = vpack.c.bf16 %v2659_v33, %v2658_v52 }
 0x28b   : > { %v1607_v35 = vpop.f32.mrb[39].mxu0 }
 0x28c   : > { %4034 = vmatprep.subr.bf16.mxu0 %v4033_v19 }
 0x28d   : > { %2179 = vmatmul.mubr.f32.gmra.mrb[32].mxu1 %v1080_v6  ;;  %4036 = vmatpush3.bf16.msra.mxu0 %v4033_v19 }
 0x28e   : > { %2183 = vmatprep.mubr.f32.mxu1 %v6157_v49  ;;  %v6274_v7 = vpop.f32.mrb[40].mxu0  ;;  %v1082_v49 = vld [vmem:[#allocation2 + $0x227] sm:$0xff]  ;;  %4038 = vmatprep.subr.bf16.mxu0 %v4037_v46 }
 0x28f   : > { %v1612_v26 = vpop.f32.mrb[41].mxu0 }
 0x291   : > { %2184 = vmatmul.mubr.f32.gmra.mrb[34].mxu1 %v1081_v43  ;;  %4040 = vmatpush3.bf16.msra.mxu0 %v4037_v46 }
 0x292   : > { %v6282_v38 = vpop.f32.mrb[42].mxu0  ;;  %2188 = vmatprep.mubr.f32.mxu1 %v4696_v42  ;;  %4042 = vmatprep.subr.bf16.mxu0 %v4041_v44 }
 0x293   : > { %v1617_v21 = vpop.f32.mrb[43].mxu0 }
 0x295   : > { %2189 = vmatmul.mubr.f32.gmra.mrb[36].mxu1 %v1082_v49  ;;  %4044 = vmatpush3.bf16.msra.mxu0 %v4041_v44 }
 0x296   : > { %v6290_v12 = vpop.f32.mrb[44].mxu0  ;;  %2193 = vmatprep.mubr.f32.mxu1 %v4696_v42 }
 0x297   : > { %v1622_v40 = vpop.f32.mrb[45].mxu0 }
 0x299   : > { %2194 = vmatmul.mubr.f32.gmra.mrb[38].mxu1 %v1083_v32 }
 0x29a   : > { %v6292_v0 = vpop.f32.mrb[46].mxu0 }
 0x29b   : > { %v1627_v4 = vpop.f32.mrb[47].mxu0 }
 0x29e   : > { %v6294_v48 = vpop.f32.mrb[48].mxu0 }
 0x29f   : > { %v1632_v25 = vpop.f32.mrb[49].mxu0 }
 0x2a2   : > { %v6296_v39 = vpop.f32.mrb[50].mxu0 }
 0x2a3   : > { %v1637_v41 = vpop.f32.mrb[51].mxu0 }
 0x2a6   : > { %v6298_v36 = vpop.f32.mrb[52].mxu0 }
 0x2a7   : > { %v1642_v10 = vpop.f32.mrb[53].mxu0 }
 0x2a8   : > { %v6357_v10 = vld [vmem:[%s6833_s4] ss:$0 sm:$0xff] }
 0x2aa   : > { %v6300_v60 = vpop.f32.mrb[54].mxu0 }
 0x2ab   : > { %v1647_v27 = vpop.f32.mrb[55].mxu0 }
 0x2ac   : > { %v4077_v27 = vadd.f32 %v6357_v10, %v6238_v51 }
 0x2ae   : > { %v3631_v3 = vpop.f32.mrb[96].mxu0 }
 0x2af   : > { %v2265_v28 = vpop.f32.mrb[97].mxu0 }
 0x2b2   : > { %v3634_v1 = vpop.f32.mrb[98].mxu0 }
 0x2b3   : > { %v2275_v62 = vpop.f32.mrb[99].mxu0 }
 0x2b6   : > { %v6302_v29 = vpop.f32.mrb[100].mxu0 }
 0x2b7   : > { %v6304_v8 = vpop.f32.mrb[101].mxu0 }
 0x2ba   : > { %v6306_v23 = vpop.f32.mrb[102].mxu0 }
 0x2bb   : > { %v6308_v9 = vpop.f32.mrb[103].mxu0 }
 0x2be   : > { %v6310_v55 = vpop.f32.mrb[104].mxu0 }
 0x2bf   : > { %v6312_v35 = vpop.f32.mrb[105].mxu0 }
 0x2c2   : > { %v6314_v6 = vpop.f32.mrb[106].mxu0 }
 0x2c3   : > { %v6316_v52 = vpop.f32.mrb[107].mxu0 }
 0x2c6   : > { %v6318_v33 = vpop.f32.mrb[108].mxu0 }
 0x2c7   : > { %v6320_v19 = vpop.f32.mrb[109].mxu0 }
 0x2ca   : > { %v6322_v26 = vpop.f32.mrb[110].mxu0 }
 0x2cb   : > { %v6324_v43 = vpop.f32.mrb[111].mxu0 }
 0x2ce   : > { %v6326_v58 = vpop.f32.mrb[112].mxu0 }
 0x2cf   : > { %v6328_v57 = vpop.f32.mrb[113].mxu0 }
 0x2d2   : > { %v6330_v42 = vpop.f32.mrb[114].mxu0 }
 0x2d3   : > { %v6332_v49 = vpop.f32.mrb[115].mxu0 }
 0x2d6   : > { %v6334_v46 = vpop.f32.mrb[116].mxu0 }
 0x2d7   : > { %v6336_v21 = vpop.f32.mrb[117].mxu0 }
 0x2da   : > { %v6338_v17 = vpop.f32.mrb[118].mxu0 }
 0x2db   : > { %v6340_v34 = vpop.f32.mrb[119].mxu0 }
 0x2de   : > { %v6342_v32 = vpop.f32.mrb[120].mxu0 }
 0x2df   : > { %6846 = vst [vmem:[#allocation13_spill] sm:$0xff] %v6342_v32  ;;  %v6344_v44 = vpop.f32.mrb[121].mxu0 }
 0x2e0   : > { %6847 = vst [vmem:[#allocation14_spill] sm:$0xff] %v6344_v44  ;;  %v4081_v44 = vadd.f32 %v6357_v10, %v6256_v61 }
 0x2e2   : > { %v6346_v40 = vpop.f32.mrb[122].mxu0 }
 0x2e3   : > { %6848 = vst [vmem:[#allocation15_spill] sm:$0xff] %v6346_v40  ;;  %v6348_v4 = vpop.f32.mrb[123].mxu0 }
 0x2e4   : > { %6849 = vst [vmem:[#allocation16_spill] sm:$0xff] %v6348_v4 }
 0x2e6   : > { %v6350_v25 = vpop.f32.mrb[124].mxu0 }
 0x2e7   : > { %6850 = vst [vmem:[#allocation17_spill] sm:$0xff] %v6350_v25  ;;  %v6352_v41 = vpop.f32.mrb[125].mxu0  ;;  %v4079_v25 = vadd.f32 %v6357_v10, %v6247_v53 }
 0x2e8   : > { %6851 = vst [vmem:[#allocation18_spill] sm:$0xff] %v6352_v41 }
 0x2ea   : > { %v6361_v30 = vpop.f32.mrb[126].mxu0 }
 0x2eb   : > { %6852 = vst [vmem:[#allocation19_spill] sm:$0xff] %v6361_v30  ;;  %v6363_v40 = vpop.f32.mrb[127].mxu0  ;;  %v4083_v30 = vadd.f32 %v6357_v10, %v6265_v63 }
 0x2f0   : > { %v2040_v56 = vpop.f32.mrb[40].mxu1 }
 0x2f1   : > { %v4078_v31 = vadd.f32 %v4077_v27, %v2040_v56  ;;  %v2042_v18 = vpop.f32.mrb[41].mxu1 }
 0x2f3   : > { %v2266_v4 = vadd.f32 %v4078_v31, %v2265_v28 }
 0x2f4   : > { %v2045_v41 = vpop.f32.mrb[42].mxu1 }
 0x2f5   : > { %v3301_v59 = vmul.f32 -1.442695, %v2266_v4  ;;  %v4080_v32 = vadd.f32 %v4079_v25, %v2045_v41  ;;  %v2047_v15 = vpop.f32.mrb[43].mxu1 }
 0x2f7   : > { %4440 = vpow2.f32 %v3301_v59  ;;  %v6369_v51 = vadd.f32 %v4080_v32, %v3631_v3  ;;  %v4085_v59 = vadd.f32 %v6357_v10, %v6274_v7 }
 0x2f8   : > { %v2050_v5 = vpop.f32.mrb[44].mxu1 }
 0x2f9   : > { %v3302_v56 = vmul.f32 -1.442695, %v6369_v51  ;;  %v4082_v18 = vadd.f32 %v4081_v44, %v2050_v5  ;;  %v2052_v27 = vpop.f32.mrb[45].mxu1 }
 0x2fb   : > { %4442 = vpow2.f32 %v3302_v56  ;;  %v6374_v31 = vadd.f32 %v4082_v18, %v2275_v62  ;;  %v4087_v62 = vadd.f32 %v6357_v10, %v6282_v38 }
 0x2fc   : > { %v2055_v53 = vpop.f32.mrb[46].mxu1 }
 0x2fd   : > { %v3303_v15 = vmul.f32 -1.442695, %v6374_v31  ;;  %v4084_v28 = vadd.f32 %v4083_v30, %v2055_v53  ;;  %v2057_v25 = vpop.f32.mrb[47].mxu1 }
 0x2ff   : > { %4444 = vpow2.f32 %v3303_v15  ;;  %v6379_v61 = vadd.f32 %v4084_v28, %v3634_v1  ;;  %v4089_v15 = vadd.f32 %v6357_v10, %v6290_v12 }
 0x300   : > { %v2060_v3 = vpop.f32.mrb[48].mxu1 }
 0x301   : > { %v4441_v5 = vpop.eup %4440  ;;  %v3304_v32 = vmul.f32 -1.442695, %v6379_v61  ;;  %v4086_v44 = vadd.f32 %v4085_v59, %v2060_v3  ;;  %v2062_v63 = vpop.f32.mrb[49].mxu1 }
 0x302   : > { %v2520_v41 = vadd.f32 1.0, %v4441_v5 }
 0x303   : > { %4446 = vpow2.f32 %v3304_v32  ;;  %v6385_v30 = vadd.f32 %v4086_v44, %v6304_v8  ;;  %v4091_v32 = vadd.f32 %v6357_v10, %v6292_v0 }
 0x304   : > { %4448 = vrcp.f32 %v2520_v41  ;;  %v2065_v56 = vpop.f32.mrb[50].mxu1 }
 0x305   : > { %v4443_v7 = vpop.eup %4442  ;;  %v3305_v1 = vmul.f32 -1.442695, %v6385_v30  ;;  %v4088_v18 = vadd.f32 %v4087_v62, %v2065_v56  ;;  %v2067_v27 = vpop.f32.mrb[51].mxu1 }
 0x306   : > { %v2521_v53 = vadd.f32 1.0, %v4443_v7 }
 0x307   : > { %4450 = vpow2.f32 %v3305_v1  ;;  %v6391_v28 = vadd.f32 %v4088_v18, %v6302_v29  ;;  %v4093_v1 = vadd.f32 %v6357_v10, %v6294_v48 }
 0x308   : > { %4452 = vrcp.f32 %v2521_v53  ;;  %v2070_v38 = vpop.f32.mrb[52].mxu1 }
 0x309   : > { %v4445_v25 = vpop.eup %4444  ;;  %v3306_v8 = vmul.f32 -1.442695, %v6391_v28  ;;  %v4090_v59 = vadd.f32 %v4089_v15, %v2070_v38  ;;  %v2072_v3 = vpop.f32.mrb[53].mxu1 }
 0x30a   : > { %v2522_v5 = vadd.f32 1.0, %v4445_v25 }
 0x30b   : > { %4454 = vpow2.f32 %v3306_v8  ;;  %v6397_v44 = vadd.f32 %v4090_v59, %v6308_v9  ;;  %v4095_v59 = vadd.f32 %v6357_v10, %v6296_v39 }
 0x30c   : > { %4456 = vrcp.f32 %v2522_v5  ;;  %v2075_v12 = vpop.f32.mrb[54].mxu1 }
 0x30d   : > { %v4447_v63 = vpop.eup %4446  ;;  %v3307_v29 = vmul.f32 -1.442695, %v6397_v44  ;;  %v4092_v41 = vadd.f32 %v4091_v32, %v2075_v12  ;;  %v2077_v62 = vpop.f32.mrb[55].mxu1 }
 0x30e   : > { %v4449_v56 = vpop.eup %4448  ;;  %v2523_v7 = vadd.f32 1.0, %v4447_v63 }
 0x30f   : > { %4458 = vpow2.f32 %v3307_v29  ;;  %v6403_v18 = vadd.f32 %v4092_v41, %v6306_v23  ;;  %v2616_v0 = vmul.f32 %v4449_v56, %v2266_v4  ;;  %v4097_v41 = vadd.f32 %v6357_v10, %v6298_v36 }
 0x310   : > { %4460 = vrcp.f32 %v2523_v7  ;;  %v2080_v9 = vpop.f32.mrb[56].mxu1 }
 0x311   : > { %v4451_v27 = vpop.eup %4450  ;;  %v3308_v53 = vmul.f32 -1.442695, %v6403_v18  ;;  %v4094_v15 = vadd.f32 %v4093_v1, %v2080_v9  ;;  %v2082_v38 = vpop.f32.mrb[57].mxu1  ;;  %3709 = vmatprep.mubr.f32.mxu0 %v2616_v0 }
 0x312   : > { %v4453_v25 = vpop.eup %4452  ;;  %v2524_v8 = vadd.f32 1.0, %v4451_v27  ;;  %v4099_v27 = vadd.f32 %v6357_v10, %v6300_v60 }
 0x313   : > { %v2617_v48 = vmul.f32 %v4453_v25, %v6369_v51  ;;  %4462 = vpow2.f32 %v3308_v53  ;;  %v6410_v23 = vadd.f32 %v4094_v15, %v6312_v35 }
 0x314   : > { %4464 = vrcp.f32 %v2524_v8  ;;  %v2085_v4 = vpop.f32.mrb[58].mxu1 }
 0x315   : > { %v4455_v3 = vpop.eup %4454  ;;  %v3309_v5 = vmul.f32 -1.442695, %v6410_v23  ;;  %v4096_v32 = vadd.f32 %v4095_v59, %v2085_v4  ;;  %v2087_v12 = vpop.f32.mrb[59].mxu1  ;;  %3710 = vmatmul.mubr.f32.vlgmr.msra.gmra.mrb[128].mxu0 %v2617_v48  ;;  %v1426_v48 = vadd.f32 %v6357_v10, %v6166_v11 }
 0x316   : > { %v4457_v63 = vpop.eup %4456  ;;  %v2525_v29 = vadd.f32 1.0, %v4455_v3 }
 0x317   : > { %4466 = vpow2.f32 %v3309_v5  ;;  %v6416_v39 = vadd.f32 %v4096_v32, %v6310_v55  ;;  %v2618_v35 = vmul.f32 %v4457_v63, %v6374_v31 }
 0x318   : > { %4468 = vrcp.f32 %v2525_v29  ;;  %v2090_v51 = vpop.f32.mrb[60].mxu1  ;;  %v1431_v29 = vadd.f32 %v6357_v10, %v6169_v54 }
 0x319   : > { %v4459_v62 = vpop.eup %4458  ;;  %v3310_v56 = vmul.f32 -1.442695, %v6416_v39  ;;  %v4098_v7 = vadd.f32 %v4097_v41, %v2090_v51  ;;  %v2092_v1 = vpop.f32.mrb[61].mxu1  ;;  %3712 = vmatprep.mubr.f32.mxu0 %v2618_v35 }
 0x31a   : > { %v4461_v0 = vpop.eup %4460  ;;  %v2526_v9 = vadd.f32 1.0, %v4459_v62  ;;  %v1436_v1 = vadd.f32 %v6357_v10, %v6172_v20 }
 0x31b   : > { %4470 = vpow2.f32 %v3310_v56  ;;  %v6423_v36 = vadd.f32 %v4098_v7, %v6316_v52  ;;  %v2619_v55 = vmul.f32 %v4461_v0, %v6379_v61 }
 0x31c   : > { %4472 = vrcp.f32 %v2526_v9  ;;  %v2095_v31 = vpop.f32.mrb[62].mxu1 }
 0x31d   : > { %v4463_v53 = vpop.eup %4462  ;;  %v3311_v15 = vmul.f32 -1.442695, %v6423_v36  ;;  %v4100_v38 = vadd.f32 %v4099_v27, %v2095_v31  ;;  %v2097_v25 = vpop.f32.mrb[63].mxu1  ;;  %3713 = vmatmul.mubr.f32.gmra.mrb[130].mxu0 %v2619_v55 }
 0x31e   : > { %v4465_v8 = vpop.eup %4464  ;;  %v2527_v59 = vadd.f32 1.0, %v4463_v53 }
 0x31f   : > { %4474 = vpow2.f32 %v3311_v15  ;;  %v6430_v60 = vadd.f32 %v4100_v38, %v6314_v6  ;;  %v2620_v52 = vmul.f32 %v4465_v8, %v6385_v30  ;;  %v1441_v15 = vadd.f32 %v6357_v10, %v6175_v2 }
 0x320   : > { %4476 = vrcp.f32 %v2527_v59  ;;  %v2100_v61 = vpop.f32.mrb[0].mxu1 }
 0x321   : > { %v4467_v4 = vpop.eup %4466  ;;  %v3312_v3 = vmul.f32 -1.442695, %v6430_v60  ;;  %v4102_v5 = vadd.f32 %v2100_v61, %v1426_v48  ;;  %v2102_v32 = vpop.f32.mrb[1].mxu1  ;;  %3715 = vmatprep.mubr.f32.mxu0 %v2620_v52  ;;  %v1446_v61 = vadd.f32 %v6357_v10, %v6178_v16 }
 0x322   : > { %v4469_v12 = vpop.eup %4468  ;;  %v2528_v63 = vadd.f32 1.0, %v4467_v4 }
 0x323   : > { %4478 = vpow2.f32 %v3312_v3  ;;  %v6437_v11 = vadd.f32 %v4102_v5, %v6320_v19  ;;  %v2621_v6 = vmul.f32 %v4469_v12, %v6391_v28 }
 0x324   : > { %4480 = vrcp.f32 %v2528_v63  ;;  %v2105_v30 = vpop.f32.mrb[2].mxu1 }
 0x325   : > { %v4471_v41 = vpop.eup %4470  ;;  %v3313_v35 = vmul.f32 -1.442695, %v6437_v11  ;;  %v4104_v51 = vadd.f32 %v2105_v30, %v1431_v29  ;;  %v2107_v62 = vpop.f32.mrb[3].mxu1  ;;  %3716 = vmatmul.mubr.f32.gmra.mrb[132].mxu0 %v2621_v6  ;;  %v1451_v29 = vadd.f32 %v6357_v10, %v6181_v37 }
 0x326   : > { %v4473_v56 = vpop.eup %4472  ;;  %v2529_v7 = vadd.f32 1.0, %v4471_v41 }
 0x327   : > { %4482 = vpow2.f32 %v3313_v35  ;;  %v6444_v54 = vadd.f32 %v4104_v51, %v6318_v33  ;;  %v2622_v19 = vmul.f32 %v4473_v56, %v6397_v44  ;;  %v1456_v56 = vadd.f32 %v6357_v10, %v6184_v45 }
 0x328   : > { %4484 = vrcp.f32 %v2529_v7  ;;  %v2110_v28 = vpop.f32.mrb[4].mxu1 }
 0x329   : > { %v4475_v0 = vpop.eup %4474  ;;  %v3314_v9 = vmul.f32 -1.442695, %v6444_v54  ;;  %v4106_v27 = vadd.f32 %v2110_v28, %v1436_v1  ;;  %v2112_v55 = vpop.f32.mrb[5].mxu1  ;;  %3718 = vmatprep.mubr.f32.mxu0 %v2622_v19 }
 0x32a   : > { %v4477_v31 = vpop.eup %4476  ;;  %v2530_v53 = vadd.f32 1.0, %v4475_v0 }
 0x32b   : > { %4486 = vpow2.f32 %v3314_v9  ;;  %v6451_v20 = vadd.f32 %v4106_v27, %v6324_v43  ;;  %v2623_v33 = vmul.f32 %v4477_v31, %v6403_v18  ;;  %v1461_v27 = vadd.f32 %v6357_v10, %v6187_v13 }
 0x32c   : > { %4488 = vrcp.f32 %v2530_v53  ;;  %v2115_v44 = vpop.f32.mrb[6].mxu1 }
 0x32d   : > { %v4479_v38 = vpop.eup %4478  ;;  %v3315_v25 = vmul.f32 -1.442695, %v6451_v20  ;;  %v4108_v8 = vadd.f32 %v2115_v44, %v1441_v15  ;;  %v2117_v59 = vpop.f32.mrb[7].mxu1  ;;  %3719 = vmatmul.mubr.f32.gmra.mrb[134].mxu0 %v2623_v33 }
 0x32e   : > { %v4481_v48 = vpop.eup %4480  ;;  %v2531_v52 = vadd.f32 1.0, %v4479_v38  ;;  %v1466_v38 = vadd.f32 %v6357_v10, %v6190_v14 }
 0x32f   : > { %4490 = vpow2.f32 %v3315_v25  ;;  %v6458_v2 = vadd.f32 %v4108_v8, %v6322_v26  ;;  %v2624_v43 = vmul.f32 %v4481_v48, %v6410_v23 }
 0x330   : > { %4492 = vrcp.f32 %v2531_v52  ;;  %v2120_v18 = vpop.f32.mrb[8].mxu1 }
 0x331   : > { %v4483_v4 = vpop.eup %4482  ;;  %v3316_v3 = vmul.f32 -1.442695, %v6458_v2  ;;  %v4110_v5 = vadd.f32 %v2120_v18, %v1446_v61  ;;  %v2122_v32 = vpop.f32.mrb[9].mxu1  ;;  %3721 = vmatprep.mubr.f32.mxu0 %v2624_v43  ;;  %v1471_v43 = vadd.f32 %v6357_v10, %v6193_v24 }
 0x332   : > { %v4485_v12 = vpop.eup %4484  ;;  %v2532_v63 = vadd.f32 1.0, %v4483_v4 }
 0x333   : > { %4494 = vpow2.f32 %v3316_v3  ;;  %v6465_v16 = vadd.f32 %v4110_v5, %v6328_v57  ;;  %v2625_v26 = vmul.f32 %v4485_v12, %v6416_v39 }
 0x334   : > { %4496 = vrcp.f32 %v2532_v63  ;;  %v2125_v23 = vpop.f32.mrb[10].mxu1  ;;  %v1476_v63 = vadd.f32 %v6357_v10, %v6196_v47 }
 0x335   : > { %v4487_v6 = vpop.eup %4486  ;;  %v3317_v30 = vmul.f32 -1.442695, %v6465_v16  ;;  %v4112_v41 = vadd.f32 %v2125_v23, %v1451_v29  ;;  %v2127_v35 = vpop.f32.mrb[11].mxu1  ;;  %3722 = vmatmul.mubr.f32.gmra.mrb[136].mxu0 %v2625_v26 }
 0x336   : > { %v4489_v51 = vpop.eup %4488  ;;  %v2533_v62 = vadd.f32 1.0, %v4487_v6  ;;  %v1481_v35 = vadd.f32 %v6357_v10, %v6199_v50 }
 0x337   : > { %4498 = vpow2.f32 %v3317_v30  ;;  %v6472_v37 = vadd.f32 %v4112_v41, %v6326_v58  ;;  %v2626_v57 = vmul.f32 %v4489_v51, %v6423_v36 }
 0x338   : > { %4500 = vrcp.f32 %v2533_v62  ;;  %v2130_v39 = vpop.f32.mrb[12].mxu1 }
 0x339   : > { %v4491_v7 = vpop.eup %4490  ;;  %v3318_v1 = vmul.f32 -1.442695, %v6472_v37  ;;  %v4114_v19 = vadd.f32 %v2130_v39, %v1456_v56  ;;  %v2132_v28 = vpop.f32.mrb[13].mxu1  ;;  %3724 = vmatprep.mubr.f32.mxu0 %v2626_v57 }
 0x33a   : > { %v4493_v0 = vpop.eup %4492  ;;  %v2534_v9 = vadd.f32 1.0, %v4491_v7 }
 0x33b   : > { %4502 = vpow2.f32 %v3318_v1  ;;  %v6479_v45 = vadd.f32 %v4114_v19, %v6332_v49  ;;  %v2627_v58 = vmul.f32 %v4493_v0, %v6430_v60  ;;  %v1486_v1 = vadd.f32 %v6357_v10, %v6202_v22  ;;  %v6854_v22 = vld [vmem:[#allocation14_spill] sm:$0xff] }
 0x33c   : > { %4504 = vrcp.f32 %v2534_v9  ;;  %v2135_v36 = vpop.f32.mrb[14].mxu1 }
 0x33d   : > { %v4495_v55 = vpop.eup %4494  ;;  %v3319_v31 = vmul.f32 -1.442695, %v6479_v45  ;;  %v4116_v53 = vadd.f32 %v2135_v36, %v1461_v27  ;;  %v2137_v15 = vpop.f32.mrb[15].mxu1  ;;  %3725 = vmatmul.mubr.f32.gmra.mrb[138].mxu0 %v2627_v58  ;;  %v6853_v36 = vld [vmem:[#allocation6_spill] sm:$0xff] }
 0x33e   : > { %v4497_v33 = vpop.eup %4496  ;;  %v2535_v44 = vadd.f32 1.0, %v4495_v55  ;;  %v1491_v55 = vadd.f32 %v6357_v10, %v6853_v36 }
 0x33f   : > { %4506 = vpow2.f32 %v3319_v31  ;;  %v6486_v13 = vadd.f32 %v4116_v53, %v6330_v42  ;;  %v2628_v49 = vmul.f32 %v4497_v33, %v6437_v11 }
 0x340   : > { %4508 = vrcp.f32 %v2535_v44  ;;  %v2140_v60 = vpop.f32.mrb[16].mxu1 }
 0x341   : > { %v4499_v25 = vpop.eup %4498  ;;  %v3320_v8 = vmul.f32 -1.442695, %v6486_v13  ;;  %v4118_v59 = vadd.f32 %v2140_v60, %v1466_v38  ;;  %v2142_v48 = vpop.f32.mrb[17].mxu1  ;;  %3727 = vmatprep.mubr.f32.mxu0 %v2628_v49  ;;  %v6855_v60 = vld [vmem:[#allocation7_spill] sm:$0xff] }
 0x342   : > { %v4501_v52 = vpop.eup %4500  ;;  %v2536_v61 = vadd.f32 1.0, %v4499_v25  ;;  %v1496_v25 = vadd.f32 %v6357_v10, %v6855_v60 }
 0x343   : > { %4510 = vpow2.f32 %v3320_v8  ;;  %v6493_v14 = vadd.f32 %v4118_v59, %v6336_v21  ;;  %v2629_v42 = vmul.f32 %v4501_v52, %v6444_v54  ;;  %v6856_v8 = vld [vmem:[#allocation13_spill] sm:$0xff] }
 0x344   : > { %4512 = vrcp.f32 %v2536_v61  ;;  %v2145_v11 = vpop.f32.mrb[18].mxu1 }
 0x345   : > { %v4503_v18 = vpop.eup %4502  ;;  %v3321_v4 = vmul.f32 -1.442695, %v6493_v14  ;;  %v4120_v3 = vadd.f32 %v2145_v11, %v1471_v43  ;;  %v2147_v5 = vpop.f32.mrb[19].mxu1  ;;  %3728 = vmatmul.mubr.f32.gmra.mrb[140].mxu0 %v2629_v42 }
 0x346   : > { %v4505_v32 = vpop.eup %4504  ;;  %v2537_v12 = vadd.f32 1.0, %v4503_v18  ;;  %v6858_v5 = vld [vmem:[#allocation16_spill] sm:$0xff] }
 0x347   : > { %4514 = vpow2.f32 %v3321_v4  ;;  %v6500_v24 = vadd.f32 %v4120_v3, %v6334_v46  ;;  %v2630_v21 = vmul.f32 %v4505_v32, %v6451_v20  ;;  %v6857_v4 = vld [vmem:[#allocation8_spill] sm:$0xff] }
 0x348   : > { %4516 = vrcp.f32 %v2537_v12  ;;  %v2150_v54 = vpop.f32.mrb[20].mxu1  ;;  %v1501_v3 = vadd.f32 %v6357_v10, %v6857_v4  ;;  %v6866_v4 = vld [vmem:[#allocation19_spill] sm:$0xff] }
 0x349   : > { %v4507_v29 = vpop.eup %4506  ;;  %v3322_v26 = vmul.f32 -1.442695, %v6500_v24  ;;  %v4122_v23 = vadd.f32 %v2150_v54, %v1476_v63  ;;  %v2152_v6 = vpop.f32.mrb[21].mxu1  ;;  %3730 = vmatprep.mubr.f32.mxu0 %v2630_v21 }
 0x34a   : > { %v4509_v30 = vpop.eup %4508  ;;  %v2538_v41 = vadd.f32 1.0, %v4507_v29  ;;  %v6859_v6 = vld [vmem:[#allocation9_spill] sm:$0xff] }
 0x34b   : > { %4518 = vpow2.f32 %v3322_v26  ;;  %v6507_v47 = vadd.f32 %v4122_v23, %v6340_v34  ;;  %v2631_v46 = vmul.f32 %v4509_v30, %v6458_v2  ;;  %v1506_v30 = vadd.f32 %v6357_v10, %v6859_v6 }
 0x34c   : > { %4520 = vrcp.f32 %v2538_v41  ;;  %v2155_v20 = vpop.f32.mrb[22].mxu1  ;;  %v6860_v41 = vld [vmem:[#allocation15_spill] sm:$0xff] }
 0x34d   : > { %v4511_v51 = vpop.eup %4510  ;;  %v3323_v62 = vmul.f32 -1.442695, %v6507_v47  ;;  %v4124_v56 = vadd.f32 %v2155_v20, %v1481_v35  ;;  %v2157_v57 = vpop.f32.mrb[23].mxu1  ;;  %3731 = vmatmul.mubr.f32.gmra.mrb[142].mxu0 %v2631_v46 }
 0x34e   : > { %v4513_v39 = vpop.eup %4512  ;;  %v2539_v7 = vadd.f32 1.0, %v4511_v51 }
 0x34f   : > { %4522 = vpow2.f32 %v3323_v62  ;;  %v6514_v50 = vadd.f32 %v4124_v56, %v6338_v17  ;;  %v2632_v34 = vmul.f32 %v4513_v39, %v6465_v16 }
 0x350   : > { %4524 = vrcp.f32 %v2539_v7  ;;  %v2160_v2 = vpop.f32.mrb[24].mxu1  ;;  %v6861_v7 = vld [vmem:[#allocation10_spill] sm:$0xff] }
 0x351   : > { %v4515_v19 = vpop.eup %4514  ;;  %v3324_v28 = vmul.f32 -1.442695, %v6514_v50  ;;  %v4126_v0 = vadd.f32 %v2160_v2, %v1486_v1  ;;  %v2162_v9 = vpop.f32.mrb[25].mxu1  ;;  %3733 = vmatprep.mubr.f32.mxu0 %v2632_v34  ;;  %v1511_v1 = vadd.f32 %v6357_v10, %v6861_v7  ;;  %v6862_v34 = vld [vmem:[#allocation18_spill] sm:$0xff] }
 0x352   : > { %v4517_v27 = vpop.eup %4516  ;;  %v2540_v58 = vadd.f32 1.0, %v4515_v19 }
 0x353   : > { %4526 = vpow2.f32 %v3324_v28  ;;  %v6521_v31 = vadd.f32 %v4126_v0, %v6854_v22  ;;  %v2633_v17 = vmul.f32 %v4517_v27, %v6472_v37 }
 0x354   : > { %4528 = vrcp.f32 %v2540_v58  ;;  %v2165_v16 = vpop.f32.mrb[26].mxu1 }
 0x355   : > { %v4519_v53 = vpop.eup %4518  ;;  %v3325_v15 = vmul.f32 -1.442695, %v6521_v31  ;;  %v4128_v33 = vadd.f32 %v2165_v16, %v1491_v55  ;;  %v2167_v44 = vpop.f32.mrb[27].mxu1  ;;  %3734 = vmatmul.mubr.f32.gmra.mrb[144].mxu0 %v2633_v17  ;;  %v6863_v55 = vld [vmem:[#allocation11_spill] sm:$0xff]  ;;  %v6864_v17 = vld [vmem:[#allocation17_spill] sm:$0xff] }
 0x356   : > { %v4521_v38 = vpop.eup %4520  ;;  %v2541_v49 = vadd.f32 1.0, %v4519_v53  ;;  %v1516_v22 = vadd.f32 %v6357_v10, %v6863_v55 }
 0x357   : > { %4530 = vpow2.f32 %v3325_v15  ;;  %v6528_v59 = vadd.f32 %v4128_v33, %v6856_v8  ;;  %v2634_v48 = vmul.f32 %v4521_v38, %v6479_v45 }
 0x358   : > { %4532 = vrcp.f32 %v2541_v49  ;;  %v2170_v37 = vpop.f32.mrb[28].mxu1 }
 0x359   : > { %v4523_v52 = vpop.eup %4522  ;;  %v3326_v61 = vmul.f32 -1.442695, %v6528_v59  ;;  %v4130_v43 = vadd.f32 %v2170_v37, %v1496_v25  ;;  %v2172_v42 = vpop.f32.mrb[29].mxu1  ;;  %3736 = vmatprep.mubr.f32.mxu0 %v2634_v48  ;;  %v6865_v25 = vld [vmem:[#allocation12_spill] sm:$0xff] }
 0x35a   : > { %v4525_v11 = vpop.eup %4524  ;;  %v2542_v18 = vadd.f32 1.0, %v4523_v52  ;;  %v1521_v8 = vadd.f32 %v6357_v10, %v6865_v25 }
 0x35b   : > { %4534 = vpow2.f32 %v3326_v61  ;;  %v6535_v32 = vadd.f32 %v4130_v43, %v6858_v5  ;;  %v2635_v12 = vmul.f32 %v4525_v11, %v6486_v13 }
 0x35c   : > { %4536 = vrcp.f32 %v2542_v18  ;;  %v2175_v45 = vpop.f32.mrb[30].mxu1 }
 0x35d   : > { %v4527_v63 = vpop.eup %4526  ;;  %v3327_v21 = vmul.f32 -1.442695, %v6535_v32  ;;  %v4132_v54 = vadd.f32 %v2175_v45, %v1501_v3  ;;  %v2177_v29 = vpop.f32.mrb[31].mxu1  ;;  %3737 = vmatmul.mubr.f32.gmra.mrb[146].mxu0 %v2635_v12 }
 0x35e   : > { %v4529_v26 = vpop.eup %4528  ;;  %v2543_v23 = vadd.f32 1.0, %v4527_v63 }
 0x35f   : > { %4538 = vpow2.f32 %v3327_v21  ;;  %v6542_v35 = vadd.f32 %v4132_v54, %v6860_v41  ;;  %v2636_v46 = vmul.f32 %v4529_v26, %v6493_v14 }
 0x360   : > { %4540 = vrcp.f32 %v2543_v23  ;;  %v2180_v13 = vpop.f32.mrb[32].mxu1 }
 0x361   : > { %v4531_v20 = vpop.eup %4530  ;;  %v3328_v51 = vmul.f32 -1.442695, %v6542_v35  ;;  %v4134_v62 = vadd.f32 %v2180_v13, %v1506_v30  ;;  %v2182_v56 = vpop.f32.mrb[33].mxu1  ;;  %3739 = vmatprep.mubr.f32.mxu0 %v2636_v46 }
 0x362   : > { %v4533_v57 = vpop.eup %4532  ;;  %v2544_v39 = vadd.f32 1.0, %v4531_v20 }
 0x363   : > { %4542 = vpow2.f32 %v3328_v51  ;;  %v6549_v2 = vadd.f32 %v4134_v62, %v6862_v34  ;;  %v2637_v19 = vmul.f32 %v4533_v57, %v6500_v24 }
 0x364   : > { %4544 = vrcp.f32 %v2544_v39  ;;  %v2185_v14 = vpop.f32.mrb[34].mxu1 }
 0x365   : > { %v4535_v28 = vpop.eup %4534  ;;  %v3329_v0 = vmul.f32 -1.442695, %v6549_v2  ;;  %v4136_v9 = vadd.f32 %v2185_v14, %v1511_v1  ;;  %v2187_v27 = vpop.f32.mrb[35].mxu1  ;;  %3740 = vmatmul.mubr.f32.gmra.mrb[148].mxu0 %v2637_v19 }
 0x366   : > { %v4537_v58 = vpop.eup %4536  ;;  %v2545_v36 = vadd.f32 1.0, %v4535_v28 }
 0x367   : > { %4546 = vpow2.f32 %v3329_v0  ;;  %v2411_v16 = vadd.f32 %v4136_v9, %v6864_v17  ;;  %v2638_v53 = vmul.f32 %v4537_v58, %v6507_v47 }
 0x368   : > { %4548 = vrcp.f32 %v2545_v36  ;;  %v2190_v24 = vpop.f32.mrb[36].mxu1 }
 0x369   : > { %v4539_v15 = vpop.eup %4538  ;;  %v3330_v33 = vmul.f32 -1.442695, %v2411_v16  ;;  %v4138_v44 = vadd.f32 %v2190_v24, %v1516_v22  ;;  %v2192_v38 = vpop.f32.mrb[37].mxu1  ;;  %3742 = vmatprep.mubr.f32.mxu0 %v2638_v53 }
 0x36a   : > { %v4541_v49 = vpop.eup %4540  ;;  %v2546_v60 = vadd.f32 1.0, %v4539_v15 }
 0x36b   : > { %4550 = vpow2.f32 %v3330_v33  ;;  %v2416_v48 = vadd.f32 %v4138_v44, %v6363_v40  ;;  %v2639_v37 = vmul.f32 %v4541_v49, %v6514_v50 }
 0x36c   : > { %4552 = vrcp.f32 %v2546_v60  ;;  %v2195_v52 = vpop.f32.mrb[38].mxu1 }
 0x36d   : > { %v4543_v47 = vpop.eup %4542  ;;  %v3331_v61 = vmul.f32 -1.442695, %v2416_v48  ;;  %v4140_v43 = vadd.f32 %v2195_v52, %v1521_v8  ;;  %v2197_v42 = vpop.f32.mrb[39].mxu1  ;;  %3743 = vmatmul.mubr.f32.gmra.mrb[150].mxu0 %v2639_v37 }
 0x36e   : > { %v4545_v11 = vpop.eup %4544  ;;  %v2547_v18 = vadd.f32 1.0, %v4543_v47 }
 0x36f   : > { %4554 = vpow2.f32 %v3331_v61  ;;  %v2421_v3 = vadd.f32 %v4140_v43, %v6866_v4  ;;  %v2640_v5 = vmul.f32 %v4545_v11, %v6521_v31  ;;  %v4697_v4 = vld [vmem:[%s4910_s15 + $0x8] sm:$0xff] }
 0x370   : > { %4556 = vrcp.f32 %v2547_v18 }
 0x371   : > { %v4547_v10 = vpop.eup %4546  ;;  %v3332_v12 = vmul.f32 -1.442695, %v2421_v3  ;;  %3745 = vmatprep.mubr.f32.mxu0 %v2640_v5 }
 0x372   : > { %v4549_v40 = vpop.eup %4548  ;;  %v2548_v50 = vadd.f32 1.0, %v4547_v10  ;;  %v4698_v10 = vld [vmem:[%s4910_s15] sm:$0xff] }
 0x373   : > { %4558 = vpow2.f32 %v3332_v12  ;;  %v2641_v45 = vmul.f32 %v4549_v40, %v6528_v59 }
 0x374   : > { %4560 = vrcp.f32 %v2548_v50 }
 0x375   : > { %v4551_v63 = vpop.eup %4550  ;;  %3746 = vmatmul.mubr.f32.gmra.mrb[152].mxu0 %v2641_v45 }
 0x376   : > { %v4553_v21 = vpop.eup %4552  ;;  %v2549_v54 = vadd.f32 1.0, %v4551_v63 }
 0x377   : > { %v2642_v29 = vmul.f32 %v4553_v21, %v6535_v32 }
 0x378   : > { %4562 = vrcp.f32 %v2549_v54 }
 0x379   : > { %v4555_v26 = vpop.eup %4554  ;;  %3748 = vmatprep.mubr.f32.mxu0 %v2642_v29 }
 0x37a   : > { %v4557_v31 = vpop.eup %4556  ;;  %v2550_v23 = vadd.f32 1.0, %v4555_v26 }
 0x37b   : > { %v2643_v6 = vmul.f32 %v4557_v31, %v6542_v35  ;;  %v6570_v35 = vld [vmem:[%s6835_s6] ss:$0 sm:$0xff] }
 0x37c   : > { %4564 = vrcp.f32 %v2550_v23 }
 0x37d   : > { %v4559_v30 = vpop.eup %4558  ;;  %3749 = vmatmul.mubr.f32.gmra.mrb[154].mxu0 %v2643_v6 }
 0x37e   : > { %v4561_v41 = vpop.eup %4560  ;;  %v2551_v46 = vadd.f32 1.0, %v4559_v30 }
 0x37f   : > { %v2644_v59 = vmul.f32 %v4561_v41, %v6549_v2 }
 0x380   : > { %4566 = vrcp.f32 %v2551_v46  ;;  %v4699_v46 = vld [vmem:[%s4910_s15 + $0x18] sm:$0xff] }
 0x381   : > { %3751 = vmatprep.mubr.f32.mxu0 %v2644_v59 }
 0x382   : > { %v4563_v13 = vpop.eup %4562 }
 0x383   : > { %v2645_v20 = vmul.f32 %v4563_v13, %v2411_v16 }
 0x385   : > { %3752 = vmatmul.mubr.f32.gmra.mrb[156].mxu0 %v2645_v20  ;;  %v4700_v20 = vld [vmem:[%s4910_s15 + $0x10] sm:$0xff] }
 0x386   : > { %v4565_v32 = vpop.eup %4564 }
 0x387   : > { %v2646_v51 = vmul.f32 %v4565_v32, %v2416_v48 }
 0x389   : > { %3754 = vmatprep.mubr.f32.mxu0 %v2646_v51 }
 0x38a   : > { %v4567_v62 = vpop.eup %4566 }
 0x38b   : > { %v2647_v56 = vmul.f32 %v4567_v62, %v2421_v3 }
 0x38d   : > { %3755 = vmatmul.mubr.f32.gmra.mrb[158].mxu0 %v2647_v56 }
 0x3e8   : > { %v3711_v57 = vpop.f32.mrb[128].mxu0 }
 0x3e9   : > { %v2743_v39 = vadd.f32 %v3711_v57, %v6570_v35  ;;  %v2737_v7 = vpop.f32.mrb[129].mxu0 }
 0x3ea   : > { %v2738_v1 = vadd.f32 %v6570_v35, %v2737_v7 }
 0x3eb   : > { %v3335_v34 = vmul.f32 -1.442695, %v2743_v39 }
 0x3ec   : > { %v3334_v2 = vmul.f32 -1.442695, %v2738_v1 }
 0x3ed   : > { %4568 = vpow2.f32 %v3335_v34 }
 0x3ee   : > { %4570 = vpow2.f32 %v3334_v2 }
 0x3f0   : > { %v3714_v19 = vpop.f32.mrb[130].mxu0 }
 0x3f1   : > { %v2753_v14 = vadd.f32 %v3714_v19, %v6570_v35  ;;  %v2747_v28 = vpop.f32.mrb[131].mxu0 }
 0x3f2   : > { %v2748_v0 = vadd.f32 %v6570_v35, %v2747_v28 }
 0x3f3   : > { %v3337_v9 = vmul.f32 -1.442695, %v2753_v14 }
 0x3f4   : > { %v3336_v27 = vmul.f32 -1.442695, %v2748_v0 }
 0x3f5   : > { %4572 = vpow2.f32 %v3337_v9  ;;  %v4701_v9 = vld [vmem:[%s4910_s15 + $0x28] sm:$0xff] }
 0x3f6   : > { %4574 = vpow2.f32 %v3336_v27 }
 0x3f7   : > { %v4569_v58 = vpop.eup %4568 }
 0x3f8   : > { %v4571_v36 = vpop.eup %4570  ;;  %v2993_v55 = vadd.f32 1.0, %v4569_v58  ;;  %v3717_v22 = vpop.f32.mrb[132].mxu0 }
 0x3f9   : > { %v2992_v17 = vadd.f32 1.0, %v4571_v36  ;;  %v6577_v16 = vadd.f32 %v3717_v22, %v6570_v35  ;;  %v2757_v53 = vpop.f32.mrb[133].mxu0  ;;  %v4702_v36 = vld [vmem:[%s4910_s15 + $0x20] sm:$0xff] }
 0x3fa   : > { %4576 = vrcp.f32 %v2993_v55  ;;  %v6580_v24 = vadd.f32 %v6570_v35, %v2757_v53 }
 0x3fb   : > { %4578 = vrcp.f32 %v2992_v17  ;;  %v3339_v15 = vmul.f32 -1.442695, %v6577_v16 }
 0x3fc   : > { %v3338_v33 = vmul.f32 -1.442695, %v6580_v24 }
 0x3fd   : > { %4580 = vpow2.f32 %v3339_v15 }
 0x3fe   : > { %4582 = vpow2.f32 %v3338_v33 }
 0x3ff   : > { %v4573_v44 = vpop.eup %4572 }
 0x400   : > { %v4575_v38 = vpop.eup %4574  ;;  %v2995_v49 = vadd.f32 1.0, %v4573_v44  ;;  %v3720_v60 = vpop.f32.mrb[134].mxu0 }
 0x401   : > { %v2994_v25 = vadd.f32 1.0, %v4575_v38  ;;  %v6586_v8 = vadd.f32 %v3720_v60, %v6570_v35  ;;  %v2767_v48 = vpop.f32.mrb[135].mxu0 }
 0x402   : > { %4584 = vrcp.f32 %v2995_v49  ;;  %v6589_v37 = vadd.f32 %v6570_v35, %v2767_v48 }
 0x403   : > { %4586 = vrcp.f32 %v2994_v25  ;;  %v3341_v52 = vmul.f32 -1.442695, %v6586_v8 }
 0x404   : > { %v4577_v47 = vpop.eup %4576  ;;  %v3340_v61 = vmul.f32 -1.442695, %v6589_v37 }
 0x405   : > { %v4579_v43 = vpop.eup %4578  ;;  %v3089_v42 = vmul.f32 %v4577_v47, %v2743_v39  ;;  %4588 = vpow2.f32 %v3341_v52  ;;  %v4703_v52 = vld [vmem:[%s4910_s15 + $0x38] sm:$0xff] }
 0x406   : > { %v3088_v11 = vmul.f32 %v4579_v43, %v2738_v1  ;;  %4590 = vpow2.f32 %v3340_v61  ;;  %v4704_v43 = vld [vmem:[%s4910_s15 + $0x30] sm:$0xff] }
 0x407   : > { %v4581_v18 = vpop.eup %4580  ;;  %v3121_v3 = vadd.f32 %v4697_v4, %v3089_v42 }
 0x408   : > { %v4583_v5 = vpop.eup %4582  ;;  %v3120_v12 = vadd.f32 %v4698_v10, %v3088_v11  ;;  %v2997_v40 = vadd.f32 1.0, %v4581_v18  ;;  %v3723_v50 = vpop.f32.mrb[136].mxu0 }
 0x409   : > { %3153 = vst [vmem:[%s6597_s9 + $0x8] sm:$0xff] %v3121_v3  ;;  %v2996_v45 = vadd.f32 1.0, %v4583_v5  ;;  %v6601_v63 = vadd.f32 %v3723_v50, %v6570_v35  ;;  %v2777_v21 = vpop.f32.mrb[137].mxu0 }
 0x40a   : > { %3152 = vst [vmem:[%s6597_s9] sm:$0xff] %v3120_v12  ;;  %4592 = vrcp.f32 %v2997_v40  ;;  %v6605_v54 = vadd.f32 %v6570_v35, %v2777_v21 }
 0x40b   : > { %4594 = vrcp.f32 %v2996_v45  ;;  %v3343_v29 = vmul.f32 -1.442695, %v6601_v63 }
 0x40c   : > { %v4585_v26 = vpop.eup %4584  ;;  %v3342_v31 = vmul.f32 -1.442695, %v6605_v54 }
 0x40d   : > { %v4587_v23 = vpop.eup %4586  ;;  %v3091_v6 = vmul.f32 %v4585_v26, %v2753_v14  ;;  %4596 = vpow2.f32 %v3343_v29  ;;  %v4705_v29 = vld [vmem:[%s4910_s15 + $0x48] sm:$0xff] }
 0x40e   : > { %v3090_v30 = vmul.f32 %v4587_v23, %v2748_v0  ;;  %4598 = vpow2.f32 %v3342_v31  ;;  %v4706_v23 = vld [vmem:[%s4910_s15 + $0x40] sm:$0xff] }
 0x40f   : > { %v4589_v41 = vpop.eup %4588  ;;  %v3123_v59 = vadd.f32 %v4699_v46, %v3091_v6 }
 0x410   : > { %v4591_v13 = vpop.eup %4590  ;;  %v3122_v32 = vadd.f32 %v4700_v20, %v3090_v30  ;;  %v2999_v51 = vadd.f32 1.0, %v4589_v41  ;;  %v3726_v62 = vpop.f32.mrb[138].mxu0 }
 0x411   : > { %3155 = vst [vmem:[%s6597_s9 + $0x18] sm:$0xff] %v3123_v59  ;;  %v2998_v56 = vadd.f32 1.0, %v4591_v13  ;;  %v6613_v57 = vadd.f32 %v3726_v62, %v6570_v35  ;;  %v2787_v39 = vpop.f32.mrb[139].mxu0 }
 0x412   : > { %3154 = vst [vmem:[%s6597_s9 + $0x10] sm:$0xff] %v3122_v32  ;;  %4600 = vrcp.f32 %v2999_v51  ;;  %v6617_v7 = vadd.f32 %v6570_v35, %v2787_v39 }
 0x413   : > { %4602 = vrcp.f32 %v2998_v56  ;;  %v3345_v1 = vmul.f32 -1.442695, %v6613_v57 }
 0x414   : > { %v4593_v34 = vpop.eup %4592  ;;  %v3344_v2 = vmul.f32 -1.442695, %v6617_v7 }
 0x415   : > { %v4595_v19 = vpop.eup %4594  ;;  %v3093_v14 = vmul.f32 %v4593_v34, %v6577_v16  ;;  %4604 = vpow2.f32 %v3345_v1  ;;  %v4707_v1 = vld [vmem:[%s4910_s15 + $0x58] sm:$0xff] }
 0x416   : > { %v3092_v28 = vmul.f32 %v4595_v19, %v6580_v24  ;;  %4606 = vpow2.f32 %v3344_v2  ;;  %v4708_v19 = vld [vmem:[%s4910_s15 + $0x50] sm:$0xff] }
 0x417   : > { %v4597_v0 = vpop.eup %4596  ;;  %v3125_v27 = vadd.f32 %v4701_v9, %v3093_v14 }
 0x418   : > { %v4599_v58 = vpop.eup %4598  ;;  %v3124_v55 = vadd.f32 %v4702_v36, %v3092_v28  ;;  %v3001_v22 = vadd.f32 1.0, %v4597_v0  ;;  %v3729_v17 = vpop.f32.mrb[140].mxu0 }
 0x419   : > { %3157 = vst [vmem:[%s6597_s9 + $0x28] sm:$0xff] %v3125_v27  ;;  %v3000_v53 = vadd.f32 1.0, %v4599_v58  ;;  %v6627_v15 = vadd.f32 %v3729_v17, %v6570_v35  ;;  %v2797_v16 = vpop.f32.mrb[141].mxu0 }
 0x41a   : > { %3156 = vst [vmem:[%s6597_s9 + $0x20] sm:$0xff] %v3124_v55  ;;  %4608 = vrcp.f32 %v3001_v22  ;;  %v6631_v24 = vadd.f32 %v6570_v35, %v2797_v16 }
 0x41b   : > { %4610 = vrcp.f32 %v3000_v53  ;;  %v3347_v33 = vmul.f32 -1.442695, %v6627_v15 }
 0x41c   : > { %v4601_v44 = vpop.eup %4600  ;;  %v3346_v38 = vmul.f32 -1.442695, %v6631_v24 }
 0x41d   : > { %v4603_v49 = vpop.eup %4602  ;;  %v3095_v60 = vmul.f32 %v4601_v44, %v6586_v8  ;;  %4612 = vpow2.f32 %v3347_v33  ;;  %v4709_v33 = vld [vmem:[%s4910_s15 + $0x68] sm:$0xff] }
 0x41e   : > { %v3094_v25 = vmul.f32 %v4603_v49, %v6589_v37  ;;  %4614 = vpow2.f32 %v3346_v38  ;;  %v4710_v49 = vld [vmem:[%s4910_s15 + $0x60] sm:$0xff] }
 0x41f   : > { %v4605_v48 = vpop.eup %4604  ;;  %v3127_v47 = vadd.f32 %v4703_v52, %v3095_v60 }
 0x420   : > { %v4607_v61 = vpop.eup %4606  ;;  %v3126_v42 = vadd.f32 %v4704_v43, %v3094_v25  ;;  %v3003_v11 = vadd.f32 1.0, %v4605_v48  ;;  %v3732_v18 = vpop.f32.mrb[142].mxu0 }
 0x421   : > { %3159 = vst [vmem:[%s6597_s9 + $0x38] sm:$0xff] %v3127_v47  ;;  %v3002_v4 = vadd.f32 1.0, %v4607_v61  ;;  %v6641_v3 = vadd.f32 %v3732_v18, %v6570_v35  ;;  %v2807_v8 = vpop.f32.mrb[143].mxu0 }
 0x422   : > { %3158 = vst [vmem:[%s6597_s9 + $0x30] sm:$0xff] %v3126_v42  ;;  %4616 = vrcp.f32 %v3003_v11  ;;  %v6645_v37 = vadd.f32 %v6570_v35, %v2807_v8 }
 0x423   : > { %4618 = vrcp.f32 %v3002_v4  ;;  %v3349_v5 = vmul.f32 -1.442695, %v6641_v3 }
 0x424   : > { %v4609_v10 = vpop.eup %4608  ;;  %v3348_v12 = vmul.f32 -1.442695, %v6645_v37 }
 0x425   : > { %v4611_v40 = vpop.eup %4610  ;;  %v3097_v50 = vmul.f32 %v4609_v10, %v6601_v63  ;;  %4620 = vpow2.f32 %v3349_v5  ;;  %v4711_v5 = vld [vmem:[%s4910_s15 + $0x78] sm:$0xff] }
 0x426   : > { %v3096_v45 = vmul.f32 %v4611_v40, %v6605_v54  ;;  %4622 = vpow2.f32 %v3348_v12  ;;  %v4712_v40 = vld [vmem:[%s4910_s15 + $0x70] sm:$0xff] }
 0x427   : > { %v4613_v21 = vpop.eup %4612  ;;  %v3129_v26 = vadd.f32 %v4705_v29, %v3097_v50 }
 0x428   : > { %v4615_v31 = vpop.eup %4614  ;;  %v3128_v6 = vadd.f32 %v4706_v23, %v3096_v45  ;;  %v3005_v30 = vadd.f32 1.0, %v4613_v21  ;;  %v3735_v41 = vpop.f32.mrb[144].mxu0 }
 0x429   : > { %3161 = vst [vmem:[%s6597_s9 + $0x48] sm:$0xff] %v3129_v26  ;;  %v3004_v46 = vadd.f32 1.0, %v4615_v31  ;;  %v6655_v59 = vadd.f32 %v3735_v41, %v6570_v35  ;;  %v2817_v63 = vpop.f32.mrb[145].mxu0 }
 0x42a   : > { %3160 = vst [vmem:[%s6597_s9 + $0x40] sm:$0xff] %v3128_v6  ;;  %4624 = vrcp.f32 %v3005_v30  ;;  %v6659_v54 = vadd.f32 %v6570_v35, %v2817_v63 }
 0x42b   : > { %4626 = vrcp.f32 %v3004_v46  ;;  %v3351_v13 = vmul.f32 -1.442695, %v6655_v59 }
 0x42c   : > { %v4617_v20 = vpop.eup %4616  ;;  %v3350_v32 = vmul.f32 -1.442695, %v6659_v54 }
 0x42d   : > { %v4619_v51 = vpop.eup %4618  ;;  %v3099_v62 = vmul.f32 %v4617_v20, %v6613_v57  ;;  %4628 = vpow2.f32 %v3351_v13  ;;  %v4713_v13 = vld [vmem:[%s4910_s15 + $0x88] sm:$0xff] }
 0x42e   : > { %v3098_v56 = vmul.f32 %v4619_v51, %v6617_v7  ;;  %4630 = vpow2.f32 %v3350_v32  ;;  %v4714_v51 = vld [vmem:[%s4910_s15 + $0x80] sm:$0xff] }
 0x42f   : > { %v4621_v39 = vpop.eup %4620  ;;  %v3131_v34 = vadd.f32 %v4707_v1, %v3099_v62 }
 0x430   : > { %v4623_v2 = vpop.eup %4622  ;;  %v3130_v14 = vadd.f32 %v4708_v19, %v3098_v56  ;;  %v3007_v28 = vadd.f32 1.0, %v4621_v39  ;;  %v3738_v0 = vpop.f32.mrb[146].mxu0 }
 0x431   : > { %3163 = vst [vmem:[%s6597_s9 + $0x58] sm:$0xff] %v3131_v34  ;;  %v3006_v9 = vadd.f32 1.0, %v4623_v2  ;;  %v6669_v27 = vadd.f32 %v3738_v0, %v6570_v35  ;;  %v2827_v57 = vpop.f32.mrb[147].mxu0 }
 0x432   : > { %3162 = vst [vmem:[%s6597_s9 + $0x50] sm:$0xff] %v3130_v14  ;;  %4632 = vrcp.f32 %v3007_v28  ;;  %v6673_v7 = vadd.f32 %v6570_v35, %v2827_v57 }
 0x433   : > { %4634 = vrcp.f32 %v3006_v9  ;;  %v3353_v58 = vmul.f32 -1.442695, %v6669_v27 }
 0x434   : > { %v4625_v36 = vpop.eup %4624  ;;  %v3352_v55 = vmul.f32 -1.442695, %v6673_v7 }
 0x435   : > { %v4627_v22 = vpop.eup %4626  ;;  %v3101_v17 = vmul.f32 %v4625_v36, %v6627_v15  ;;  %4636 = vpow2.f32 %v3353_v58  ;;  %v4715_v58 = vld [vmem:[%s4910_s15 + $0x98] sm:$0xff] }
 0x436   : > { %v3100_v53 = vmul.f32 %v4627_v22, %v6631_v24  ;;  %4638 = vpow2.f32 %v3352_v55  ;;  %v4716_v22 = vld [vmem:[%s4910_s15 + $0x90] sm:$0xff] }
 0x437   : > { %v4629_v16 = vpop.eup %4628  ;;  %v3133_v44 = vadd.f32 %v4709_v33, %v3101_v17 }
 0x438   : > { %v4631_v38 = vpop.eup %4630  ;;  %v3132_v60 = vadd.f32 %v4710_v49, %v3100_v53  ;;  %v3009_v25 = vadd.f32 1.0, %v4629_v16  ;;  %v3741_v48 = vpop.f32.mrb[148].mxu0 }
 0x439   : > { %3165 = vst [vmem:[%s6597_s9 + $0x68] sm:$0xff] %v3133_v44  ;;  %v3008_v52 = vadd.f32 1.0, %v4631_v38  ;;  %v6683_v47 = vadd.f32 %v3741_v48, %v6570_v35  ;;  %v2837_v15 = vpop.f32.mrb[149].mxu0 }
 0x43a   : > { %3164 = vst [vmem:[%s6597_s9 + $0x60] sm:$0xff] %v3132_v60  ;;  %4640 = vrcp.f32 %v3009_v25  ;;  %v6687_v24 = vadd.f32 %v6570_v35, %v2837_v15 }
 0x43b   : > { %4642 = vrcp.f32 %v3008_v52  ;;  %v3355_v61 = vmul.f32 -1.442695, %v6683_v47 }
 0x43c   : > { %v4633_v43 = vpop.eup %4632  ;;  %v3354_v42 = vmul.f32 -1.442695, %v6687_v24 }
 0x43d   : > { %v4635_v11 = vpop.eup %4634  ;;  %v3103_v18 = vmul.f32 %v4633_v43, %v6641_v3  ;;  %4644 = vpow2.f32 %v3355_v61  ;;  %v4717_v61 = vld [vmem:[%s4910_s15 + $0xa8] sm:$0xff] }
 0x43e   : > { %v3102_v4 = vmul.f32 %v4635_v11, %v6645_v37  ;;  %4646 = vpow2.f32 %v3354_v42  ;;  %v4718_v11 = vld [vmem:[%s4910_s15 + $0xa0] sm:$0xff] }
 0x43f   : > { %v4637_v8 = vpop.eup %4636  ;;  %v3135_v10 = vadd.f32 %v4711_v5, %v3103_v18 }
 0x440   : > { %v4639_v12 = vpop.eup %4638  ;;  %v3134_v50 = vadd.f32 %v4712_v40, %v3102_v4  ;;  %v3011_v45 = vadd.f32 1.0, %v4637_v8  ;;  %v3744_v21 = vpop.f32.mrb[150].mxu0 }
 0x441   : > { %3167 = vst [vmem:[%s6597_s9 + $0x78] sm:$0xff] %v3135_v10  ;;  %v3010_v29 = vadd.f32 1.0, %v4639_v12  ;;  %v6697_v26 = vadd.f32 %v3744_v21, %v6570_v35  ;;  %v2847_v3 = vpop.f32.mrb[151].mxu0 }
 0x442   : > { %3166 = vst [vmem:[%s6597_s9 + $0x70] sm:$0xff] %v3134_v50  ;;  %4648 = vrcp.f32 %v3011_v45  ;;  %v6701_v37 = vadd.f32 %v6570_v35, %v2847_v3 }
 0x443   : > { %4650 = vrcp.f32 %v3010_v29  ;;  %v3357_v31 = vmul.f32 -1.442695, %v6697_v26 }
 0x444   : > { %v4641_v23 = vpop.eup %4640  ;;  %v3356_v6 = vmul.f32 -1.442695, %v6701_v37 }
 0x445   : > { %v4643_v30 = vpop.eup %4642  ;;  %v3105_v41 = vmul.f32 %v4641_v23, %v6655_v59  ;;  %4652 = vpow2.f32 %v3357_v31  ;;  %v4719_v31 = vld [vmem:[%s4910_s15 + $0xb8] sm:$0xff] }
 0x446   : > { %v3104_v46 = vmul.f32 %v4643_v30, %v6659_v54  ;;  %4654 = vpow2.f32 %v3356_v6  ;;  %v4720_v30 = vld [vmem:[%s4910_s15 + $0xb0] sm:$0xff] }
 0x447   : > { %v4645_v63 = vpop.eup %4644  ;;  %v3137_v20 = vadd.f32 %v4713_v13, %v3105_v41 }
 0x448   : > { %v4647_v32 = vpop.eup %4646  ;;  %v3136_v62 = vadd.f32 %v4714_v51, %v3104_v46  ;;  %v3013_v56 = vadd.f32 1.0, %v4645_v63  ;;  %v3747_v39 = vpop.f32.mrb[152].mxu0 }
 0x449   : > { %3169 = vst [vmem:[%s6597_s9 + $0x88] sm:$0xff] %v3137_v20  ;;  %v3012_v1 = vadd.f32 1.0, %v4647_v32  ;;  %v6711_v34 = vadd.f32 %v3747_v39, %v6570_v35  ;;  %v2857_v59 = vpop.f32.mrb[153].mxu0 }
 0x44a   : > { %3168 = vst [vmem:[%s6597_s9 + $0x80] sm:$0xff] %v3136_v62  ;;  %4656 = vrcp.f32 %v3013_v56  ;;  %v6715_v54 = vadd.f32 %v6570_v35, %v2857_v59 }
 0x44b   : > { %4658 = vrcp.f32 %v3012_v1  ;;  %v3359_v2 = vmul.f32 -1.442695, %v6711_v34 }
 0x44c   : > { %v4649_v19 = vpop.eup %4648  ;;  %v3358_v14 = vmul.f32 -1.442695, %v6715_v54 }
 0x44d   : > { %v4651_v28 = vpop.eup %4650  ;;  %v3107_v0 = vmul.f32 %v4649_v19, %v6669_v27  ;;  %4660 = vpow2.f32 %v3359_v2  ;;  %v4721_v2 = vld [vmem:[%s4910_s15 + $0xc8] sm:$0xff] }
 0x44e   : > { %v3106_v9 = vmul.f32 %v4651_v28, %v6673_v7  ;;  %4662 = vpow2.f32 %v3358_v14  ;;  %v4722_v28 = vld [vmem:[%s4910_s15 + $0xc0] sm:$0xff] }
 0x44f   : > { %v4653_v57 = vpop.eup %4652  ;;  %v3139_v36 = vadd.f32 %v4715_v58, %v3107_v0 }
 0x450   : > { %v4655_v55 = vpop.eup %4654  ;;  %v3138_v17 = vadd.f32 %v4716_v22, %v3106_v9  ;;  %v3015_v53 = vadd.f32 1.0, %v4653_v57  ;;  %v3750_v16 = vpop.f32.mrb[154].mxu0 }
 0x451   : > { %3171 = vst [vmem:[%s6597_s9 + $0x98] sm:$0xff] %v3139_v36  ;;  %v3014_v33 = vadd.f32 1.0, %v4655_v55  ;;  %v6725_v44 = vadd.f32 %v3750_v16, %v6570_v35  ;;  %v2867_v27 = vpop.f32.mrb[155].mxu0  ;;  %v4723_v55 = vld [vmem:[%s4910_s15 + $0xd8] sm:$0xff] }
 0x452   : > { %3170 = vst [vmem:[%s6597_s9 + $0x90] sm:$0xff] %v3138_v17  ;;  %4664 = vrcp.f32 %v3015_v53  ;;  %v6729_v7 = vadd.f32 %v6570_v35, %v2867_v27  ;;  %v4724_v53 = vld [vmem:[%s4910_s15 + $0xd0] sm:$0xff] }
 0x453   : > { %4666 = vrcp.f32 %v3014_v33  ;;  %v3361_v38 = vmul.f32 -1.442695, %v6725_v44 }
 0x454   : > { %v4657_v49 = vpop.eup %4656  ;;  %v3360_v60 = vmul.f32 -1.442695, %v6729_v7 }
 0x455   : > { %v4659_v25 = vpop.eup %4658  ;;  %v3109_v48 = vmul.f32 %v4657_v49, %v6683_v47  ;;  %4668 = vpow2.f32 %v3361_v38 }
 0x456   : > { %v3108_v52 = vmul.f32 %v4659_v25, %v6687_v24  ;;  %4670 = vpow2.f32 %v3360_v60  ;;  %v4725_v60 = vld [vmem:[%s4910_s15 + $0xe8] sm:$0xff] }
 0x457   : > { %v4661_v15 = vpop.eup %4660  ;;  %v3141_v43 = vadd.f32 %v4717_v61, %v3109_v48  ;;  %v4726_v48 = vld [vmem:[%s4910_s15 + $0xe0] sm:$0xff] }
 0x458   : > { %v4663_v42 = vpop.eup %4662  ;;  %v3140_v18 = vadd.f32 %v4718_v11, %v3108_v52  ;;  %v3017_v4 = vadd.f32 1.0, %v4661_v15  ;;  %v3753_v8 = vpop.f32.mrb[156].mxu0  ;;  %v4727_v11 = vld [vmem:[%s4910_s15 + $0xf8] sm:$0xff] }
 0x459   : > { %3173 = vst [vmem:[%s6597_s9 + $0xa8] sm:$0xff] %v3141_v43  ;;  %v3016_v5 = vadd.f32 1.0, %v4663_v42  ;;  %v6739_v10 = vadd.f32 %v3753_v8, %v6570_v35  ;;  %v2877_v47 = vpop.f32.mrb[157].mxu0 }
 0x45a   : > { %3172 = vst [vmem:[%s6597_s9 + $0xa0] sm:$0xff] %v3140_v18  ;;  %4672 = vrcp.f32 %v3017_v4  ;;  %v6743_v24 = vadd.f32 %v6570_v35, %v2877_v47  ;;  %v4728_v4 = vld [vmem:[%s4910_s15 + $0xf0] sm:$0xff] }
 0x45b   : > { %4674 = vrcp.f32 %v3016_v5  ;;  %v3363_v12 = vmul.f32 -1.442695, %v6739_v10 }
 0x45c   : > { %v4665_v40 = vpop.eup %4664  ;;  %v3362_v50 = vmul.f32 -1.442695, %v6743_v24 }
 0x45d   : > { %v4667_v45 = vpop.eup %4666  ;;  %v3111_v21 = vmul.f32 %v4665_v40, %v6697_v26  ;;  %4676 = vpow2.f32 %v3363_v12 }
 0x45e   : > { %v3110_v29 = vmul.f32 %v4667_v45, %v6701_v37  ;;  %4678 = vpow2.f32 %v3362_v50 }
 0x45f   : > { %v4669_v3 = vpop.eup %4668  ;;  %v3143_v23 = vadd.f32 %v4719_v31, %v3111_v21 }
 0x460   : > { %v4671_v6 = vpop.eup %4670  ;;  %v3142_v41 = vadd.f32 %v4720_v30, %v3110_v29  ;;  %v3019_v46 = vadd.f32 1.0, %v4669_v3  ;;  %v3756_v63 = vpop.f32.mrb[158].mxu0 }
 0x461   : > { %3175 = vst [vmem:[%s6597_s9 + $0xb8] sm:$0xff] %v3143_v23  ;;  %v3018_v13 = vadd.f32 1.0, %v4671_v6  ;;  %v2893_v20 = vadd.f32 %v3756_v63, %v6570_v35  ;;  %v2887_v32 = vpop.f32.mrb[159].mxu0 }
 0x462   : > { %3174 = vst [vmem:[%s6597_s9 + $0xb0] sm:$0xff] %v3142_v41  ;;  %4680 = vrcp.f32 %v3019_v46  ;;  %v2888_v26 = vadd.f32 %v6570_v35, %v2887_v32 }
 0x463   : > { %4682 = vrcp.f32 %v3018_v13  ;;  %v3365_v37 = vmul.f32 -1.442695, %v2893_v20 }
 0x464   : > { %v4673_v51 = vpop.eup %4672  ;;  %v3364_v62 = vmul.f32 -1.442695, %v2888_v26 }
 0x465   : > { %v4675_v56 = vpop.eup %4674  ;;  %v3113_v39 = vmul.f32 %v4673_v51, %v6711_v34  ;;  %4684 = vpow2.f32 %v3365_v37 }
 0x466   : > { %v3112_v1 = vmul.f32 %v4675_v56, %v6715_v54  ;;  %4686 = vpow2.f32 %v3364_v62 }
 0x467   : > { %v4677_v59 = vpop.eup %4676  ;;  %v3145_v19 = vadd.f32 %v4721_v2, %v3113_v39 }
 0x468   : > { %v4679_v14 = vpop.eup %4678  ;;  %v3144_v35 = vadd.f32 %v4722_v28, %v3112_v1  ;;  %v3021_v0 = vadd.f32 1.0, %v4677_v59 }
 0x469   : > { %3177 = vst [vmem:[%s6597_s9 + $0xc8] sm:$0xff] %v3145_v19  ;;  %v3020_v9 = vadd.f32 1.0, %v4679_v14 }
 0x46a   : > { %3176 = vst [vmem:[%s6597_s9 + $0xc0] sm:$0xff] %v3144_v35  ;;  %4688 = vrcp.f32 %v3021_v0 }
 0x46b   : > { %4690 = vrcp.f32 %v3020_v9 }
 0x46c   : > { %v4681_v34 = vpop.eup %4680 }
 0x46d   : > { %v4683_v57 = vpop.eup %4682  ;;  %v3115_v54 = vmul.f32 %v4681_v34, %v6725_v44 }
 0x46e   : > { %v3114_v58 = vmul.f32 %v4683_v57, %v6729_v7 }
 0x46f   : > { %v4685_v36 = vpop.eup %4684  ;;  %v3147_v22 = vadd.f32 %v4723_v55, %v3115_v54 }
 0x470   : > { %v4687_v17 = vpop.eup %4686  ;;  %v3146_v16 = vadd.f32 %v4724_v53, %v3114_v58  ;;  %v3023_v33 = vadd.f32 1.0, %v4685_v36 }
 0x471   : > { %3179 = vst [vmem:[%s6597_s9 + $0xd8] sm:$0xff] %v3147_v22  ;;  %v3022_v27 = vadd.f32 1.0, %v4687_v17 }
 0x472   : > { %3178 = vst [vmem:[%s6597_s9 + $0xd0] sm:$0xff] %v3146_v16  ;;  %4692 = vrcp.f32 %v3023_v33 }
 0x473   : > { %4694 = vrcp.f32 %v3022_v27 }
 0x474   : > { %v4689_v44 = vpop.eup %4688 }
 0x475   : > { %v4691_v7 = vpop.eup %4690  ;;  %v3117_v38 = vmul.f32 %v4689_v44, %v6739_v10 }
 0x476   : > { %v3116_v49 = vmul.f32 %v4691_v7, %v6743_v24 }
 0x477   : > { %v3149_v25 = vadd.f32 %v4725_v60, %v3117_v38 }
 0x478   : > { %v3148_v52 = vadd.f32 %v4726_v48, %v3116_v49 }
 0x479   : > { %3181 = vst [vmem:[%s6597_s9 + $0xe8] sm:$0xff] %v3149_v25 }
 0x47a   : > { %3180 = vst [vmem:[%s6597_s9 + $0xe0] sm:$0xff] %v3148_v52 }
 0x47c   : > { %v4693_v15 = vpop.eup %4692 }
 0x47d   : > { %v4695_v61 = vpop.eup %4694  ;;  %v3119_v43 = vmul.f32 %v4693_v15, %v2893_v20 }
 0x47e   : > { %v3118_v42 = vmul.f32 %v4695_v61, %v2888_v26 }
 0x47f   : > { %v3151_v18 = vadd.f32 %v4727_v11, %v3119_v43 }
 0x480   : > { %v3150_v8 = vadd.f32 %v4728_v4, %v3118_v42 }
 0x481   : > { %3183 = vst [vmem:[%s6597_s9 + $0xf8] sm:$0xff] %v3151_v18 }
 0x482   : > { %3182 = vst [vmem:[%s6597_s9 + $0xf0] sm:$0xff] %v3150_v8 }
 0x483   : > { %4742 = shalt.err (!%p4739_p3)
}
 0x484   : > { %s4743_s15 = scalar_lea.hbm %s6779_s18, 4096  ;;  %s4747_s8 = scalar_lea.hbm %s6836_s7, 8192 }
 0x485   : > { %p4744_p4 = scmp.ne.s32.totalorder %s6779_s18, %s4743_s15  ;;  %p4748_p9 = scmp.lt.u32.totalorder %s6779_s18, %s6836_s7 }
 0x486   : > { %p4749_p10 = scmp.lt.u32.totalorder %s4747_s8, %s4743_s15  ;;  %p4751_p12 = scmp.lt.u32.totalorder %s4743_s15, %s6779_s18 }
 0x487   : > { %p4745_p7 = pnand %p4744_p4, %p4876_p5 }
 0x488   : > { %p4750_p11 = por %p4749_p10, %p4748_p9 }
 0x489   : > { %p4746_p8 = pneg %p4745_p7 }
 0x48a   : > { %p4752_p13 = por %p4751_p12, %p4750_p11 }
 0x48c   : > { %p4753_p0 = pnand %p4752_p13, %p4746_p8 }
 0x48e   : > { %4756 = shalt.err (!%p4753_p0)
}
 0x48f   : > { %s4796_s16 = smov 128   ;;  %s4797_s17 = smov 8  }
 0x490   : > { %4269 = dma.vmem_to_hbm [thread:$0]  (%p4876_p5), %s6781_s14, 4096, %s6779_s18, %s6788_s28, %s4796_s16, %s4796_s16, %s4797_s17  }
 0x491 PF: > { %p4275_p1 = scmp.ge.s32.totalorder %s4791_s27, 2  ;;  %s3213_s19 = sand.u32 1, %s4779_s24  }
 0x492   : > { %s3214_s20 = scalar_lea.sflag [#allocation4], %s3213_s19 }
 0x493   : > { %p4272_p2 = pnand %p4275_p1, %p4880_p6 }
 0x495   : > { %4774 = dma.done.wait (!%p4272_p2), %s3214_s20, 4096  }
 0x496   : > { %4776 = vsyncadd (!%p4272_p2), %s3214_s20, 4294963200  ;;  %p17_p3 = scmp.ge.s32.totalorder %s4863_s30, 4   ;;  %s6867_s24 = smov %s4783_s25 }
 0x497   : > { %s6868_s25 = smov %s4787_s26  ;;  %s6869_s26 = smov %s4874_s10 }
 0x498   : > { %s6870_s27 = smov %s4863_s30  ;;  %19 = sbr.rel (!%p17_p3) target bundleno = 3 (0x3), region = 86 }
 0x49f   :  { %3219 = vsyncpa [#allocation4], 1 }
 0x4a0   :  { %3221 = vsyncpa [#allocation4 + $0x1], 1 }

</bundles_post_ra>
